<compile_context>
chip_gen: v7x
topology: tpu7x:2x2x1
jax: 0.10.0
libtpu: 0.0.40
codegen_flags: <defaults>
</compile_context>

<pallas_src>
import functools

import jax
import jax.numpy as jnp
from jax.experimental import pallas as pl
from jax.experimental.pallas import tpu as pltpu


def _cparams(*sems):
    return pltpu.CompilerParams(
        dimension_semantics=tuple(sems),
        vmem_limit_bytes=32 * 1024 * 1024,   # safe on v5e/v6e/v7x
    )


# ---------------------------------------------------------------------------
# BasicBlock: 1x1 conv + ReLU over a "virtual concat" of several 16-ch tensors.
# The concat is never materialized: one matmul per slice, accumulated in f32.
# ---------------------------------------------------------------------------
def _bb_kernel(*refs, n_in):
    xs = refs[:n_in]                            # each (TM, C) bf16
    w_ref, b_ref, o_ref = refs[n_in], refs[n_in + 1], refs[n_in + 2]
    w = w_ref[...]                              # (n_in, C, C) bf16
    acc = jnp.dot(xs[0][...], w[0], preferred_element_type=jnp.float32)
    for k in range(1, n_in):
        acc = acc + jnp.dot(xs[k][...], w[k], preferred_element_type=jnp.float32)
    o_ref[...] = jnp.maximum(acc + b_ref[...], 0.0).astype(o_ref.dtype)


def basic_block(p, xs_nhwc, *, tm=256):
    n, h, w, c = xs_nhwc[0].shape
    m = n * h * w
    n_in = len(xs_nhwc)
    tm = min(tm, m)
    xs2d = [x.reshape(m, c) for x in xs_nhwc]   # pure views, no copies
    out = pl.pallas_call(
        functools.partial(_bb_kernel, n_in=n_in),
        out_shape=jax.ShapeDtypeStruct((m, c), jnp.bfloat16),
        grid=(pl.cdiv(m, tm),),
        in_specs=[pl.BlockSpec((tm, c), lambda i: (i, 0)) for _ in range(n_in)]
                 + [pl.BlockSpec((n_in, c, c), lambda i: (0, 0, 0)),
                    pl.BlockSpec((1, c), lambda i: (0, 0))],
        out_specs=pl.BlockSpec((tm, c), lambda i: (i, 0)),
        compiler_params=_cparams("parallel"),
    )(*xs2d, p["w"], p["b"])
    return out.reshape(n, h, w, c)


# ---------------------------------------------------------------------------
# Fused InvertedResidual: expand(1x1)+ReLU6 -> dw3x3+ReLU6 -> project(1x1)+skip.
# Grid (batch, row-tile); halo rows come from clamped neighbour blocks; the
# expanded activation lives only in a VMEM scratch (W+2 padded).
# ---------------------------------------------------------------------------
def _ir_kernel(xp_ref, xc_ref, xn_ref, we_ref, be_ref, wd_ref, bd_ref,
               wp_ref, bp_ref, o_ref, ep_ref, *, th, width, c, mid, ht):
    i = pl.program_id(1)
    we = we_ref[...]
    be = be_ref[...]

    def expand(v):                              # (r, width, c) bf16 -> (r, width, mid) f32
        r = v.shape[0]
        t = jnp.dot(v.reshape(r * width, c), we, preferred_element_type=jnp.float32)
        return jnp.clip(t + be, 0.0, 6.0).reshape(r, width, mid)

    # --- 1x1 expand (+ReLU6) of the tile rows and their 1-row halos ----------
    # The depthwise zero-padding lives in expanded-activation space, so halo rows
    # at true image borders are zeroed *after* the expand.
    mtop = jnp.where(i > 0, 1.0, 0.0)
    mbot = jnp.where(i < ht - 1, 1.0, 0.0)
    ep_ref[1:th + 1, 1:width + 1, :] = expand(xc_ref[0])
    ep_ref[0:1, 1:width + 1, :] = expand(xp_ref[0, th - 1:th]) * mtop
    ep_ref[th + 1:th + 2, 1:width + 1, :] = expand(xn_ref[0, 0:1]) * mbot
    zcol = jnp.zeros((th + 2, 1, mid), jnp.float32)
    ep_ref[:, 0:1, :] = zcol
    ep_ref[:, width + 1:width + 2, :] = zcol

    # --- 3x3 depthwise (+bias, ReLU6); taps read from the padded VMEM scratch -
    wd = wd_ref[...]                            # (9, mid) f32 (VPU math in f32: v5e-safe)
    acc = jnp.zeros((th, width, mid), jnp.float32)
    for dy in range(3):
        for dx in range(3):
            tap = ep_ref[dy:dy + th, dx:dx + width, :]
            acc = acc + tap * wd[dy * 3 + dx].reshape(1, 1, mid)
    d = jnp.clip(acc + bd_ref[...].reshape(1, 1, mid), 0.0, 6.0)

    # --- 1x1 project + bias + identity residual ------------------------------
    y = jnp.dot(d.reshape(th * width, mid).astype(jnp.bfloat16), wp_ref[...],
                preferred_element_type=jnp.float32)
    y = y + bp_ref[...] + xc_ref[0].reshape(th * width, c).astype(jnp.float32)
    o_ref[0] = y.reshape(th, width, c).astype(o_ref.dtype)


def inverted_residual(p, x_nhwc, *, th=8):
    n, h, w, c = x_nhwc.shape
    mid = p["we"].shape[1]
    th = min(th, h)
    if h % th != 0:
        th = h                                  # TODO(synk): pick a divisor for odd H
    ht = h // th

    xspec = lambda f: pl.BlockSpec((1, th, w, c), f)
    full = lambda shape: pl.BlockSpec(shape, lambda b, i, _s=shape: (0,) * len(_s))

    out = pl.pallas_call(
        functools.partial(_ir_kernel, th=th, width=w, c=c, mid=mid, ht=ht),
        out_shape=jax.ShapeDtypeStruct((n, h, w, c), jnp.bfloat16),
        grid=(n, ht),
        in_specs=[
            xspec(lambda b, i: (b, jnp.maximum(i - 1, 0), 0, 0)),   # prev tile (halo)
            xspec(lambda b, i: (b, i, 0, 0)),                       # current tile
            xspec(lambda b, i: (b, jnp.minimum(i + 1, ht - 1), 0, 0)),  # next tile (halo)
            full((c, mid)), full((1, mid)),                         # expand
            full((9, mid)), full((1, mid)),                         # depthwise
            full((mid, c)), full((1, c)),                           # project
        ],
        out_specs=pl.BlockSpec((1, th, w, c), lambda b, i: (b, i, 0, 0)),
        scratch_shapes=[pltpu.VMEM((th + 2, w + 2, mid), jnp.float32)],
        compiler_params=_cparams("parallel", "parallel"),
    )(x_nhwc, x_nhwc, x_nhwc, p["we"], p["be"], p["wd"], p["bd"], p["wp"], p["bp"])
    return out


# ---------------------------------------------------------------------------
# Parameters (deterministic synthetic init; weights bf16 for the MXU path,
# biases + depthwise weights f32).
# ---------------------------------------------------------------------------
def init_block4_params(key, n_feats, exp=6):
    c, mid = n_feats, n_feats * exp
    keys = jax.random.split(key, 9)
    params = {}
    for idx, n_in in enumerate([2, 2, 3, 4, 5], start=1):
        kw, kb = jax.random.split(keys[idx - 1])
        s = 1.0 / jnp.sqrt(jnp.float32(n_in * c))
        params[f"c{idx}"] = {
            "w": jax.random.uniform(kw, (n_in, c, c), jnp.float32, -s, s).astype(jnp.bfloat16),
            "b": jax.random.uniform(kb, (1, c), jnp.float32, -s, s),
        }
    for idx in range(1, 5):
        ke, kd, kp = jax.random.split(keys[4 + idx], 3)
        ke1, ke2 = jax.random.split(ke)
        kd1, kd2 = jax.random.split(kd)
        kp1, kp2 = jax.random.split(kp)
        se = 1.0 / jnp.sqrt(jnp.float32(c))
        sd = 1.0 / 3.0
        sp = 1.0 / jnp.sqrt(jnp.float32(mid))
        params[f"b{idx}"] = {
            "we": jax.random.uniform(ke1, (c, mid), jnp.float32, -se, se).astype(jnp.bfloat16),
            "be": jax.random.uniform(ke2, (1, mid), jnp.float32, -se, se),
            "wd": jax.random.uniform(kd1, (9, mid), jnp.float32, -sd, sd),
            "bd": jax.random.uniform(kd2, (1, mid), jnp.float32, -sd, sd),
            "wp": jax.random.uniform(kp1, (mid, c), jnp.float32, -sp, sp).astype(jnp.bfloat16),
            "bp": jax.random.uniform(kp2, (1, c), jnp.float32, -sp, sp),
        }
    return params


# ---------------------------------------------------------------------------
# Block4 forward (NHWC bf16 between kernels; no concats, no pads).
# ---------------------------------------------------------------------------
def block4_forward(params, x_in_nchw, x3_list_nchw):
    to_nhwc = lambda t: jnp.transpose(t, (0, 2, 3, 1)).astype(jnp.bfloat16)
    to_nchw = lambda t: jnp.transpose(t.astype(jnp.float32), (0, 3, 1, 2))

    x_in = to_nhwc(x_in_nchw)
    x3 = to_nhwc(x3_list_nchw[-1])

    c1 = basic_block(params["c1"], [x_in, x3])
    b1 = inverted_residual(params["b1"], c1)
    c2 = basic_block(params["c2"], [b1, c1])
    b2 = inverted_residual(params["b2"], c2)
    c3 = basic_block(params["c3"], [c1, b1, b2])
    b3 = inverted_residual(params["b3"], c3)
    c4 = basic_block(params["c4"], [c1, b1, b2, b3])
    b4 = inverted_residual(params["b4"], c4)
    c5 = basic_block(params["c5"], [b1, b2, b3, b4, c1])

    return [to_nchw(c2), to_nchw(c3), to_nchw(c4), to_nchw(c5)]


# ---------------------------------------------------------------------------
# Pure-JAX reference (same bf16 rounding points) for a numerical sanity check.
# ---------------------------------------------------------------------------
def _ref_forward(params, x_in_nchw, x3_list_nchw):
    f32, bf16 = jnp.float32, jnp.bfloat16
    to_nhwc = lambda t: jnp.transpose(t, (0, 2, 3, 1)).astype(bf16)
    to_nchw = lambda t: jnp.transpose(t.astype(f32), (0, 3, 1, 2))

    def bb(p, xs):
        acc = 0.0
        for k, x in enumerate(xs):
            acc = acc + jnp.einsum("nhwc,cd->nhwd", x.astype(f32), p["w"][k].astype(f32))
        return jnp.maximum(acc + p["b"].reshape(1, 1, 1, -1), 0.0).astype(bf16)

    def ir(p, x):
        xf = x.astype(f32)
        e = jnp.einsum("nhwc,cm->nhwm", xf, p["we"].astype(f32))
        e = jnp.clip(e + p["be"].reshape(1, 1, 1, -1), 0.0, 6.0)
        n, h, w, m = e.shape
        ep = jnp.pad(e, ((0, 0), (1, 1), (1, 1), (0, 0)))
        acc = jnp.zeros_like(e)
        for dy in range(3):
            for dx in range(3):
                acc = acc + ep[:, dy:dy + h, dx:dx + w, :] * p["wd"][dy * 3 + dx].reshape(1, 1, 1, -1)
        d = jnp.clip(acc + p["bd"].reshape(1, 1, 1, -1), 0.0, 6.0)
        y = jnp.einsum("nhwm,mc->nhwc", d.astype(bf16).astype(f32), p["wp"].astype(f32))
        return (y + p["bp"].reshape(1, 1, 1, -1) + xf).astype(bf16)

    x_in = to_nhwc(x_in_nchw)
    x3 = to_nhwc(x3_list_nchw[-1])
    c1 = bb(params["c1"], [x_in, x3]); b1 = ir(params["b1"], c1)
    c2 = bb(params["c2"], [b1, c1]);   b2 = ir(params["b2"], c2)
    c3 = bb(params["c3"], [c1, b1, b2]); b3 = ir(params["b3"], c3)
    c4 = bb(params["c4"], [c1, b1, b2, b3]); b4 = ir(params["b4"], c4)
    c5 = bb(params["c5"], [b1, b2, b3, b4, c1])
    return [to_nchw(c2), to_nchw(c3), to_nchw(c4), to_nchw(c5)]


if __name__ == "__main__":
    n_feats, N, H, W = 16, 2, 16, 16
    key = jax.random.PRNGKey(0)
    kp, kx, k3 = jax.random.split(key, 3)

    params = init_block4_params(kp, n_feats, exp=6)
    x_in = jax.random.normal(kx, (N, n_feats, H, W), jnp.float32)   # NCHW like PyTorch
    x3 = [jax.random.normal(k3, (N, n_feats, H, W), jnp.float32)]

    fwd = jax.jit(block4_forward)
    outs = fwd(params, x_in, x3)
    for o in outs:
        jax.block_until_ready(o)

    assert len(outs) == 4
    assert all(o.shape == (N, n_feats, H, W) for o in outs)
    assert all(bool(jnp.all(jnp.isfinite(o))) for o in outs)

    # Numerical check vs. a pure-JAX reference with matching bf16 rounding points.
    refs = _ref_forward(params, x_in, x3)
    for o, r in zip(outs, refs):
        err = float(jnp.max(jnp.abs(o - r)))
        assert err < 5e-2, f"kernel vs reference mismatch: max|diff|={err}"

    print("KERNEL_OK")
</pallas_src>

<mosaic_0001>
module attributes {stable_mosaic.version = 11 : i64} {
  func.func @_bb_kernel(%arg0: i32, %arg1: memref<256x16xbf16, #tpu.memory_space<vmem>>, %arg2: memref<256x16xbf16, #tpu.memory_space<vmem>>, %arg3: memref<256x16xbf16, #tpu.memory_space<vmem>>, %arg4: memref<3x16x16xbf16, #tpu.memory_space<vmem>>, %arg5: memref<1x16xf32, #tpu.memory_space<vmem>>, %arg6: memref<256x16xbf16, #tpu.memory_space<vmem>>) attributes {dimension_semantics = [#tpu.dimension_semantics<parallel>], iteration_bounds = array<i64: 2>, scalar_prefetch = 0 : i64, scratch_operands = 0 : i64, tpu.core_type = #tpu.core_type<tc>, window_params = [{transform_indices = @transform_0, window_bounds = array<i64: 256, 16>}, {transform_indices = @transform_1, window_bounds = array<i64: 256, 16>}, {transform_indices = @transform_2, window_bounds = array<i64: 256, 16>}, {pipeline_mode = #tpu.pipeline_mode<synchronous>, transform_indices = @transform_3, window_bounds = array<i64: 3, 16, 16>}, {pipeline_mode = #tpu.pipeline_mode<synchronous>, transform_indices = @transform_4, window_bounds = array<i64: 1, 16>}, {transform_indices = @transform_5, window_bounds = array<i64: 256, 16>}]} {
    %c0 = arith.constant 0 : index
    %c0_0 = arith.constant 0 : index
    %c0_1 = arith.constant 0 : index
    %0 = vector.load %arg4[%c0, %c0_0, %c0_1] : memref<3x16x16xbf16, #tpu.memory_space<vmem>>, vector<3x16x16xbf16>
    %c0_2 = arith.constant 0 : index
    %c0_3 = arith.constant 0 : index
    %1 = vector.load %arg1[%c0_2, %c0_3] : memref<256x16xbf16, #tpu.memory_space<vmem>>, vector<256x16xbf16>
    %2 = vector.extract_strided_slice %0 {offsets = [0, 0, 0], sizes = [1, 16, 16], strides = [1, 1, 1]} : vector<3x16x16xbf16> to vector<1x16x16xbf16>
    %3 = vector.shape_cast %2 : vector<1x16x16xbf16> to vector<16x16xbf16>
    %cst = arith.constant dense<0.000000e+00> : vector<256x16xf32>
    %4 = tpu.matmul %1, %3, %cst {dimension_numbers = #tpu.dot_dimension_numbers<[1], [0], [0], [1], [0, 0, 1, 1], [], []>} : vector<256x16xbf16>, vector<16x16xbf16>, vector<256x16xf32> -> vector<256x16xf32>
    %c0_4 = arith.constant 0 : index
    %c0_5 = arith.constant 0 : index
    %5 = vector.load %arg2[%c0_4, %c0_5] : memref<256x16xbf16, #tpu.memory_space<vmem>>, vector<256x16xbf16>
    %6 = vector.extract_strided_slice %0 {offsets = [1, 0, 0], sizes = [1, 16, 16], strides = [1, 1, 1]} : vector<3x16x16xbf16> to vector<1x16x16xbf16>
    %7 = vector.shape_cast %6 : vector<1x16x16xbf16> to vector<16x16xbf16>
    %cst_6 = arith.constant dense<0.000000e+00> : vector<256x16xf32>
    %8 = tpu.matmul %5, %7, %cst_6 {dimension_numbers = #tpu.dot_dimension_numbers<[1], [0], [0], [1], [0, 0, 1, 1], [], []>} : vector<256x16xbf16>, vector<16x16xbf16>, vector<256x16xf32> -> vector<256x16xf32>
    %9 = arith.addf %4, %8 : vector<256x16xf32>
    %c0_7 = arith.constant 0 : index
    %c0_8 = arith.constant 0 : index
    %10 = vector.load %arg3[%c0_7, %c0_8] : memref<256x16xbf16, #tpu.memory_space<vmem>>, vector<256x16xbf16>
    %11 = vector.extract_strided_slice %0 {offsets = [2, 0, 0], sizes = [1, 16, 16], strides = [1, 1, 1]} : vector<3x16x16xbf16> to vector<1x16x16xbf16>
    %12 = vector.shape_cast %11 : vector<1x16x16xbf16> to vector<16x16xbf16>
    %cst_9 = arith.constant dense<0.000000e+00> : vector<256x16xf32>
    %13 = tpu.matmul %10, %12, %cst_9 {dimension_numbers = #tpu.dot_dimension_numbers<[1], [0], [0], [1], [0, 0, 1, 1], [], []>} : vector<256x16xbf16>, vector<16x16xbf16>, vector<256x16xf32> -> vector<256x16xf32>
    %14 = arith.addf %9, %13 : vector<256x16xf32>
    %c0_10 = arith.constant 0 : index
    %c0_11 = arith.constant 0 : index
    %15 = vector.load %arg5[%c0_10, %c0_11] : memref<1x16xf32, #tpu.memory_space<vmem>>, vector<1x16xf32>
    %16 = vector.broadcast %15 : vector<1x16xf32> to vector<256x16xf32>
    %17 = arith.addf %14, %16 : vector<256x16xf32>
    %cst_12 = arith.constant 0.000000e+00 : f32
    %18 = vector.broadcast %cst_12 : f32 to vector<256x16xf32>
    %19 = arith.maximumf %17, %18 : vector<256x16xf32>
    %20 = arith.truncf %19 : vector<256x16xf32> to vector<256x16xbf16>
    %c0_13 = arith.constant 0 : index
    %c0_14 = arith.constant 0 : index
    %21 = vector.load %arg6[%c0_13, %c0_14] : memref<256x16xbf16, #tpu.memory_space<vmem>>, vector<256x16xbf16>
    tpu.vector_store %arg6[%c0_13, %c0_14], %20 {strides = array<i32>} : memref<256x16xbf16, #tpu.memory_space<vmem>>, vector<256x16xbf16>,
    return
  }
  func.func @transform_0(%arg0: i32) -> (i32, i32) {
    %c0_i32 = arith.constant 0 : i32
    %c0_i32_0 = arith.constant 0 : i32
    return %arg0, %c0_i32 : i32, i32
  }
  func.func @transform_1(%arg0: i32) -> (i32, i32) {
    %c0_i32 = arith.constant 0 : i32
    %c0_i32_0 = arith.constant 0 : i32
    return %arg0, %c0_i32 : i32, i32
  }
  func.func @transform_2(%arg0: i32) -> (i32, i32) {
    %c0_i32 = arith.constant 0 : i32
    %c0_i32_0 = arith.constant 0 : i32
    return %arg0, %c0_i32 : i32, i32
  }
  func.func @transform_3(%arg0: i32) -> (i32, i32, i32) {
    %c0_i32 = arith.constant 0 : i32
    %c0_i32_0 = arith.constant 0 : i32
    %c0_i32_1 = arith.constant 0 : i32
    %c0_i32_2 = arith.constant 0 : i32
    return %c0_i32, %c0_i32_0, %c0_i32_1 : i32, i32, i32
  }
  func.func @transform_4(%arg0: i32) -> (i32, i32) {
    %c0_i32 = arith.constant 0 : i32
    %c0_i32_0 = arith.constant 0 : i32
    %c0_i32_1 = arith.constant 0 : i32
    return %c0_i32, %c0_i32_0 : i32, i32
  }
  func.func @transform_5(%arg0: i32) -> (i32, i32) {
    %c0_i32 = arith.constant 0 : i32
    %c0_i32_0 = arith.constant 0 : i32
    return %arg0, %c0_i32 : i32, i32
  }
}

module attributes {stable_mosaic.version = 11 : i64} {
  func.func @_bb_kernel(%arg0: i32, %arg1: memref<256x16xbf16, #tpu.memory_space<vmem>>, %arg2: memref<256x16xbf16, #tpu.memory_space<vmem>>, %arg3: memref<2x16x16xbf16, #tpu.memory_space<vmem>>, %arg4: memref<1x16xf32, #tpu.memory_space<vmem>>, %arg5: memref<256x16xbf16, #tpu.memory_space<vmem>>) attributes {dimension_semantics = [#tpu.dimension_semantics<parallel>], iteration_bounds = array<i64: 2>, scalar_prefetch = 0 : i64, scratch_operands = 0 : i64, tpu.core_type = #tpu.core_type<tc>, window_params = [{transform_indices = @transform_0, window_bounds = array<i64: 256, 16>}, {transform_indices = @transform_1, window_bounds = array<i64: 256, 16>}, {pipeline_mode = #tpu.pipeline_mode<synchronous>, transform_indices = @transform_2, window_bounds = array<i64: 2, 16, 16>}, {pipeline_mode = #tpu.pipeline_mode<synchronous>, transform_indices = @transform_3, window_bounds = array<i64: 1, 16>}, {transform_indices = @transform_4, window_bounds = array<i64: 256, 16>}]} {
    %c0 = arith.constant 0 : index
    %c0_0 = arith.constant 0 : index
    %c0_1 = arith.constant 0 : index
    %0 = vector.load %arg3[%c0, %c0_0, %c0_1] : memref<2x16x16xbf16, #tpu.memory_space<vmem>>, vector<2x16x16xbf16>
    %c0_2 = arith.constant 0 : index
    %c0_3 = arith.constant 0 : index
    %1 = vector.load %arg1[%c0_2, %c0_3] : memref<256x16xbf16, #tpu.memory_space<vmem>>, vector<256x16xbf16>
    %2 = vector.extract_strided_slice %0 {offsets = [0, 0, 0], sizes = [1, 16, 16], strides = [1, 1, 1]} : vector<2x16x16xbf16> to vector<1x16x16xbf16>
    %3 = vector.shape_cast %2 : vector<1x16x16xbf16> to vector<16x16xbf16>
    %cst = arith.constant dense<0.000000e+00> : vector<256x16xf32>
    %4 = tpu.matmul %1, %3, %cst {dimension_numbers = #tpu.dot_dimension_numbers<[1], [0], [0], [1], [0, 0, 1, 1], [], []>} : vector<256x16xbf16>, vector<16x16xbf16>, vector<256x16xf32> -> vector<256x16xf32>
    %c0_4 = arith.constant 0 : index
    %c0_5 = arith.constant 0 : index
    %5 = vector.load %arg2[%c0_4, %c0_5] : memref<256x16xbf16, #tpu.memory_space<vmem>>, vector<256x16xbf16>
    %6 = vector.extract_strided_slice %0 {offsets = [1, 0, 0], sizes = [1, 16, 16], strides = [1, 1, 1]} : vector<2x16x16xbf16> to vector<1x16x16xbf16>
    %7 = vector.shape_cast %6 : vector<1x16x16xbf16> to vector<16x16xbf16>
    %cst_6 = arith.constant dense<0.000000e+00> : vector<256x16xf32>
    %8 = tpu.matmul %5, %7, %cst_6 {dimension_numbers = #tpu.dot_dimension_numbers<[1], [0], [0], [1], [0, 0, 1, 1], [], []>} : vector<256x16xbf16>, vector<16x16xbf16>, vector<256x16xf32> -> vector<256x16xf32>
    %9 = arith.addf %4, %8 : vector<256x16xf32>
    %c0_7 = arith.constant 0 : index
    %c0_8 = arith.constant 0 : index
    %10 = vector.load %arg4[%c0_7, %c0_8] : memref<1x16xf32, #tpu.memory_space<vmem>>, vector<1x16xf32>
    %11 = vector.broadcast %10 : vector<1x16xf32> to vector<256x16xf32>
    %12 = arith.addf %9, %11 : vector<256x16xf32>
    %cst_9 = arith.constant 0.000000e+00 : f32
    %13 = vector.broadcast %cst_9 : f32 to vector<256x16xf32>
    %14 = arith.maximumf %12, %13 : vector<256x16xf32>
    %15 = arith.truncf %14 : vector<256x16xf32> to vector<256x16xbf16>
    %c0_10 = arith.constant 0 : index
    %c0_11 = arith.constant 0 : index
    %16 = vector.load %arg5[%c0_10, %c0_11] : memref<256x16xbf16, #tpu.memory_space<vmem>>, vector<256x16xbf16>
    tpu.vector_store %arg5[%c0_10, %c0_11], %15 {strides = array<i32>} : memref<256x16xbf16, #tpu.memory_space<vmem>>, vector<256x16xbf16>,
    return
  }
  func.func @transform_0(%arg0: i32) -> (i32, i32) {
    %c0_i32 = arith.constant 0 : i32
    %c0_i32_0 = arith.constant 0 : i32
    return %arg0, %c0_i32 : i32, i32
  }
  func.func @transform_1(%arg0: i32) -> (i32, i32) {
    %c0_i32 = arith.constant 0 : i32
    %c0_i32_0 = arith.constant 0 : i32
    return %arg0, %c0_i32 : i32, i32
  }
  func.func @transform_2(%arg0: i32) -> (i32, i32, i32) {
    %c0_i32 = arith.constant 0 : i32
    %c0_i32_0 = arith.constant 0 : i32
    %c0_i32_1 = arith.constant 0 : i32
    %c0_i32_2 = arith.constant 0 : i32
    return %c0_i32, %c0_i32_0, %c0_i32_1 : i32, i32, i32
  }
  func.func @transform_3(%arg0: i32) -> (i32, i32) {
    %c0_i32 = arith.constant 0 : i32
    %c0_i32_0 = arith.constant 0 : i32
    %c0_i32_1 = arith.constant 0 : i32
    return %c0_i32, %c0_i32_0 : i32, i32
  }
  func.func @transform_4(%arg0: i32) -> (i32, i32) {
    %c0_i32 = arith.constant 0 : i32
    %c0_i32_0 = arith.constant 0 : i32
    return %arg0, %c0_i32 : i32, i32
  }
}

module attributes {stable_mosaic.version = 11 : i64} {
  func.func @_ir_kernel(%arg0: i32, %arg1: i32, %arg2: memref<1x8x16x16xbf16, #tpu.memory_space<vmem>>, %arg3: memref<1x8x16x16xbf16, #tpu.memory_space<vmem>>, %arg4: memref<1x8x16x16xbf16, #tpu.memory_space<vmem>>, %arg5: memref<16x96xbf16, #tpu.memory_space<vmem>>, %arg6: memref<1x96xf32, #tpu.memory_space<vmem>>, %arg7: memref<9x96xf32, #tpu.memory_space<vmem>>, %arg8: memref<1x96xf32, #tpu.memory_space<vmem>>, %arg9: memref<96x16xbf16, #tpu.memory_space<vmem>>, %arg10: memref<1x16xf32, #tpu.memory_space<vmem>>, %arg11: memref<1x8x16x16xbf16, #tpu.memory_space<vmem>>, %arg12: memref<10x18x96xf32, #tpu.memory_space<vmem>>) attributes {dimension_semantics = [#tpu.dimension_semantics<parallel>, #tpu.dimension_semantics<parallel>], iteration_bounds = array<i64: 2, 2>, scalar_prefetch = 0 : i64, scratch_operands = 1 : i64, tpu.core_type = #tpu.core_type<tc>, window_params = [{transform_indices = @transform_0, window_bounds = array<i64: 1, 8, 16, 16>}, {transform_indices = @transform_1, window_bounds = array<i64: 1, 8, 16, 16>}, {transform_indices = @transform_2, window_bounds = array<i64: 1, 8, 16, 16>}, {pipeline_mode = #tpu.pipeline_mode<synchronous>, transform_indices = @transform_3, window_bounds = array<i64: 16, 96>}, {pipeline_mode = #tpu.pipeline_mode<synchronous>, transform_indices = @transform_4, window_bounds = array<i64: 1, 96>}, {pipeline_mode = #tpu.pipeline_mode<synchronous>, transform_indices = @transform_5, window_bounds = array<i64: 9, 96>}, {pipeline_mode = #tpu.pipeline_mode<synchronous>, transform_indices = @transform_6, window_bounds = array<i64: 1, 96>}, {pipeline_mode = #tpu.pipeline_mode<synchronous>, transform_indices = @transform_7, window_bounds = array<i64: 96, 16>}, {pipeline_mode = #tpu.pipeline_mode<synchronous>, transform_indices = @transform_8, window_bounds = array<i64: 1, 16>}, {transform_indices = @transform_9, window_bounds = array<i64: 1, 8, 16, 16>}]} {
    %c0 = arith.constant 0 : index
    %c0_0 = arith.constant 0 : index
    %0 = vector.load %arg5[%c0, %c0_0] : memref<16x96xbf16, #tpu.memory_space<vmem>>, vector<16x96xbf16>
    %c0_1 = arith.constant 0 : index
    %c0_2 = arith.constant 0 : index
    %1 = vector.load %arg6[%c0_1, %c0_2] : memref<1x96xf32, #tpu.memory_space<vmem>>, vector<1x96xf32>
    %c0_i32 = arith.constant 0 : i32
    %2 = arith.cmpi sgt, %arg1, %c0_i32 : i32
    %cst = arith.constant 1.000000e+00 : f32
    %cst_3 = arith.constant 0.000000e+00 : f32
    %3 = arith.select %2, %cst, %cst_3 : f32
    %c1_i32 = arith.constant 1 : i32
    %4 = arith.cmpi slt, %arg1, %c1_i32 : i32
    %cst_4 = arith.constant 1.000000e+00 : f32
    %cst_5 = arith.constant 0.000000e+00 : f32
    %5 = arith.select %4, %cst_4, %cst_5 : f32
    %c0_6 = arith.constant 0 : index
    %c0_7 = arith.constant 0 : index
    %c0_8 = arith.constant 0 : index
    %c0_9 = arith.constant 0 : index
    %6 = vector.load %arg3[%c0_6, %c0_7, %c0_8, %c0_9] : memref<1x8x16x16xbf16, #tpu.memory_space<vmem>>, vector<1x8x16x16xbf16>
    %7 = vector.shape_cast %6 : vector<1x8x16x16xbf16> to vector<8x16x16xbf16>
    %8 = vector.shape_cast %7 : vector<8x16x16xbf16> to vector<128x16xbf16>
    %cst_10 = arith.constant dense<0.000000e+00> : vector<128x96xf32>
    %9 = tpu.matmul %8, %0, %cst_10 {dimension_numbers = #tpu.dot_dimension_numbers<[1], [0], [0], [1], [0, 0, 1, 1], [], []>} : vector<128x16xbf16>, vector<16x96xbf16>, vector<128x96xf32> -> vector<128x96xf32>
    %10 = vector.broadcast %1 : vector<1x96xf32> to vector<128x96xf32>
    %11 = arith.addf %9, %10 : vector<128x96xf32>
    %cst_11 = arith.constant 0.000000e+00 : f32
    %cst_12 = arith.constant 6.000000e+00 : f32
    %12 = vector.broadcast %cst_11 : f32 to vector<128x96xf32>
    %13 = arith.maximumf %12, %11 : vector<128x96xf32>
    %14 = vector.broadcast %cst_12 : f32 to vector<128x96xf32>
    %15 = arith.minimumf %14, %13 : vector<128x96xf32>
    %16 = vector.shape_cast %15 : vector<128x96xf32> to vector<8x16x96xf32>
    %c1 = arith.constant 1 : index
    %c1_13 = arith.constant 1 : index
    %c0_14 = arith.constant 0 : index
    %17 = vector.load %arg12[%c1, %c1_13, %c0_14] : memref<10x18x96xf32, #tpu.memory_space<vmem>>, vector<8x16x96xf32>
    tpu.vector_store %arg12[%c1, %c1_13, %c0_14], %16 {strides = array<i32>} : memref<10x18x96xf32, #tpu.memory_space<vmem>>, vector<8x16x96xf32>,
    %c0_15 = arith.constant 0 : index
    %c7 = arith.constant 7 : index
    %c0_16 = arith.constant 0 : index
    %c0_17 = arith.constant 0 : index
    %18 = vector.load %arg2[%c0_15, %c7, %c0_16, %c0_17] : memref<1x8x16x16xbf16, #tpu.memory_space<vmem>>, vector<1x1x16x16xbf16>
    %19 = vector.shape_cast %18 : vector<1x1x16x16xbf16> to vector<1x16x16xbf16>
    %20 = vector.shape_cast %19 : vector<1x16x16xbf16> to vector<16x16xbf16>
    %cst_18 = arith.constant dense<0.000000e+00> : vector<16x96xf32>
    %21 = tpu.matmul %20, %0, %cst_18 {dimension_numbers = #tpu.dot_dimension_numbers<[1], [0], [0], [1], [0, 0, 1, 1], [], []>} : vector<16x16xbf16>, vector<16x96xbf16>, vector<16x96xf32> -> vector<16x96xf32>
    %22 = vector.broadcast %1 : vector<1x96xf32> to vector<16x96xf32>
    %23 = arith.addf %21, %22 : vector<16x96xf32>
    %cst_19 = arith.constant 0.000000e+00 : f32
    %cst_20 = arith.constant 6.000000e+00 : f32
    %24 = vector.broadcast %cst_19 : f32 to vector<16x96xf32>
    %25 = arith.maximumf %24, %23 : vector<16x96xf32>
    %26 = vector.broadcast %cst_20 : f32 to vector<16x96xf32>
    %27 = arith.minimumf %26, %25 : vector<16x96xf32>
    %28 = vector.shape_cast %27 : vector<16x96xf32> to vector<1x16x96xf32>
    %29 = vector.broadcast %3 : f32 to vector<1x16x96xf32>
    %30 = arith.mulf %28, %29 : vector<1x16x96xf32>
    %c0_21 = arith.constant 0 : index
    %c1_22 = arith.constant 1 : index
    %c0_23 = arith.constant 0 : index
    %31 = vector.load %arg12[%c0_21, %c1_22, %c0_23] : memref<10x18x96xf32, #tpu.memory_space<vmem>>, vector<1x16x96xf32>
    tpu.vector_store %arg12[%c0_21, %c1_22, %c0_23], %30 {strides = array<i32>} : memref<10x18x96xf32, #tpu.memory_space<vmem>>, vector<1x16x96xf32>,
    %c0_24 = arith.constant 0 : index
    %c0_25 = arith.constant 0 : index
    %c0_26 = arith.constant 0 : index
    %c0_27 = arith.constant 0 : index
    %32 = vector.load %arg4[%c0_24, %c0_25, %c0_26, %c0_27] : memref<1x8x16x16xbf16, #tpu.memory_space<vmem>>, vector<1x1x16x16xbf16>
    %33 = vector.shape_cast %32 : vector<1x1x16x16xbf16> to vector<1x16x16xbf16>
    %34 = vector.shape_cast %33 : vector<1x16x16xbf16> to vector<16x16xbf16>
    %cst_28 = arith.constant dense<0.000000e+00> : vector<16x96xf32>
    %35 = tpu.matmul %34, %0, %cst_28 {dimension_numbers = #tpu.dot_dimension_numbers<[1], [0], [0], [1], [0, 0, 1, 1], [], []>} : vector<16x16xbf16>, vector<16x96xbf16>, vector<16x96xf32> -> vector<16x96xf32>
    %36 = vector.broadcast %1 : vector<1x96xf32> to vector<16x96xf32>
    %37 = arith.addf %35, %36 : vector<16x96xf32>
    %cst_29 = arith.constant 0.000000e+00 : f32
    %cst_30 = arith.constant 6.000000e+00 : f32
    %38 = vector.broadcast %cst_29 : f32 to vector<16x96xf32>
    %39 = arith.maximumf %38, %37 : vector<16x96xf32>
    %40 = vector.broadcast %cst_30 : f32 to vector<16x96xf32>
    %41 = arith.minimumf %40, %39 : vector<16x96xf32>
    %42 = vector.shape_cast %41 : vector<16x96xf32> to vector<1x16x96xf32>
    %43 = vector.broadcast %5 : f32 to vector<1x16x96xf32>
    %44 = arith.mulf %42, %43 : vector<1x16x96xf32>
    %c9 = arith.constant 9 : index
    %c1_31 = arith.constant 1 : index
    %c0_32 = arith.constant 0 : index
    %45 = vector.load %arg12[%c9, %c1_31, %c0_32] : memref<10x18x96xf32, #tpu.memory_space<vmem>>, vector<1x16x96xf32>
    tpu.vector_store %arg12[%c9, %c1_31, %c0_32], %44 {strides = array<i32>} : memref<10x18x96xf32, #tpu.memory_space<vmem>>, vector<1x16x96xf32>,
    %cst_33 = arith.constant 0.000000e+00 : f32
    %46 = vector.broadcast %cst_33 : f32 to vector<10x1x96xf32>
    %c0_34 = arith.constant 0 : index
    %c0_35 = arith.constant 0 : index
    %c0_36 = arith.constant 0 : index
    %47 = vector.load %arg12[%c0_34, %c0_35, %c0_36] : memref<10x18x96xf32, #tpu.memory_space<vmem>>, vector<10x1x96xf32>
    tpu.vector_store %arg12[%c0_34, %c0_35, %c0_36], %46 {strides = array<i32>} : memref<10x18x96xf32, #tpu.memory_space<vmem>>, vector<10x1x96xf32>,
    %c0_37 = arith.constant 0 : index
    %c17 = arith.constant 17 : index
    %c0_38 = arith.constant 0 : index
    %48 = vector.load %arg12[%c0_37, %c17, %c0_38] : memref<10x18x96xf32, #tpu.memory_space<vmem>>, vector<10x1x96xf32>
    tpu.vector_store %arg12[%c0_37, %c17, %c0_38], %46 {strides = array<i32>} : memref<10x18x96xf32, #tpu.memory_space<vmem>>, vector<10x1x96xf32>,
    %c0_39 = arith.constant 0 : index
    %c0_40 = arith.constant 0 : index
    %49 = vector.load %arg7[%c0_39, %c0_40] : memref<9x96xf32, #tpu.memory_space<vmem>>, vector<9x96xf32>
    %cst_41 = arith.constant 0.000000e+00 : f32
    %50 = vector.broadcast %cst_41 : f32 to vector<8x16x96xf32>
    %c0_42 = arith.constant 0 : index
    %c0_43 = arith.constant 0 : index
    %c0_44 = arith.constant 0 : index
    %51 = vector.load %arg12[%c0_42, %c0_43, %c0_44] : memref<10x18x96xf32, #tpu.memory_space<vmem>>, vector<8x16x96xf32>
    %52 = vector.extract_strided_slice %49 {offsets = [0, 0], sizes = [1, 96], strides = [1, 1]} : vector<9x96xf32> to vector<1x96xf32>
    %53 = vector.shape_cast %52 : vector<1x96xf32> to vector<96xf32>
    %54 = vector.shape_cast %53 : vector<96xf32> to vector<1x1x96xf32>
    %55 = vector.broadcast %54 : vector<1x1x96xf32> to vector<8x16x96xf32>
    %56 = arith.mulf %51, %55 : vector<8x16x96xf32>
    %57 = arith.addf %50, %56 : vector<8x16x96xf32>
    %c0_45 = arith.constant 0 : index
    %c1_46 = arith.constant 1 : index
    %c0_47 = arith.constant 0 : index
    %58 = vector.load %arg12[%c0_45, %c1_46, %c0_47] : memref<10x18x96xf32, #tpu.memory_space<vmem>>, vector<8x16x96xf32>
    %59 = vector.extract_strided_slice %49 {offsets = [1, 0], sizes = [1, 96], strides = [1, 1]} : vector<9x96xf32> to vector<1x96xf32>
    %60 = vector.shape_cast %59 : vector<1x96xf32> to vector<96xf32>
    %61 = vector.shape_cast %60 : vector<96xf32> to vector<1x1x96xf32>
    %62 = vector.broadcast %61 : vector<1x1x96xf32> to vector<8x16x96xf32>
    %63 = arith.mulf %58, %62 : vector<8x16x96xf32>
    %64 = arith.addf %57, %63 : vector<8x16x96xf32>
    %c0_48 = arith.constant 0 : index
    %c2 = arith.constant 2 : index
    %c0_49 = arith.constant 0 : index
    %65 = vector.load %arg12[%c0_48, %c2, %c0_49] : memref<10x18x96xf32, #tpu.memory_space<vmem>>, vector<8x16x96xf32>
    %66 = vector.extract_strided_slice %49 {offsets = [2, 0], sizes = [1, 96], strides = [1, 1]} : vector<9x96xf32> to vector<1x96xf32>
    %67 = vector.shape_cast %66 : vector<1x96xf32> to vector<96xf32>
    %68 = vector.shape_cast %67 : vector<96xf32> to vector<1x1x96xf32>
    %69 = vector.broadcast %68 : vector<1x1x96xf32> to vector<8x16x96xf32>
    %70 = arith.mulf %65, %69 : vector<8x16x96xf32>
    %71 = arith.addf %64, %70 : vector<8x16x96xf32>
    %c1_50 = arith.constant 1 : index
    %c0_51 = arith.constant 0 : index
    %c0_52 = arith.constant 0 : index
    %72 = vector.load %arg12[%c1_50, %c0_51, %c0_52] : memref<10x18x96xf32, #tpu.memory_space<vmem>>, vector<8x16x96xf32>
    %73 = vector.extract_strided_slice %49 {offsets = [3, 0], sizes = [1, 96], strides = [1, 1]} : vector<9x96xf32> to vector<1x96xf32>
    %74 = vector.shape_cast %73 : vector<1x96xf32> to vector<96xf32>
    %75 = vector.shape_cast %74 : vector<96xf32> to vector<1x1x96xf32>
    %76 = vector.broadcast %75 : vector<1x1x96xf32> to vector<8x16x96xf32>
    %77 = arith.mulf %72, %76 : vector<8x16x96xf32>
    %78 = arith.addf %71, %77 : vector<8x16x96xf32>
    %c1_53 = arith.constant 1 : index
    %c1_54 = arith.constant 1 : index
    %c0_55 = arith.constant 0 : index
    %79 = vector.load %arg12[%c1_53, %c1_54, %c0_55] : memref<10x18x96xf32, #tpu.memory_space<vmem>>, vector<8x16x96xf32>
    %80 = vector.extract_strided_slice %49 {offsets = [4, 0], sizes = [1, 96], strides = [1, 1]} : vector<9x96xf32> to vector<1x96xf32>
    %81 = vector.shape_cast %80 : vector<1x96xf32> to vector<96xf32>
    %82 = vector.shape_cast %81 : vector<96xf32> to vector<1x1x96xf32>
    %83 = vector.broadcast %82 : vector<1x1x96xf32> to vector<8x16x96xf32>
    %84 = arith.mulf %79, %83 : vector<8x16x96xf32>
    %85 = arith.addf %78, %84 : vector<8x16x96xf32>
    %c1_56 = arith.constant 1 : index
    %c2_57 = arith.constant 2 : index
    %c0_58 = arith.constant 0 : index
    %86 = vector.load %arg12[%c1_56, %c2_57, %c0_58] : memref<10x18x96xf32, #tpu.memory_space<vmem>>, vector<8x16x96xf32>
    %87 = vector.extract_strided_slice %49 {offsets = [5, 0], sizes = [1, 96], strides = [1, 1]} : vector<9x96xf32> to vector<1x96xf32>
    %88 = vector.shape_cast %87 : vector<1x96xf32> to vector<96xf32>
    %89 = vector.shape_cast %88 : vector<96xf32> to vector<1x1x96xf32>
    %90 = vector.broadcast %89 : vector<1x1x96xf32> to vector<8x16x96xf32>
    %91 = arith.mulf %86, %90 : vector<8x16x96xf32>
    %92 = arith.addf %85, %91 : vector<8x16x96xf32>
    %c2_59 = arith.constant 2 : index
    %c0_60 = arith.constant 0 : index
    %c0_61 = arith.constant 0 : index
    %93 = vector.load %arg12[%c2_59, %c0_60, %c0_61] : memref<10x18x96xf32, #tpu.memory_space<vmem>>, vector<8x16x96xf32>
    %94 = vector.extract_strided_slice %49 {offsets = [6, 0], sizes = [1, 96], strides = [1, 1]} : vector<9x96xf32> to vector<1x96xf32>
    %95 = vector.shape_cast %94 : vector<1x96xf32> to vector<96xf32>
    %96 = vector.shape_cast %95 : vector<96xf32> to vector<1x1x96xf32>
    %97 = vector.broadcast %96 : vector<1x1x96xf32> to vector<8x16x96xf32>
    %98 = arith.mulf %93, %97 : vector<8x16x96xf32>
    %99 = arith.addf %92, %98 : vector<8x16x96xf32>
    %c2_62 = arith.constant 2 : index
    %c1_63 = arith.constant 1 : index
    %c0_64 = arith.constant 0 : index
    %100 = vector.load %arg12[%c2_62, %c1_63, %c0_64] : memref<10x18x96xf32, #tpu.memory_space<vmem>>, vector<8x16x96xf32>
    %101 = vector.extract_strided_slice %49 {offsets = [7, 0], sizes = [1, 96], strides = [1, 1]} : vector<9x96xf32> to vector<1x96xf32>
    %102 = vector.shape_cast %101 : vector<1x96xf32> to vector<96xf32>
    %103 = vector.shape_cast %102 : vector<96xf32> to vector<1x1x96xf32>
    %104 = vector.broadcast %103 : vector<1x1x96xf32> to vector<8x16x96xf32>
    %105 = arith.mulf %100, %104 : vector<8x16x96xf32>
    %106 = arith.addf %99, %105 : vector<8x16x96xf32>
    %c2_65 = arith.constant 2 : index
    %c2_66 = arith.constant 2 : index
    %c0_67 = arith.constant 0 : index
    %107 = vector.load %arg12[%c2_65, %c2_66, %c0_67] : memref<10x18x96xf32, #tpu.memory_space<vmem>>, vector<8x16x96xf32>
    %108 = vector.extract_strided_slice %49 {offsets = [8, 0], sizes = [1, 96], strides = [1, 1]} : vector<9x96xf32> to vector<1x96xf32>
    %109 = vector.shape_cast %108 : vector<1x96xf32> to vector<96xf32>
    %110 = vector.shape_cast %109 : vector<96xf32> to vector<1x1x96xf32>
    %111 = vector.broadcast %110 : vector<1x1x96xf32> to vector<8x16x96xf32>
    %112 = arith.mulf %107, %111 : vector<8x16x96xf32>
    %113 = arith.addf %106, %112 : vector<8x16x96xf32>
    %c0_68 = arith.constant 0 : index
    %c0_69 = arith.constant 0 : index
    %114 = vector.load %arg8[%c0_68, %c0_69] : memref<1x96xf32, #tpu.memory_space<vmem>>, vector<1x96xf32>
    %115 = vector.shape_cast %114 : vector<1x96xf32> to vector<1x1x96xf32>
    %116 = vector.broadcast %115 : vector<1x1x96xf32> to vector<8x16x96xf32>
    %117 = arith.addf %113, %116 : vector<8x16x96xf32>
    %cst_70 = arith.constant 0.000000e+00 : f32
    %cst_71 = arith.constant 6.000000e+00 : f32
    %118 = vector.broadcast %cst_70 : f32 to vector<8x16x96xf32>
    %119 = arith.maximumf %118, %117 : vector<8x16x96xf32>
    %120 = vector.broadcast %cst_71 : f32 to vector<8x16x96xf32>
    %121 = arith.minimumf %120, %119 : vector<8x16x96xf32>
    %122 = vector.shape_cast %121 : vector<8x16x96xf32> to vector<128x96xf32>
    %123 = arith.truncf %122 : vector<128x96xf32> to vector<128x96xbf16>
    %c0_72 = arith.constant 0 : index
    %c0_73 = arith.constant 0 : index
    %124 = vector.load %arg9[%c0_72, %c0_73] : memref<96x16xbf16, #tpu.memory_space<vmem>>, vector<96x16xbf16>
    %cst_74 = arith.constant dense<0.000000e+00> : vector<128x16xf32>
    %125 = tpu.matmul %123, %124, %cst_74 {dimension_numbers = #tpu.dot_dimension_numbers<[1], [0], [0], [1], [0, 0, 1, 1], [], []>} : vector<128x96xbf16>, vector<96x16xbf16>, vector<128x16xf32> -> vector<128x16xf32>
    %c0_75 = arith.constant 0 : index
    %c0_76 = arith.constant 0 : index
    %126 = vector.load %arg10[%c0_75, %c0_76] : memref<1x16xf32, #tpu.memory_space<vmem>>, vector<1x16xf32>
    %127 = vector.broadcast %126 : vector<1x16xf32> to vector<128x16xf32>
    %128 = arith.addf %125, %127 : vector<128x16xf32>
    %c0_77 = arith.constant 0 : index
    %c0_78 = arith.constant 0 : index
    %c0_79 = arith.constant 0 : index
    %c0_80 = arith.constant 0 : index
    %129 = vector.load %arg3[%c0_77, %c0_78, %c0_79, %c0_80] : memref<1x8x16x16xbf16, #tpu.memory_space<vmem>>, vector<1x8x16x16xbf16>
    %130 = vector.shape_cast %129 : vector<1x8x16x16xbf16> to vector<8x16x16xbf16>
    %131 = vector.shape_cast %130 : vector<8x16x16xbf16> to vector<128x16xbf16>
    %132 = arith.extf %131 : vector<128x16xbf16> to vector<128x16xf32>
    %133 = arith.addf %128, %132 : vector<128x16xf32>
    %134 = vector.shape_cast %133 : vector<128x16xf32> to vector<8x16x16xf32>
    %135 = arith.truncf %134 : vector<8x16x16xf32> to vector<8x16x16xbf16>
    %c0_81 = arith.constant 0 : index
    %c0_82 = arith.constant 0 : index
    %c0_83 = arith.constant 0 : index
    %c0_84 = arith.constant 0 : index
    %136 = vector.load %arg11[%c0_81, %c0_82, %c0_83, %c0_84] : memref<1x8x16x16xbf16, #tpu.memory_space<vmem>>, vector<1x8x16x16xbf16>
    %137 = vector.shape_cast %136 : vector<1x8x16x16xbf16> to vector<8x16x16xbf16>
    %138 = vector.shape_cast %135 : vector<8x16x16xbf16> to vector<1x8x16x16xbf16>
    tpu.vector_store %arg11[%c0_81, %c0_82, %c0_83, %c0_84], %138 {strides = array<i32>} : memref<1x8x16x16xbf16, #tpu.memory_space<vmem>>, vector<1x8x16x16xbf16>,
    return
  }
  func.func @transform_0(%arg0: i32, %arg1: i32) -> (i32, i32, i32, i32) {
    %c1_i32 = arith.constant 1 : i32
    %0 = arith.subi %arg1, %c1_i32 : i32
    %c0_i32 = arith.constant 0 : i32
    %1 = arith.maxsi %0, %c0_i32 : i32
    %c0_i32_0 = arith.constant 0 : i32
    %c0_i32_1 = arith.constant 0 : i32
    %c0_i32_2 = arith.constant 0 : i32
    return %arg0, %1, %c0_i32_0, %c0_i32_1 : i32, i32, i32, i32
  }
  func.func @transform_1(%arg0: i32, %arg1: i32) -> (i32, i32, i32, i32) {
    %c0_i32 = arith.constant 0 : i32
    %c0_i32_0 = arith.constant 0 : i32
    %c0_i32_1 = arith.constant 0 : i32
    return %arg0, %arg1, %c0_i32, %c0_i32_0 : i32, i32, i32, i32
  }
  func.func @transform_2(%arg0: i32, %arg1: i32) -> (i32, i32, i32, i32) {
    %c1_i32 = arith.constant 1 : i32
    %0 = arith.addi %arg1, %c1_i32 : i32
    %c1_i32_0 = arith.constant 1 : i32
    %1 = arith.minsi %0, %c1_i32_0 : i32
    %c0_i32 = arith.constant 0 : i32
    %c0_i32_1 = arith.constant 0 : i32
    %c0_i32_2 = arith.constant 0 : i32
    return %arg0, %1, %c0_i32, %c0_i32_1 : i32, i32, i32, i32
  }
  func.func @transform_3(%arg0: i32, %arg1: i32) -> (i32, i32) {
    %c0_i32 = arith.constant 0 : i32
    %c0_i32_0 = arith.constant 0 : i32
    %c0_i32_1 = arith.constant 0 : i32
    return %c0_i32, %c0_i32_0 : i32, i32
  }
  func.func @transform_4(%arg0: i32, %arg1: i32) -> (i32, i32) {
    %c0_i32 = arith.constant 0 : i32
    %c0_i32_0 = arith.constant 0 : i32
    %c0_i32_1 = arith.constant 0 : i32
    return %c0_i32, %c0_i32_0 : i32, i32
  }
  func.func @transform_5(%arg0: i32, %arg1: i32) -> (i32, i32) {
    %c0_i32 = arith.constant 0 : i32
    %c0_i32_0 = arith.constant 0 : i32
    %c0_i32_1 = arith.constant 0 : i32
    return %c0_i32, %c0_i32_0 : i32, i32
  }
  func.func @transform_6(%arg0: i32, %arg1: i32) -> (i32, i32) {
    %c0_i32 = arith.constant 0 : i32
    %c0_i32_0 = arith.constant 0 : i32
    %c0_i32_1 = arith.constant 0 : i32
    return %c0_i32, %c0_i32_0 : i32, i32
  }
  func.func @transform_7(%arg0: i32, %arg1: i32) -> (i32, i32) {
    %c0_i32 = arith.constant 0 : i32
    %c0_i32_0 = arith.constant 0 : i32
    %c0_i32_1 = arith.constant 0 : i32
    return %c0_i32, %c0_i32_0 : i32, i32
  }
  func.func @transform_8(%arg0: i32, %arg1: i32) -> (i32, i32) {
    %c0_i32 = arith.constant 0 : i32
    %c0_i32_0 = arith.constant 0 : i32
    %c0_i32_1 = arith.constant 0 : i32
    return %c0_i32, %c0_i32_0 : i32, i32
  }
  func.func @transform_9(%arg0: i32, %arg1: i32) -> (i32, i32, i32, i32) {
    %c0_i32 = arith.constant 0 : i32
    %c0_i32_0 = arith.constant 0 : i32
    %c0_i32_1 = arith.constant 0 : i32
    return %arg0, %arg1, %c0_i32, %c0_i32_0 : i32, i32, i32, i32
  }
}

module attributes {stable_mosaic.version = 11 : i64} {
  func.func @_bb_kernel(%arg0: i32, %arg1: memref<256x16xbf16, #tpu.memory_space<vmem>>, %arg2: memref<256x16xbf16, #tpu.memory_space<vmem>>, %arg3: memref<256x16xbf16, #tpu.memory_space<vmem>>, %arg4: memref<256x16xbf16, #tpu.memory_space<vmem>>, %arg5: memref<4x16x16xbf16, #tpu.memory_space<vmem>>, %arg6: memref<1x16xf32, #tpu.memory_space<vmem>>, %arg7: memref<256x16xbf16, #tpu.memory_space<vmem>>) attributes {dimension_semantics = [#tpu.dimension_semantics<parallel>], iteration_bounds = array<i64: 2>, scalar_prefetch = 0 : i64, scratch_operands = 0 : i64, tpu.core_type = #tpu.core_type<tc>, window_params = [{transform_indices = @transform_0, window_bounds = array<i64: 256, 16>}, {transform_indices = @transform_1, window_bounds = array<i64: 256, 16>}, {transform_indices = @transform_2, window_bounds = array<i64: 256, 16>}, {transform_indices = @transform_3, window_bounds = array<i64: 256, 16>}, {pipeline_mode = #tpu.pipeline_mode<synchronous>, transform_indices = @transform_4, window_bounds = array<i64: 4, 16, 16>}, {pipeline_mode = #tpu.pipeline_mode<synchronous>, transform_indices = @transform_5, window_bounds = array<i64: 1, 16>}, {transform_indices = @transform_6, window_bounds = array<i64: 256, 16>}]} {
    %c0 = arith.constant 0 : index
    %c0_0 = arith.constant 0 : index
    %c0_1 = arith.constant 0 : index
    %0 = vector.load %arg5[%c0, %c0_0, %c0_1] : memref<4x16x16xbf16, #tpu.memory_space<vmem>>, vector<4x16x16xbf16>
    %c0_2 = arith.constant 0 : index
    %c0_3 = arith.constant 0 : index
    %1 = vector.load %arg1[%c0_2, %c0_3] : memref<256x16xbf16, #tpu.memory_space<vmem>>, vector<256x16xbf16>
    %2 = vector.extract_strided_slice %0 {offsets = [0, 0, 0], sizes = [1, 16, 16], strides = [1, 1, 1]} : vector<4x16x16xbf16> to vector<1x16x16xbf16>
    %3 = vector.shape_cast %2 : vector<1x16x16xbf16> to vector<16x16xbf16>
    %cst = arith.constant dense<0.000000e+00> : vector<256x16xf32>
    %4 = tpu.matmul %1, %3, %cst {dimension_numbers = #tpu.dot_dimension_numbers<[1], [0], [0], [1], [0, 0, 1, 1], [], []>} : vector<256x16xbf16>, vector<16x16xbf16>, vector<256x16xf32> -> vector<256x16xf32>
    %c0_4 = arith.constant 0 : index
    %c0_5 = arith.constant 0 : index
    %5 = vector.load %arg2[%c0_4, %c0_5] : memref<256x16xbf16, #tpu.memory_space<vmem>>, vector<256x16xbf16>
    %6 = vector.extract_strided_slice %0 {offsets = [1, 0, 0], sizes = [1, 16, 16], strides = [1, 1, 1]} : vector<4x16x16xbf16> to vector<1x16x16xbf16>
    %7 = vector.shape_cast %6 : vector<1x16x16xbf16> to vector<16x16xbf16>
    %cst_6 = arith.constant dense<0.000000e+00> : vector<256x16xf32>
    %8 = tpu.matmul %5, %7, %cst_6 {dimension_numbers = #tpu.dot_dimension_numbers<[1], [0], [0], [1], [0, 0, 1, 1], [], []>} : vector<256x16xbf16>, vector<16x16xbf16>, vector<256x16xf32> -> vector<256x16xf32>
    %9 = arith.addf %4, %8 : vector<256x16xf32>
    %c0_7 = arith.constant 0 : index
    %c0_8 = arith.constant 0 : index
    %10 = vector.load %arg3[%c0_7, %c0_8] : memref<256x16xbf16, #tpu.memory_space<vmem>>, vector<256x16xbf16>
    %11 = vector.extract_strided_slice %0 {offsets = [2, 0, 0], sizes = [1, 16, 16], strides = [1, 1, 1]} : vector<4x16x16xbf16> to vector<1x16x16xbf16>
    %12 = vector.shape_cast %11 : vector<1x16x16xbf16> to vector<16x16xbf16>
    %cst_9 = arith.constant dense<0.000000e+00> : vector<256x16xf32>
    %13 = tpu.matmul %10, %12, %cst_9 {dimension_numbers = #tpu.dot_dimension_numbers<[1], [0], [0], [1], [0, 0, 1, 1], [], []>} : vector<256x16xbf16>, vector<16x16xbf16>, vector<256x16xf32> -> vector<256x16xf32>
    %14 = arith.addf %9, %13 : vector<256x16xf32>
    %c0_10 = arith.constant 0 : index
    %c0_11 = arith.constant 0 : index
    %15 = vector.load %arg4[%c0_10, %c0_11] : memref<256x16xbf16, #tpu.memory_space<vmem>>, vector<256x16xbf16>
    %16 = vector.extract_strided_slice %0 {offsets = [3, 0, 0], sizes = [1, 16, 16], strides = [1, 1, 1]} : vector<4x16x16xbf16> to vector<1x16x16xbf16>
    %17 = vector.shape_cast %16 : vector<1x16x16xbf16> to vector<16x16xbf16>
    %cst_12 = arith.constant dense<0.000000e+00> : vector<256x16xf32>
    %18 = tpu.matmul %15, %17, %cst_12 {dimension_numbers = #tpu.dot_dimension_numbers<[1], [0], [0], [1], [0, 0, 1, 1], [], []>} : vector<256x16xbf16>, vector<16x16xbf16>, vector<256x16xf32> -> vector<256x16xf32>
    %19 = arith.addf %14, %18 : vector<256x16xf32>
    %c0_13 = arith.constant 0 : index
    %c0_14 = arith.constant 0 : index
    %20 = vector.load %arg6[%c0_13, %c0_14] : memref<1x16xf32, #tpu.memory_space<vmem>>, vector<1x16xf32>
    %21 = vector.broadcast %20 : vector<1x16xf32> to vector<256x16xf32>
    %22 = arith.addf %19, %21 : vector<256x16xf32>
    %cst_15 = arith.constant 0.000000e+00 : f32
    %23 = vector.broadcast %cst_15 : f32 to vector<256x16xf32>
    %24 = arith.maximumf %22, %23 : vector<256x16xf32>
    %25 = arith.truncf %24 : vector<256x16xf32> to vector<256x16xbf16>
    %c0_16 = arith.constant 0 : index
    %c0_17 = arith.constant 0 : index
    %26 = vector.load %arg7[%c0_16, %c0_17] : memref<256x16xbf16, #tpu.memory_space<vmem>>, vector<256x16xbf16>
    tpu.vector_store %arg7[%c0_16, %c0_17], %25 {strides = array<i32>} : memref<256x16xbf16, #tpu.memory_space<vmem>>, vector<256x16xbf16>,
    return
  }
  func.func @transform_0(%arg0: i32) -> (i32, i32) {
    %c0_i32 = arith.constant 0 : i32
    %c0_i32_0 = arith.constant 0 : i32
    return %arg0, %c0_i32 : i32, i32
  }
  func.func @transform_1(%arg0: i32) -> (i32, i32) {
    %c0_i32 = arith.constant 0 : i32
    %c0_i32_0 = arith.constant 0 : i32
    return %arg0, %c0_i32 : i32, i32
  }
  func.func @transform_2(%arg0: i32) -> (i32, i32) {
    %c0_i32 = arith.constant 0 : i32
    %c0_i32_0 = arith.constant 0 : i32
    return %arg0, %c0_i32 : i32, i32
  }
  func.func @transform_3(%arg0: i32) -> (i32, i32) {
    %c0_i32 = arith.constant 0 : i32
    %c0_i32_0 = arith.constant 0 : i32
    return %arg0, %c0_i32 : i32, i32
  }
  func.func @transform_4(%arg0: i32) -> (i32, i32, i32) {
    %c0_i32 = arith.constant 0 : i32
    %c0_i32_0 = arith.constant 0 : i32
    %c0_i32_1 = arith.constant 0 : i32
    %c0_i32_2 = arith.constant 0 : i32
    return %c0_i32, %c0_i32_0, %c0_i32_1 : i32, i32, i32
  }
  func.func @transform_5(%arg0: i32) -> (i32, i32) {
    %c0_i32 = arith.constant 0 : i32
    %c0_i32_0 = arith.constant 0 : i32
    %c0_i32_1 = arith.constant 0 : i32
    return %c0_i32, %c0_i32_0 : i32, i32
  }
  func.func @transform_6(%arg0: i32) -> (i32, i32) {
    %c0_i32 = arith.constant 0 : i32
    %c0_i32_0 = arith.constant 0 : i32
    return %arg0, %c0_i32 : i32, i32
  }
}

module attributes {stable_mosaic.version = 11 : i64} {
  func.func @_bb_kernel(%arg0: i32, %arg1: memref<256x16xbf16, #tpu.memory_space<vmem>>, %arg2: memref<256x16xbf16, #tpu.memory_space<vmem>>, %arg3: memref<256x16xbf16, #tpu.memory_space<vmem>>, %arg4: memref<256x16xbf16, #tpu.memory_space<vmem>>, %arg5: memref<256x16xbf16, #tpu.memory_space<vmem>>, %arg6: memref<5x16x16xbf16, #tpu.memory_space<vmem>>, %arg7: memref<1x16xf32, #tpu.memory_space<vmem>>, %arg8: memref<256x16xbf16, #tpu.memory_space<vmem>>) attributes {dimension_semantics = [#tpu.dimension_semantics<parallel>], iteration_bounds = array<i64: 2>, scalar_prefetch = 0 : i64, scratch_operands = 0 : i64, tpu.core_type = #tpu.core_type<tc>, window_params = [{transform_indices = @transform_0, window_bounds = array<i64: 256, 16>}, {transform_indices = @transform_1, window_bounds = array<i64: 256, 16>}, {transform_indices = @transform_2, window_bounds = array<i64: 256, 16>}, {transform_indices = @transform_3, window_bounds = array<i64: 256, 16>}, {transform_indices = @transform_4, window_bounds = array<i64: 256, 16>}, {pipeline_mode = #tpu.pipeline_mode<synchronous>, transform_indices = @transform_5, window_bounds = array<i64: 5, 16, 16>}, {pipeline_mode = #tpu.pipeline_mode<synchronous>, transform_indices = @transform_6, window_bounds = array<i64: 1, 16>}, {transform_indices = @transform_7, window_bounds = array<i64: 256, 16>}]} {
    %c0 = arith.constant 0 : index
    %c0_0 = arith.constant 0 : index
    %c0_1 = arith.constant 0 : index
    %0 = vector.load %arg6[%c0, %c0_0, %c0_1] : memref<5x16x16xbf16, #tpu.memory_space<vmem>>, vector<5x16x16xbf16>
    %c0_2 = arith.constant 0 : index
    %c0_3 = arith.constant 0 : index
    %1 = vector.load %arg1[%c0_2, %c0_3] : memref<256x16xbf16, #tpu.memory_space<vmem>>, vector<256x16xbf16>
    %2 = vector.extract_strided_slice %0 {offsets = [0, 0, 0], sizes = [1, 16, 16], strides = [1, 1, 1]} : vector<5x16x16xbf16> to vector<1x16x16xbf16>
    %3 = vector.shape_cast %2 : vector<1x16x16xbf16> to vector<16x16xbf16>
    %cst = arith.constant dense<0.000000e+00> : vector<256x16xf32>
    %4 = tpu.matmul %1, %3, %cst {dimension_numbers = #tpu.dot_dimension_numbers<[1], [0], [0], [1], [0, 0, 1, 1], [], []>} : vector<256x16xbf16>, vector<16x16xbf16>, vector<256x16xf32> -> vector<256x16xf32>
    %c0_4 = arith.constant 0 : index
    %c0_5 = arith.constant 0 : index
    %5 = vector.load %arg2[%c0_4, %c0_5] : memref<256x16xbf16, #tpu.memory_space<vmem>>, vector<256x16xbf16>
    %6 = vector.extract_strided_slice %0 {offsets = [1, 0, 0], sizes = [1, 16, 16], strides = [1, 1, 1]} : vector<5x16x16xbf16> to vector<1x16x16xbf16>
    %7 = vector.shape_cast %6 : vector<1x16x16xbf16> to vector<16x16xbf16>
    %cst_6 = arith.constant dense<0.000000e+00> : vector<256x16xf32>
    %8 = tpu.matmul %5, %7, %cst_6 {dimension_numbers = #tpu.dot_dimension_numbers<[1], [0], [0], [1], [0, 0, 1, 1], [], []>} : vector<256x16xbf16>, vector<16x16xbf16>, vector<256x16xf32> -> vector<256x16xf32>
    %9 = arith.addf %4, %8 : vector<256x16xf32>
    %c0_7 = arith.constant 0 : index
    %c0_8 = arith.constant 0 : index
    %10 = vector.load %arg3[%c0_7, %c0_8] : memref<256x16xbf16, #tpu.memory_space<vmem>>, vector<256x16xbf16>
    %11 = vector.extract_strided_slice %0 {offsets = [2, 0, 0], sizes = [1, 16, 16], strides = [1, 1, 1]} : vector<5x16x16xbf16> to vector<1x16x16xbf16>
    %12 = vector.shape_cast %11 : vector<1x16x16xbf16> to vector<16x16xbf16>
    %cst_9 = arith.constant dense<0.000000e+00> : vector<256x16xf32>
    %13 = tpu.matmul %10, %12, %cst_9 {dimension_numbers = #tpu.dot_dimension_numbers<[1], [0], [0], [1], [0, 0, 1, 1], [], []>} : vector<256x16xbf16>, vector<16x16xbf16>, vector<256x16xf32> -> vector<256x16xf32>
    %14 = arith.addf %9, %13 : vector<256x16xf32>
    %c0_10 = arith.constant 0 : index
    %c0_11 = arith.constant 0 : index
    %15 = vector.load %arg4[%c0_10, %c0_11] : memref<256x16xbf16, #tpu.memory_space<vmem>>, vector<256x16xbf16>
    %16 = vector.extract_strided_slice %0 {offsets = [3, 0, 0], sizes = [1, 16, 16], strides = [1, 1, 1]} : vector<5x16x16xbf16> to vector<1x16x16xbf16>
    %17 = vector.shape_cast %16 : vector<1x16x16xbf16> to vector<16x16xbf16>
    %cst_12 = arith.constant dense<0.000000e+00> : vector<256x16xf32>
    %18 = tpu.matmul %15, %17, %cst_12 {dimension_numbers = #tpu.dot_dimension_numbers<[1], [0], [0], [1], [0, 0, 1, 1], [], []>} : vector<256x16xbf16>, vector<16x16xbf16>, vector<256x16xf32> -> vector<256x16xf32>
    %19 = arith.addf %14, %18 : vector<256x16xf32>
    %c0_13 = arith.constant 0 : index
    %c0_14 = arith.constant 0 : index
    %20 = vector.load %arg5[%c0_13, %c0_14] : memref<256x16xbf16, #tpu.memory_space<vmem>>, vector<256x16xbf16>
    %21 = vector.extract_strided_slice %0 {offsets = [4, 0, 0], sizes = [1, 16, 16], strides = [1, 1, 1]} : vector<5x16x16xbf16> to vector<1x16x16xbf16>
    %22 = vector.shape_cast %21 : vector<1x16x16xbf16> to vector<16x16xbf16>
    %cst_15 = arith.constant dense<0.000000e+00> : vector<256x16xf32>
    %23 = tpu.matmul %20, %22, %cst_15 {dimension_numbers = #tpu.dot_dimension_numbers<[1], [0], [0], [1], [0, 0, 1, 1], [], []>} : vector<256x16xbf16>, vector<16x16xbf16>, vector<256x16xf32> -> vector<256x16xf32>
    %24 = arith.addf %19, %23 : vector<256x16xf32>
    %c0_16 = arith.constant 0 : index
    %c0_17 = arith.constant 0 : index
    %25 = vector.load %arg7[%c0_16, %c0_17] : memref<1x16xf32, #tpu.memory_space<vmem>>, vector<1x16xf32>
    %26 = vector.broadcast %25 : vector<1x16xf32> to vector<256x16xf32>
    %27 = arith.addf %24, %26 : vector<256x16xf32>
    %cst_18 = arith.constant 0.000000e+00 : f32
    %28 = vector.broadcast %cst_18 : f32 to vector<256x16xf32>
    %29 = arith.maximumf %27, %28 : vector<256x16xf32>
    %30 = arith.truncf %29 : vector<256x16xf32> to vector<256x16xbf16>
    %c0_19 = arith.constant 0 : index
    %c0_20 = arith.constant 0 : index
    %31 = vector.load %arg8[%c0_19, %c0_20] : memref<256x16xbf16, #tpu.memory_space<vmem>>, vector<256x16xbf16>
    tpu.vector_store %arg8[%c0_19, %c0_20], %30 {strides = array<i32>} : memref<256x16xbf16, #tpu.memory_space<vmem>>, vector<256x16xbf16>,
    return
  }
  func.func @transform_0(%arg0: i32) -> (i32, i32) {
    %c0_i32 = arith.constant 0 : i32
    %c0_i32_0 = arith.constant 0 : i32
    return %arg0, %c0_i32 : i32, i32
  }
  func.func @transform_1(%arg0: i32) -> (i32, i32) {
    %c0_i32 = arith.constant 0 : i32
    %c0_i32_0 = arith.constant 0 : i32
    return %arg0, %c0_i32 : i32, i32
  }
  func.func @transform_2(%arg0: i32) -> (i32, i32) {
    %c0_i32 = arith.constant 0 : i32
    %c0_i32_0 = arith.constant 0 : i32
    return %arg0, %c0_i32 : i32, i32
  }
  func.func @transform_3(%arg0: i32) -> (i32, i32) {
    %c0_i32 = arith.constant 0 : i32
    %c0_i32_0 = arith.constant 0 : i32
    return %arg0, %c0_i32 : i32, i32
  }
  func.func @transform_4(%arg0: i32) -> (i32, i32) {
    %c0_i32 = arith.constant 0 : i32
    %c0_i32_0 = arith.constant 0 : i32
    return %arg0, %c0_i32 : i32, i32
  }
  func.func @transform_5(%arg0: i32) -> (i32, i32, i32) {
    %c0_i32 = arith.constant 0 : i32
    %c0_i32_0 = arith.constant 0 : i32
    %c0_i32_1 = arith.constant 0 : i32
    %c0_i32_2 = arith.constant 0 : i32
    return %c0_i32, %c0_i32_0, %c0_i32_1 : i32, i32, i32
  }
  func.func @transform_6(%arg0: i32) -> (i32, i32) {
    %c0_i32 = arith.constant 0 : i32
    %c0_i32_0 = arith.constant 0 : i32
    %c0_i32_1 = arith.constant 0 : i32
    return %c0_i32, %c0_i32_0 : i32, i32
  }
  func.func @transform_7(%arg0: i32) -> (i32, i32) {
    %c0_i32 = arith.constant 0 : i32
    %c0_i32_0 = arith.constant 0 : i32
    return %arg0, %c0_i32 : i32, i32
  }
}

</mosaic_0001>

<bundles_post_ra>
// kernel: block4_forward.9
= control target key start
LH: loop header
LB: loop body
LE: loop exit
PB: predicated region body
PF: predicated region fallthrough
CT: control target
= control target key end

     0   :  { %s1536_s15 = smov 0   ;;  %s1738_s0 = inlined_call_operand.vmem [shape: bf16[512,16], index: 0, kind: input, shape index: {}]   ;;  %s1739_s1 = inlined_call_operand.vmem [shape: bf16[512,16], index: 1, kind: input, shape index: {}]   ;;  %s1740_s2 = inlined_call_operand.vmem [shape: bf16[2,16,16], index: 2, kind: input, shape index: {}]   ;;  %s1741_s3 = inlined_call_operand.vmem [shape: f32[1,16], index: 3, kind: input, shape index: {}]   ;;  %s1742_s4 = inlined_call_operand.vmem [shape: bf16[512,16], index: 4, kind: output, shape index: {}]  }
   0x1 LB: > { %s1183_s16 = sadd.s32 4294967295, %s1509_s15   ;;  %p1187_p0 = scmp.ge.s32.totalorder %s1509_s15, 1  ;;  %s1509_s15 = sphi %s1536_s15, %s14_s15  }
   0x2   : > { %p174_p1 = scmp.lt.s32.totalorder %s1509_s15, 3 }
   0x4   : > { %p175_p2 = pnand %p1187_p0, %p174_p1 }
   0x5   : > { %v1469_v0 = vld [vmem:[%s1740_s2 + $0x8] sm:$0xff] (!%p175_p2)   ;;  %s1188_s19 = sshll.u32 (!%p175_p2), %s1183_s16, 5  ;;  %v1470_v1 = vld [vmem:[%s1740_s2] sm:$0xff] (!%p175_p2)   ;;  %vm378_vm0 = vcmask (!%p175_p2), 130048   ;;  %vm1082_vm1 = vcmask (!%p175_p2), 125952  }
   0x6   : > { %178 = sbr.rel (%p175_p2) target bundleno = 299 (0x12b), region = 36  ;;  %p206_p3 = scmp.lt.s32.totalorder (!%p175_p2), %s1188_s19, 63  ;;  %1361 = vmatprep.subr.bf16.mxu1 (!%p175_p2), %v1469_v0  ;;  %1395 = vmatprep.subr.bf16.mxu0 (!%p175_p2), %v1470_v1  ;;  %v1631_v36 = vld [vmem:[%s1741_s3] ss:$0 sm:$0xff] (!%p175_p2) }
   0x7   : > { %1362 = vmatpush3.bf16.msra.mxu1 (!%p175_p2), %v1469_v0  ;;  %1396 = vmatpush3.bf16.msra.mxu0 (!%p175_p2), %v1470_v1 }
   0xd   : > { %s1744_s19 = smov (!%p206_p3, %s1188_s19), 63 }
   0xe   : > { %s1550_s22 = sshll.u32 %s1744_s19, 2 }
   0xf   : > { %s1556_s25 = scalar_lea.vmem %s1739_s1, %s1550_s22  ;;  %s1563_s28 = scalar_lea.vmem %s1738_s0, %s1550_s22 }
  0x10   : > { %v1471_v2 = vld [vmem:[%s1556_s25] sm:$0xff]   ;;  %v1473_v4 = vld [vmem:[%s1556_s25 + $0x8] sm:$0xff]   ;;  %v1475_v6 = vld [vmem:[%s1556_s25 + $0x10] sm:$0xff]   ;;  %s1640_s7 = scalar_lea.vmem %s1742_s4, %s1550_s22 }
  0x11   : > { %v1472_v3 = vld [vmem:[%s1563_s28] sm:$0xff]   ;;  %1363 = vmatprep.mubr.msk.bf16.mxu1 %vm378_vm0, %v1471_v2  ;;  %v1474_v5 = vld [vmem:[%s1563_s28 + $0x8] sm:$0xff]   ;;  %v1476_v7 = vld [vmem:[%s1563_s28 + $0x10] sm:$0xff]  }
  0x12   : > { %1397 = vmatprep.mubr.msk.bf16.mxu0 %vm378_vm0, %v1472_v3  ;;  %1364 = vmatmul.mubr.msk.bf16.vlgmr.msra.gmra.mrb[0].mxu1 %vm378_vm0, %v1473_v4  ;;  %v1477_v8 = vld [vmem:[%s1556_s25 + $0x18] sm:$0xff]   ;;  %v1479_v10 = vld [vmem:[%s1556_s25 + $0x20] sm:$0xff]   ;;  %v1481_v12 = vld [vmem:[%s1556_s25 + $0x28] sm:$0xff]  }
  0x13   : > { %1398 = vmatmul.mubr.msk.bf16.vlgmr.msra.gmra.mrb[0].mxu0 %vm378_vm0, %v1474_v5  ;;  %1367 = vmatprep.mubr.msk.bf16.mxu1 %vm378_vm0, %v1475_v6  ;;  %v1478_v9 = vld [vmem:[%s1563_s28 + $0x18] sm:$0xff]   ;;  %v1480_v11 = vld [vmem:[%s1563_s28 + $0x20] sm:$0xff]   ;;  %v1482_v13 = vld [vmem:[%s1563_s28 + $0x28] sm:$0xff]  }
  0x14   : > { %1401 = vmatprep.mubr.msk.bf16.mxu0 %vm378_vm0, %v1476_v7  ;;  %v1483_v14 = vld [vmem:[%s1556_s25 + $0x30] sm:$0xff]   ;;  %v1485_v16 = vld [vmem:[%s1556_s25 + $0x38] sm:$0xff]   ;;  %v1487_v18 = vld [vmem:[%s1556_s25 + $0x40] sm:$0xff]  }
  0x15   : > { %v1484_v15 = vld [vmem:[%s1563_s28 + $0x30] sm:$0xff]   ;;  %v1486_v17 = vld [vmem:[%s1563_s28 + $0x38] sm:$0xff]   ;;  %v1488_v19 = vld [vmem:[%s1563_s28 + $0x40] sm:$0xff]  }
  0x16   : > { %v1489_v20 = vld [vmem:[%s1556_s25 + $0x48] sm:$0xff]   ;;  %v1491_v22 = vld [vmem:[%s1556_s25 + $0x50] sm:$0xff]   ;;  %v1493_v24 = vld [vmem:[%s1556_s25 + $0x58] sm:$0xff]  }
  0x17   : > { %v1490_v21 = vld [vmem:[%s1563_s28 + $0x48] sm:$0xff]   ;;  %v1492_v23 = vld [vmem:[%s1563_s28 + $0x50] sm:$0xff]   ;;  %v1494_v25 = vld [vmem:[%s1563_s28 + $0x58] sm:$0xff]  }
  0x18   : > { %v1495_v26 = vld [vmem:[%s1556_s25 + $0x60] sm:$0xff]   ;;  %v1497_v28 = vld [vmem:[%s1556_s25 + $0x68] sm:$0xff]   ;;  %v1499_v30 = vld [vmem:[%s1556_s25 + $0x70] sm:$0xff]  }
  0x19   : > { %v1496_v27 = vld [vmem:[%s1563_s28 + $0x60] sm:$0xff]   ;;  %v1498_v29 = vld [vmem:[%s1563_s28 + $0x68] sm:$0xff]   ;;  %v1500_v31 = vld [vmem:[%s1563_s28 + $0x70] sm:$0xff]  }
  0x1a   : > { %1368 = vmatmul.mubr.msk.bf16.gmra.mrb[4].mxu1 %vm378_vm0, %v1477_v8  ;;  %v1501_v32 = vld [vmem:[%s1556_s25 + $0x78] sm:$0xff]  }
  0x1b   : > { %1402 = vmatmul.mubr.msk.bf16.gmra.mrb[4].mxu0 %vm378_vm0, %v1478_v9  ;;  %1371 = vmatprep.mubr.msk.bf16.mxu1 %vm378_vm0, %v1479_v10  ;;  %v1502_v33 = vld [vmem:[%s1563_s28 + $0x78] sm:$0xff]  }
  0x1c   : > { %1405 = vmatprep.mubr.msk.bf16.mxu0 %vm378_vm0, %v1480_v11 }
  0x22   : > { %1372 = vmatmul.mubr.msk.bf16.gmra.mrb[8].mxu1 %vm378_vm0, %v1481_v12 }
  0x23   : > { %1406 = vmatmul.mubr.msk.bf16.gmra.mrb[8].mxu0 %vm378_vm0, %v1482_v13  ;;  %1375 = vmatprep.mubr.msk.bf16.mxu1 %vm378_vm0, %v1483_v14 }
  0x24   : > { %1409 = vmatprep.mubr.msk.bf16.mxu0 %vm378_vm0, %v1484_v15 }
  0x2a   : > { %1376 = vmatmul.mubr.msk.bf16.gmra.mrb[12].mxu1 %vm378_vm0, %v1485_v16 }
  0x2b   : > { %1410 = vmatmul.mubr.msk.bf16.gmra.mrb[12].mxu0 %vm378_vm0, %v1486_v17  ;;  %1379 = vmatprep.mubr.msk.bf16.mxu1 %vm378_vm0, %v1487_v18 }
  0x2c   : > { %1413 = vmatprep.mubr.msk.bf16.mxu0 %vm378_vm0, %v1488_v19 }
  0x32   : > { %1380 = vmatmul.mubr.msk.bf16.gmra.mrb[16].mxu1 %vm378_vm0, %v1489_v20 }
  0x33   : > { %1414 = vmatmul.mubr.msk.bf16.gmra.mrb[16].mxu0 %vm378_vm0, %v1490_v21  ;;  %1383 = vmatprep.mubr.msk.bf16.mxu1 %vm378_vm0, %v1491_v22 }
  0x34   : > { %1417 = vmatprep.mubr.msk.bf16.mxu0 %vm378_vm0, %v1492_v23 }
  0x3a   : > { %1384 = vmatmul.mubr.msk.bf16.gmra.mrb[20].mxu1 %vm378_vm0, %v1493_v24 }
  0x3b   : > { %1418 = vmatmul.mubr.msk.bf16.gmra.mrb[20].mxu0 %vm378_vm0, %v1494_v25  ;;  %1387 = vmatprep.mubr.msk.bf16.mxu1 %vm378_vm0, %v1495_v26 }
  0x3c   : > { %1421 = vmatprep.mubr.msk.bf16.mxu0 %vm378_vm0, %v1496_v27 }
  0x42   : > { %1388 = vmatmul.mubr.msk.bf16.gmra.mrb[24].mxu1 %vm378_vm0, %v1497_v28 }
  0x43   : > { %1422 = vmatmul.mubr.msk.bf16.gmra.mrb[24].mxu0 %vm378_vm0, %v1498_v29  ;;  %1391 = vmatprep.mubr.msk.bf16.mxu1 %vm378_vm0, %v1499_v30 }
  0x44   : > { %1425 = vmatprep.mubr.msk.bf16.mxu0 %vm378_vm0, %v1500_v31 }
  0x4a   : > { %1392 = vmatmul.mubr.msk.bf16.gmra.mrb[28].mxu1 %vm378_vm0, %v1501_v32 }
  0x4b   : > { %1426 = vmatmul.mubr.msk.bf16.gmra.mrb[28].mxu0 %vm378_vm0, %v1502_v33 }
  0xe5   : > { %v1365_v34 = vpop.f32.mrb[0].mxu1 }
  0xe6   : > { %v1399_v35 = vpop.f32.mrb[0].mxu0  ;;  %v461_v37 = vpop.f32.mrb[1].mxu1 }
  0xe7   : > { %v765_v38 = vadd.f32 %v1399_v35, %v1365_v34  ;;  %v756_v39 = vpop.f32.mrb[1].mxu0  ;;  %v1366_v40 = vpop.f32.mrb[2].mxu1 }
  0xe8   : > { %v757_v41 = vadd.f32 %v756_v39, %v461_v37  ;;  %v1400_v42 = vpop.f32.mrb[2].mxu0  ;;  %v464_v43 = vpop.f32.mrb[3].mxu1 }
  0xe9   : > { %v892_v44 = vadd.f32 %v1631_v36, %v765_v38  ;;  %v768_v45 = vadd.f32 %v1400_v42, %v1366_v40  ;;  %v759_v46 = vpop.f32.mrb[3].mxu0 }
  0xea   : > { %v890_v47 = vadd.f32 %v1631_v36, %v757_v41  ;;  %v760_v48 = vadd.f32 %v759_v46, %v464_v43 }
  0xeb   : > { %v924_v49 = vmax.f32 %v892_v44, 0.0  ;;  %v893_v50 = vadd.f32 %v1631_v36, %v768_v45 }
  0xec   : > { %v922_v51 = vmax.f32 %v890_v47, 0.0  ;;  %v891_v52 = vadd.f32 %v1631_v36, %v760_v48 }
  0xed   : > { %v1297_v53 = vpack.c.bf16 %v924_v49, %v924_v49  ;;  %v925_v54 = vmax.f32 %v893_v50, 0.0  ;;  %v1369_v55 = vpop.f32.mrb[4].mxu1 }
  0xee   : > { %v1295_v56 = vpack.c.bf16 %v922_v51, %v922_v51  ;;  %v923_v57 = vmax.f32 %v891_v52, 0.0  ;;  %v1403_v58 = vpop.f32.mrb[4].mxu0  ;;  %v477_v59 = vpop.f32.mrb[5].mxu1 }
  0xef   : > { %1085 = vst.msk [vmem:[%s1640_s7 + $0x8] sm:$0xf] %vm1082_vm1, %v1297_v53  ;;  %v1298_v60 = vpack.c.bf16 %v925_v54, %v925_v54  ;;  %v781_v61 = vadd.f32 %v1403_v58, %v1369_v55  ;;  %v772_v62 = vpop.f32.mrb[5].mxu0  ;;  %v1370_v63 = vpop.f32.mrb[6].mxu1 }
  0xf0   : > { %1083 = vst.msk [vmem:[%s1640_s7] sm:$0xf] %vm1082_vm1, %v1295_v56  ;;  %v1296_v0 = vpack.c.bf16 %v923_v57, %v923_v57  ;;  %v773_v1 = vadd.f32 %v772_v62, %v477_v59  ;;  %v1404_v2 = vpop.f32.mrb[6].mxu0  ;;  %v480_v3 = vpop.f32.mrb[7].mxu1 }
  0xf1   : > { %1086 = vst.msk [vmem:[%s1640_s7 + $0xc] sm:$0xf] %vm1082_vm1, %v1298_v60  ;;  %v896_v4 = vadd.f32 %v1631_v36, %v781_v61  ;;  %v784_v5 = vadd.f32 %v1404_v2, %v1370_v63  ;;  %v775_v6 = vpop.f32.mrb[7].mxu0 }
  0xf2   : > { %1084 = vst.msk [vmem:[%s1640_s7 + $0x4] sm:$0xf] %vm1082_vm1, %v1296_v0  ;;  %v894_v7 = vadd.f32 %v1631_v36, %v773_v1  ;;  %v776_v8 = vadd.f32 %v775_v6, %v480_v3 }
  0xf3   : > { %v928_v9 = vmax.f32 %v896_v4, 0.0  ;;  %v897_v10 = vadd.f32 %v1631_v36, %v784_v5 }
  0xf4   : > { %v926_v11 = vmax.f32 %v894_v7, 0.0  ;;  %v895_v12 = vadd.f32 %v1631_v36, %v776_v8 }
  0xf5   : > { %v1301_v13 = vpack.c.bf16 %v928_v9, %v928_v9  ;;  %v929_v14 = vmax.f32 %v897_v10, 0.0  ;;  %v1373_v15 = vpop.f32.mrb[8].mxu1 }
  0xf6   : > { %v1299_v16 = vpack.c.bf16 %v926_v11, %v926_v11  ;;  %v927_v17 = vmax.f32 %v895_v12, 0.0  ;;  %v1407_v18 = vpop.f32.mrb[8].mxu0  ;;  %v493_v19 = vpop.f32.mrb[9].mxu1 }
  0xf7   : > { %1089 = vst.msk [vmem:[%s1640_s7 + $0x18] sm:$0xf] %vm1082_vm1, %v1301_v13  ;;  %v1302_v20 = vpack.c.bf16 %v929_v14, %v929_v14  ;;  %v797_v21 = vadd.f32 %v1407_v18, %v1373_v15  ;;  %v788_v22 = vpop.f32.mrb[9].mxu0  ;;  %v1374_v23 = vpop.f32.mrb[10].mxu1 }
  0xf8   : > { %1087 = vst.msk [vmem:[%s1640_s7 + $0x10] sm:$0xf] %vm1082_vm1, %v1299_v16  ;;  %v1300_v24 = vpack.c.bf16 %v927_v17, %v927_v17  ;;  %v789_v25 = vadd.f32 %v788_v22, %v493_v19  ;;  %v1408_v26 = vpop.f32.mrb[10].mxu0  ;;  %v496_v27 = vpop.f32.mrb[11].mxu1 }
  0xf9   : > { %1090 = vst.msk [vmem:[%s1640_s7 + $0x1c] sm:$0xf] %vm1082_vm1, %v1302_v20  ;;  %v900_v28 = vadd.f32 %v1631_v36, %v797_v21  ;;  %v800_v29 = vadd.f32 %v1408_v26, %v1374_v23  ;;  %v791_v30 = vpop.f32.mrb[11].mxu0 }
  0xfa   : > { %1088 = vst.msk [vmem:[%s1640_s7 + $0x14] sm:$0xf] %vm1082_vm1, %v1300_v24  ;;  %v898_v31 = vadd.f32 %v1631_v36, %v789_v25  ;;  %v792_v32 = vadd.f32 %v791_v30, %v496_v27 }
  0xfb   : > { %v932_v33 = vmax.f32 %v900_v28, 0.0  ;;  %v901_v34 = vadd.f32 %v1631_v36, %v800_v29 }
  0xfc   : > { %v930_v35 = vmax.f32 %v898_v31, 0.0  ;;  %v899_v37 = vadd.f32 %v1631_v36, %v792_v32 }
  0xfd   : > { %v1305_v38 = vpack.c.bf16 %v932_v33, %v932_v33  ;;  %v933_v39 = vmax.f32 %v901_v34, 0.0  ;;  %v1377_v40 = vpop.f32.mrb[12].mxu1 }
  0xfe   : > { %v1303_v41 = vpack.c.bf16 %v930_v35, %v930_v35  ;;  %v931_v42 = vmax.f32 %v899_v37, 0.0  ;;  %v1411_v43 = vpop.f32.mrb[12].mxu0  ;;  %v509_v44 = vpop.f32.mrb[13].mxu1 }
  0xff   : > { %1093 = vst.msk [vmem:[%s1640_s7 + $0x28] sm:$0xf] %vm1082_vm1, %v1305_v38  ;;  %v1306_v45 = vpack.c.bf16 %v933_v39, %v933_v39  ;;  %v813_v46 = vadd.f32 %v1411_v43, %v1377_v40  ;;  %v804_v47 = vpop.f32.mrb[13].mxu0  ;;  %v1378_v48 = vpop.f32.mrb[14].mxu1 }
 0x100   : > { %1091 = vst.msk [vmem:[%s1640_s7 + $0x20] sm:$0xf] %vm1082_vm1, %v1303_v41  ;;  %v1304_v49 = vpack.c.bf16 %v931_v42, %v931_v42  ;;  %v805_v50 = vadd.f32 %v804_v47, %v509_v44  ;;  %v1412_v51 = vpop.f32.mrb[14].mxu0  ;;  %v512_v52 = vpop.f32.mrb[15].mxu1 }
 0x101   : > { %1094 = vst.msk [vmem:[%s1640_s7 + $0x2c] sm:$0xf] %vm1082_vm1, %v1306_v45  ;;  %v904_v53 = vadd.f32 %v1631_v36, %v813_v46  ;;  %v816_v54 = vadd.f32 %v1412_v51, %v1378_v48  ;;  %v807_v55 = vpop.f32.mrb[15].mxu0 }
 0x102   : > { %1092 = vst.msk [vmem:[%s1640_s7 + $0x24] sm:$0xf] %vm1082_vm1, %v1304_v49  ;;  %v902_v56 = vadd.f32 %v1631_v36, %v805_v50  ;;  %v808_v57 = vadd.f32 %v807_v55, %v512_v52 }
 0x103   : > { %v936_v58 = vmax.f32 %v904_v53, 0.0  ;;  %v905_v59 = vadd.f32 %v1631_v36, %v816_v54 }
 0x104   : > { %v934_v60 = vmax.f32 %v902_v56, 0.0  ;;  %v903_v61 = vadd.f32 %v1631_v36, %v808_v57 }
 0x105   : > { %v1309_v62 = vpack.c.bf16 %v936_v58, %v936_v58  ;;  %v937_v63 = vmax.f32 %v905_v59, 0.0  ;;  %v1381_v0 = vpop.f32.mrb[16].mxu1 }
 0x106   : > { %v1307_v1 = vpack.c.bf16 %v934_v60, %v934_v60  ;;  %v935_v2 = vmax.f32 %v903_v61, 0.0  ;;  %v1415_v3 = vpop.f32.mrb[16].mxu0  ;;  %v525_v4 = vpop.f32.mrb[17].mxu1 }
 0x107   : > { %1097 = vst.msk [vmem:[%s1640_s7 + $0x38] sm:$0xf] %vm1082_vm1, %v1309_v62  ;;  %v1310_v5 = vpack.c.bf16 %v937_v63, %v937_v63  ;;  %v829_v6 = vadd.f32 %v1415_v3, %v1381_v0  ;;  %v820_v7 = vpop.f32.mrb[17].mxu0  ;;  %v1382_v8 = vpop.f32.mrb[18].mxu1 }
 0x108   : > { %1095 = vst.msk [vmem:[%s1640_s7 + $0x30] sm:$0xf] %vm1082_vm1, %v1307_v1  ;;  %v1308_v9 = vpack.c.bf16 %v935_v2, %v935_v2  ;;  %v821_v10 = vadd.f32 %v820_v7, %v525_v4  ;;  %v1416_v11 = vpop.f32.mrb[18].mxu0  ;;  %v528_v12 = vpop.f32.mrb[19].mxu1 }
 0x109   : > { %1098 = vst.msk [vmem:[%s1640_s7 + $0x3c] sm:$0xf] %vm1082_vm1, %v1310_v5  ;;  %v908_v13 = vadd.f32 %v1631_v36, %v829_v6  ;;  %v832_v14 = vadd.f32 %v1416_v11, %v1382_v8  ;;  %v823_v15 = vpop.f32.mrb[19].mxu0 }
 0x10a   : > { %1096 = vst.msk [vmem:[%s1640_s7 + $0x34] sm:$0xf] %vm1082_vm1, %v1308_v9  ;;  %v906_v16 = vadd.f32 %v1631_v36, %v821_v10  ;;  %v824_v17 = vadd.f32 %v823_v15, %v528_v12 }
 0x10b   : > { %v940_v18 = vmax.f32 %v908_v13, 0.0  ;;  %v909_v19 = vadd.f32 %v1631_v36, %v832_v14 }
 0x10c   : > { %v938_v20 = vmax.f32 %v906_v16, 0.0  ;;  %v907_v21 = vadd.f32 %v1631_v36, %v824_v17 }
 0x10d   : > { %v1313_v22 = vpack.c.bf16 %v940_v18, %v940_v18  ;;  %v941_v23 = vmax.f32 %v909_v19, 0.0  ;;  %v1385_v24 = vpop.f32.mrb[20].mxu1 }
 0x10e   : > { %v1311_v25 = vpack.c.bf16 %v938_v20, %v938_v20  ;;  %v939_v26 = vmax.f32 %v907_v21, 0.0  ;;  %v1419_v27 = vpop.f32.mrb[20].mxu0  ;;  %v541_v28 = vpop.f32.mrb[21].mxu1 }
 0x10f   : > { %1101 = vst.msk [vmem:[%s1640_s7 + $0x48] sm:$0xf] %vm1082_vm1, %v1313_v22  ;;  %v1314_v29 = vpack.c.bf16 %v941_v23, %v941_v23  ;;  %v845_v30 = vadd.f32 %v1419_v27, %v1385_v24  ;;  %v836_v31 = vpop.f32.mrb[21].mxu0  ;;  %v1386_v32 = vpop.f32.mrb[22].mxu1 }
 0x110   : > { %1099 = vst.msk [vmem:[%s1640_s7 + $0x40] sm:$0xf] %vm1082_vm1, %v1311_v25  ;;  %v1312_v33 = vpack.c.bf16 %v939_v26, %v939_v26  ;;  %v837_v34 = vadd.f32 %v836_v31, %v541_v28  ;;  %v1420_v35 = vpop.f32.mrb[22].mxu0  ;;  %v544_v37 = vpop.f32.mrb[23].mxu1 }
 0x111   : > { %1102 = vst.msk [vmem:[%s1640_s7 + $0x4c] sm:$0xf] %vm1082_vm1, %v1314_v29  ;;  %v912_v38 = vadd.f32 %v1631_v36, %v845_v30  ;;  %v848_v39 = vadd.f32 %v1420_v35, %v1386_v32  ;;  %v839_v40 = vpop.f32.mrb[23].mxu0 }
 0x112   : > { %1100 = vst.msk [vmem:[%s1640_s7 + $0x44] sm:$0xf] %vm1082_vm1, %v1312_v33  ;;  %v910_v41 = vadd.f32 %v1631_v36, %v837_v34  ;;  %v840_v42 = vadd.f32 %v839_v40, %v544_v37 }
 0x113   : > { %v944_v43 = vmax.f32 %v912_v38, 0.0  ;;  %v913_v44 = vadd.f32 %v1631_v36, %v848_v39 }
 0x114   : > { %v942_v45 = vmax.f32 %v910_v41, 0.0  ;;  %v911_v46 = vadd.f32 %v1631_v36, %v840_v42 }
 0x115   : > { %v1317_v47 = vpack.c.bf16 %v944_v43, %v944_v43  ;;  %v945_v48 = vmax.f32 %v913_v44, 0.0  ;;  %v1389_v49 = vpop.f32.mrb[24].mxu1 }
 0x116   : > { %v1315_v50 = vpack.c.bf16 %v942_v45, %v942_v45  ;;  %v943_v51 = vmax.f32 %v911_v46, 0.0  ;;  %v1423_v52 = vpop.f32.mrb[24].mxu0  ;;  %v557_v53 = vpop.f32.mrb[25].mxu1 }
 0x117   : > { %1105 = vst.msk [vmem:[%s1640_s7 + $0x58] sm:$0xf] %vm1082_vm1, %v1317_v47  ;;  %v1318_v54 = vpack.c.bf16 %v945_v48, %v945_v48  ;;  %v861_v55 = vadd.f32 %v1423_v52, %v1389_v49  ;;  %v852_v56 = vpop.f32.mrb[25].mxu0  ;;  %v1390_v57 = vpop.f32.mrb[26].mxu1 }
 0x118   : > { %1103 = vst.msk [vmem:[%s1640_s7 + $0x50] sm:$0xf] %vm1082_vm1, %v1315_v50  ;;  %v1316_v58 = vpack.c.bf16 %v943_v51, %v943_v51  ;;  %v853_v59 = vadd.f32 %v852_v56, %v557_v53  ;;  %v1424_v60 = vpop.f32.mrb[26].mxu0  ;;  %v560_v61 = vpop.f32.mrb[27].mxu1 }
 0x119   : > { %1106 = vst.msk [vmem:[%s1640_s7 + $0x5c] sm:$0xf] %vm1082_vm1, %v1318_v54  ;;  %v916_v62 = vadd.f32 %v1631_v36, %v861_v55  ;;  %v864_v63 = vadd.f32 %v1424_v60, %v1390_v57  ;;  %v855_v0 = vpop.f32.mrb[27].mxu0 }
 0x11a   : > { %1104 = vst.msk [vmem:[%s1640_s7 + $0x54] sm:$0xf] %vm1082_vm1, %v1316_v58  ;;  %v914_v1 = vadd.f32 %v1631_v36, %v853_v59  ;;  %v856_v2 = vadd.f32 %v855_v0, %v560_v61 }
 0x11b   : > { %v948_v3 = vmax.f32 %v916_v62, 0.0  ;;  %v917_v4 = vadd.f32 %v1631_v36, %v864_v63 }
 0x11c   : > { %v946_v5 = vmax.f32 %v914_v1, 0.0  ;;  %v915_v6 = vadd.f32 %v1631_v36, %v856_v2 }
 0x11d   : > { %v1321_v7 = vpack.c.bf16 %v948_v3, %v948_v3  ;;  %v949_v8 = vmax.f32 %v917_v4, 0.0  ;;  %v1393_v9 = vpop.f32.mrb[28].mxu1 }
 0x11e   : > { %v1319_v10 = vpack.c.bf16 %v946_v5, %v946_v5  ;;  %v947_v11 = vmax.f32 %v915_v6, 0.0  ;;  %v1427_v12 = vpop.f32.mrb[28].mxu0  ;;  %v573_v13 = vpop.f32.mrb[29].mxu1 }
 0x11f   : > { %1109 = vst.msk [vmem:[%s1640_s7 + $0x68] sm:$0xf] %vm1082_vm1, %v1321_v7  ;;  %v1322_v14 = vpack.c.bf16 %v949_v8, %v949_v8  ;;  %v877_v15 = vadd.f32 %v1427_v12, %v1393_v9  ;;  %v868_v16 = vpop.f32.mrb[29].mxu0  ;;  %v1394_v17 = vpop.f32.mrb[30].mxu1 }
 0x120   : > { %1107 = vst.msk [vmem:[%s1640_s7 + $0x60] sm:$0xf] %vm1082_vm1, %v1319_v10  ;;  %v1320_v18 = vpack.c.bf16 %v947_v11, %v947_v11  ;;  %v869_v19 = vadd.f32 %v868_v16, %v573_v13  ;;  %v1428_v20 = vpop.f32.mrb[30].mxu0  ;;  %v576_v21 = vpop.f32.mrb[31].mxu1 }
 0x121   : > { %1110 = vst.msk [vmem:[%s1640_s7 + $0x6c] sm:$0xf] %vm1082_vm1, %v1322_v14  ;;  %v920_v22 = vadd.f32 %v1631_v36, %v877_v15  ;;  %v880_v23 = vadd.f32 %v1428_v20, %v1394_v17  ;;  %v871_v24 = vpop.f32.mrb[31].mxu0 }
 0x122   : > { %1108 = vst.msk [vmem:[%s1640_s7 + $0x64] sm:$0xf] %vm1082_vm1, %v1320_v18  ;;  %v918_v25 = vadd.f32 %v1631_v36, %v869_v19  ;;  %v872_v26 = vadd.f32 %v871_v24, %v576_v21 }
 0x123   : > { %v952_v27 = vmax.f32 %v920_v22, 0.0  ;;  %v921_v28 = vadd.f32 %v1631_v36, %v880_v23 }
 0x124   : > { %v950_v29 = vmax.f32 %v918_v25, 0.0  ;;  %v919_v30 = vadd.f32 %v1631_v36, %v872_v26 }
 0x125   : > { %v1325_v31 = vpack.c.bf16 %v952_v27, %v952_v27  ;;  %v953_v32 = vmax.f32 %v921_v28, 0.0 }
 0x126   : > { %v1323_v33 = vpack.c.bf16 %v950_v29, %v950_v29  ;;  %v951_v34 = vmax.f32 %v919_v30, 0.0 }
 0x127   : > { %1113 = vst.msk [vmem:[%s1640_s7 + $0x78] sm:$0xf] %vm1082_vm1, %v1325_v31  ;;  %v1326_v35 = vpack.c.bf16 %v953_v32, %v953_v32 }
 0x128   : > { %1111 = vst.msk [vmem:[%s1640_s7 + $0x70] sm:$0xf] %vm1082_vm1, %v1323_v33  ;;  %v1324_v37 = vpack.c.bf16 %v951_v34, %v951_v34 }
 0x129   : > { %1114 = vst.msk [vmem:[%s1640_s7 + $0x7c] sm:$0xf] %vm1082_vm1, %v1326_v35 }
 0x12a   : > { %1112 = vst.msk [vmem:[%s1640_s7 + $0x74] sm:$0xf] %vm1082_vm1, %v1324_v37 }
 0x12b PF: > { %s14_s15 = sadd.s32 1, %s1509_s15  }
 0x12c   : > { %p11_p4 = scmp.ge.s32.totalorder %s14_s15, 4  }
 0x12e   :  { %13 = sbr.rel (!%p11_p4) target bundleno = 1 (0x1), region = 69 }

// kernel: block4_forward.13
= control target key start
LH: loop header
LB: loop body
LE: loop exit
PB: predicated region body
PF: predicated region fallthrough
CT: control target
= control target key end

     0   :  { %s2100_s18 = smov 0   ;;  %s2358_s0 = inlined_call_operand.vmem [shape: bf16[512,16], index: 0, kind: input, shape index: {}]   ;;  %s2359_s1 = inlined_call_operand.vmem [shape: bf16[512,16], index: 1, kind: input, shape index: {}]   ;;  %s2360_s2 = inlined_call_operand.vmem [shape: bf16[512,16], index: 2, kind: input, shape index: {}]   ;;  %s2361_s3 = inlined_call_operand.vmem [shape: bf16[3,16,16], index: 3, kind: input, shape index: {}]   ;;  %s2362_s4 = inlined_call_operand.vmem [shape: f32[1,16], index: 4, kind: input, shape index: {}]   ;;  %s2363_s5 = inlined_call_operand.vmem [shape: bf16[512,16], index: 5, kind: output, shape index: {}]  }
   0x1 LB: > { %s1605_s19 = sadd.s32 4294967295, %s2068_s18   ;;  %p1609_p0 = scmp.ge.s32.totalorder %s2068_s18, 1  ;;  %s2068_s18 = sphi %s2100_s18, %s15_s18  }
   0x2   : > { %p210_p1 = scmp.lt.s32.totalorder %s2068_s18, 3 }
   0x4   : > { %p211_p2 = pnand %p1609_p0, %p210_p1 }
   0x5   : > { %v2011_v0 = vld [vmem:[%s2361_s3 + $0x8] sm:$0xff] (!%p211_p2)   ;;  %s1610_s22 = sshll.u32 (!%p211_p2), %s1605_s19, 5  ;;  %v2012_v1 = vld [vmem:[%s2361_s3] sm:$0xff] (!%p211_p2)   ;;  %v2015_v2 = vld [vmem:[%s2361_s3 + $0x10] sm:$0xff] (!%p211_p2)   ;;  %vm429_vm0 = vcmask (!%p211_p2), 130048   ;;  %vm1492_vm1 = vcmask (!%p211_p2), 125952  }
   0x6   : > { %214 = sbr.rel (%p211_p2) target bundleno = 331 (0x14b), region = 40  ;;  %p249_p3 = scmp.lt.s32.totalorder (!%p211_p2), %s1610_s22, 63  ;;  %1835 = vmatprep.subr.bf16.mxu1 (!%p211_p2), %v2011_v0  ;;  %1869 = vmatprep.subr.bf16.mxu0 (!%p211_p2), %v2012_v1 }
   0x7   : > { %1836 = vmatpush3.bf16.msra.mxu1 (!%p211_p2), %v2011_v0  ;;  %1870 = vmatpush3.bf16.msra.mxu0 (!%p211_p2), %v2012_v1 }
   0x8   : > { %1937 = vmatprep.subr.bf16.mxu1 (!%p211_p2), %v2012_v1  ;;  %1903 = vmatprep.subr.bf16.mxu0 (!%p211_p2), %v2015_v2 }
   0xd   : > { %s2365_s22 = smov (!%p249_p3, %s1610_s22), 63 }
   0xe   : > { %s2117_s27 = sshll.u32 %s2365_s22, 2 }
   0xf   : > { %s2123_s30 = scalar_lea.vmem %s2359_s1, %s2117_s27  ;;  %s2129_s8 = scalar_lea.vmem %s2358_s0, %s2117_s27 }
  0x10   : > { %v2013_v3 = vld [vmem:[%s2123_s30] sm:$0xff]   ;;  %v2016_v5 = vld [vmem:[%s2123_s30 + $0x8] sm:$0xff]   ;;  %v2018_v7 = vld [vmem:[%s2123_s30 + $0x10] sm:$0xff]   ;;  %s2157_s11 = scalar_lea.vmem %s2360_s2, %s2117_s27  ;;  %s2255_s16 = scalar_lea.vmem %s2363_s5, %s2117_s27 }
  0x11   : > { %v2014_v4 = vld [vmem:[%s2129_s8] sm:$0xff]   ;;  %1837 = vmatprep.mubr.msk.bf16.mxu1 %vm429_vm0, %v2013_v3  ;;  %v2017_v6 = vld [vmem:[%s2129_s8 + $0x8] sm:$0xff]   ;;  %v2019_v8 = vld [vmem:[%s2129_s8 + $0x10] sm:$0xff]  }
  0x12   : > { %1871 = vmatprep.mubr.msk.bf16.mxu0 %vm429_vm0, %v2014_v4  ;;  %1838 = vmatmul.mubr.msk.bf16.vlgmr.msra.gmra.mrb[0].mxu1 %vm429_vm0, %v2016_v5  ;;  %v2020_v9 = vld [vmem:[%s2123_s30 + $0x18] sm:$0xff]   ;;  %v2022_v11 = vld [vmem:[%s2123_s30 + $0x20] sm:$0xff]   ;;  %v2024_v13 = vld [vmem:[%s2123_s30 + $0x28] sm:$0xff]  }
  0x13   : > { %1938 = vmatpush3.bf16.msra.mxu1 %v2012_v1  ;;  %1872 = vmatmul.mubr.msk.bf16.vlgmr.msra.gmra.mrb[0].mxu0 %vm429_vm0, %v2017_v6  ;;  %v2021_v10 = vld [vmem:[%s2129_s8 + $0x18] sm:$0xff]   ;;  %v2023_v12 = vld [vmem:[%s2129_s8 + $0x20] sm:$0xff]   ;;  %v2025_v14 = vld [vmem:[%s2129_s8 + $0x28] sm:$0xff]  }
  0x14   : > { %1904 = vmatpush3.bf16.msra.mxu0 %v2015_v2  ;;  %1841 = vmatprep.mubr.msk.bf16.mxu1 %vm429_vm0, %v2018_v7  ;;  %v2026_v15 = vld [vmem:[%s2123_s30 + $0x30] sm:$0xff]   ;;  %v2028_v17 = vld [vmem:[%s2123_s30 + $0x38] sm:$0xff]   ;;  %v2030_v19 = vld [vmem:[%s2123_s30 + $0x40] sm:$0xff]  }
  0x15   : > { %1875 = vmatprep.mubr.msk.bf16.mxu0 %vm429_vm0, %v2019_v8  ;;  %v2027_v16 = vld [vmem:[%s2129_s8 + $0x30] sm:$0xff]   ;;  %v2029_v18 = vld [vmem:[%s2129_s8 + $0x38] sm:$0xff]   ;;  %v2031_v20 = vld [vmem:[%s2157_s11] sm:$0xff]  }
  0x16   : > { %v2032_v21 = vld [vmem:[%s2123_s30 + $0x48] sm:$0xff]   ;;  %v2034_v23 = vld [vmem:[%s2123_s30 + $0x50] sm:$0xff]   ;;  %v2036_v25 = vld [vmem:[%s2123_s30 + $0x58] sm:$0xff]  }
  0x17   : > { %v2033_v22 = vld [vmem:[%s2157_s11 + $0x8] sm:$0xff]   ;;  %v2035_v24 = vld [vmem:[%s2157_s11 + $0x10] sm:$0xff]   ;;  %v2037_v26 = vld [vmem:[%s2157_s11 + $0x18] sm:$0xff]  }
  0x18   : > { %v2038_v27 = vld [vmem:[%s2123_s30 + $0x60] sm:$0xff]   ;;  %v2040_v29 = vld [vmem:[%s2123_s30 + $0x68] sm:$0xff]   ;;  %v2042_v31 = vld [vmem:[%s2123_s30 + $0x70] sm:$0xff]  }
  0x19   : > { %v2039_v28 = vld [vmem:[%s2157_s11 + $0x20] sm:$0xff]   ;;  %v2041_v30 = vld [vmem:[%s2157_s11 + $0x28] sm:$0xff]   ;;  %v2043_v32 = vld [vmem:[%s2157_s11 + $0x30] sm:$0xff]  }
  0x1a   : > { %1842 = vmatmul.mubr.msk.bf16.gmra.mrb[4].mxu1 %vm429_vm0, %v2020_v9  ;;  %v2044_v33 = vld [vmem:[%s2123_s30 + $0x78] sm:$0xff]   ;;  %v2046_v35 = vld [vmem:[%s2129_s8 + $0x40] sm:$0xff]   ;;  %v2048_v37 = vld [vmem:[%s2129_s8 + $0x48] sm:$0xff]  }
  0x1b   : > { %1876 = vmatmul.mubr.msk.bf16.gmra.mrb[4].mxu0 %vm429_vm0, %v2021_v10  ;;  %1845 = vmatprep.mubr.msk.bf16.mxu1 %vm429_vm0, %v2022_v11  ;;  %v2045_v34 = vld [vmem:[%s2157_s11 + $0x38] sm:$0xff]   ;;  %v2047_v36 = vld [vmem:[%s2157_s11 + $0x40] sm:$0xff]   ;;  %v2049_v38 = vld [vmem:[%s2157_s11 + $0x48] sm:$0xff]  }
  0x1c   : > { %1879 = vmatprep.mubr.msk.bf16.mxu0 %vm429_vm0, %v2023_v12  ;;  %v2050_v39 = vld [vmem:[%s2129_s8 + $0x50] sm:$0xff]   ;;  %v2052_v41 = vld [vmem:[%s2129_s8 + $0x58] sm:$0xff]   ;;  %v2054_v43 = vld [vmem:[%s2129_s8 + $0x60] sm:$0xff]  }
  0x1d   : > { %v2051_v40 = vld [vmem:[%s2157_s11 + $0x50] sm:$0xff]   ;;  %v2053_v42 = vld [vmem:[%s2157_s11 + $0x58] sm:$0xff]   ;;  %v2055_v44 = vld [vmem:[%s2157_s11 + $0x60] sm:$0xff]  }
  0x1e   : > { %v2056_v45 = vld [vmem:[%s2129_s8 + $0x68] sm:$0xff]   ;;  %v2058_v47 = vld [vmem:[%s2129_s8 + $0x70] sm:$0xff]   ;;  %v2060_v49 = vld [vmem:[%s2129_s8 + $0x78] sm:$0xff]  }
  0x1f   : > { %v2057_v46 = vld [vmem:[%s2157_s11 + $0x68] sm:$0xff]   ;;  %v2059_v48 = vld [vmem:[%s2157_s11 + $0x70] sm:$0xff]   ;;  %v2061_v50 = vld [vmem:[%s2157_s11 + $0x78] sm:$0xff]  }
  0x20   : > { %v2246_v4 = vld [vmem:[%s2362_s4] ss:$0 sm:$0xff] }
  0x22   : > { %1846 = vmatmul.mubr.msk.bf16.gmra.mrb[8].mxu1 %vm429_vm0, %v2024_v13 }
  0x23   : > { %1880 = vmatmul.mubr.msk.bf16.gmra.mrb[8].mxu0 %vm429_vm0, %v2025_v14  ;;  %1849 = vmatprep.mubr.msk.bf16.mxu1 %vm429_vm0, %v2026_v15 }
  0x24   : > { %1883 = vmatprep.mubr.msk.bf16.mxu0 %vm429_vm0, %v2027_v16 }
  0x2a   : > { %1850 = vmatmul.mubr.msk.bf16.gmra.mrb[12].mxu1 %vm429_vm0, %v2028_v17 }
  0x2b   : > { %1884 = vmatmul.mubr.msk.bf16.gmra.mrb[12].mxu0 %vm429_vm0, %v2029_v18  ;;  %1853 = vmatprep.mubr.msk.bf16.mxu1 %vm429_vm0, %v2030_v19 }
  0x2c   : > { %1905 = vmatprep.mubr.msk.bf16.mxu0 %vm429_vm0, %v2031_v20 }
  0x32   : > { %1854 = vmatmul.mubr.msk.bf16.gmra.mrb[16].mxu1 %vm429_vm0, %v2032_v21 }
  0x33   : > { %1906 = vmatmul.mubr.msk.bf16.vlgmr.msra.gmra.mrb[0].mxu0 %vm429_vm0, %v2033_v22  ;;  %1857 = vmatprep.mubr.msk.bf16.mxu1 %vm429_vm0, %v2034_v23 }
  0x34   : > { %1909 = vmatprep.mubr.msk.bf16.mxu0 %vm429_vm0, %v2035_v24 }
  0x3a   : > { %1858 = vmatmul.mubr.msk.bf16.gmra.mrb[20].mxu1 %vm429_vm0, %v2036_v25 }
  0x3b   : > { %1910 = vmatmul.mubr.msk.bf16.gmra.mrb[4].mxu0 %vm429_vm0, %v2037_v26  ;;  %1861 = vmatprep.mubr.msk.bf16.mxu1 %vm429_vm0, %v2038_v27 }
  0x3c   : > { %1913 = vmatprep.mubr.msk.bf16.mxu0 %vm429_vm0, %v2039_v28 }
  0x42   : > { %1862 = vmatmul.mubr.msk.bf16.gmra.mrb[24].mxu1 %vm429_vm0, %v2040_v29 }
  0x43   : > { %1914 = vmatmul.mubr.msk.bf16.gmra.mrb[8].mxu0 %vm429_vm0, %v2041_v30  ;;  %1865 = vmatprep.mubr.msk.bf16.mxu1 %vm429_vm0, %v2042_v31 }
  0x44   : > { %1917 = vmatprep.mubr.msk.bf16.mxu0 %vm429_vm0, %v2043_v32 }
  0x4a   : > { %1866 = vmatmul.mubr.msk.bf16.gmra.mrb[28].mxu1 %vm429_vm0, %v2044_v33 }
  0x4b   : > { %1918 = vmatmul.mubr.msk.bf16.gmra.mrb[12].mxu0 %vm429_vm0, %v2045_v34  ;;  %1887 = vmatprep.mubr.msk.bf16.mxu1 %vm429_vm0, %v2046_v35 }
  0x4c   : > { %1921 = vmatprep.mubr.msk.bf16.mxu0 %vm429_vm0, %v2047_v36 }
  0x52   : > { %1888 = vmatmul.mubr.msk.bf16.vlgmr.msra.gmra.mrb[16].mxu1 %vm429_vm0, %v2048_v37 }
  0x53   : > { %1922 = vmatmul.mubr.msk.bf16.gmra.mrb[16].mxu0 %vm429_vm0, %v2049_v38  ;;  %1891 = vmatprep.mubr.msk.bf16.mxu1 %vm429_vm0, %v2050_v39 }
  0x54   : > { %1925 = vmatprep.mubr.msk.bf16.mxu0 %vm429_vm0, %v2051_v40 }
  0x5a   : > { %1892 = vmatmul.mubr.msk.bf16.gmra.mrb[20].mxu1 %vm429_vm0, %v2052_v41 }
  0x5b   : > { %1926 = vmatmul.mubr.msk.bf16.gmra.mrb[20].mxu0 %vm429_vm0, %v2053_v42  ;;  %1895 = vmatprep.mubr.msk.bf16.mxu1 %vm429_vm0, %v2054_v43 }
  0x5c   : > { %1929 = vmatprep.mubr.msk.bf16.mxu0 %vm429_vm0, %v2055_v44 }
  0x62   : > { %1896 = vmatmul.mubr.msk.bf16.gmra.mrb[24].mxu1 %vm429_vm0, %v2056_v45 }
  0x63   : > { %1930 = vmatmul.mubr.msk.bf16.gmra.mrb[24].mxu0 %vm429_vm0, %v2057_v46  ;;  %1899 = vmatprep.mubr.msk.bf16.mxu1 %vm429_vm0, %v2058_v47 }
  0x64   : > { %1933 = vmatprep.mubr.msk.bf16.mxu0 %vm429_vm0, %v2059_v48 }
  0x6a   : > { %1900 = vmatmul.mubr.msk.bf16.gmra.mrb[28].mxu1 %vm429_vm0, %v2060_v49 }
  0x6b   : > { %1934 = vmatmul.mubr.msk.bf16.gmra.mrb[28].mxu0 %vm429_vm0, %v2061_v50 }
  0xe5   : > { %v1839_v51 = vpop.f32.mrb[0].mxu1 }
  0xe6   : > { %v512_v52 = vpop.f32.mrb[1].mxu1 }
  0xe7   : > { %v1840_v53 = vpop.f32.mrb[2].mxu1 }
  0xe8   : > { %v515_v54 = vpop.f32.mrb[3].mxu1 }
  0xed   : > { %v1843_v55 = vpop.f32.mrb[4].mxu1 }
  0xee   : > { %v528_v56 = vpop.f32.mrb[5].mxu1 }
  0xef   : > { %v1844_v57 = vpop.f32.mrb[6].mxu1 }
  0xf0   : > { %v531_v58 = vpop.f32.mrb[7].mxu1 }
  0xf5   : > { %v1847_v59 = vpop.f32.mrb[8].mxu1 }
  0xf6   : > { %v544_v60 = vpop.f32.mrb[9].mxu1 }
  0xf7   : > { %v1848_v61 = vpop.f32.mrb[10].mxu1 }
  0xf8   : > { %v2233_v62 = vpop.f32.mrb[11].mxu1 }
  0xfd   : > { %v2235_v63 = vpop.f32.mrb[12].mxu1 }
  0xfe   : > { %v2237_v0 = vpop.f32.mrb[13].mxu1 }
  0xff   : > { %v2239_v1 = vpop.f32.mrb[14].mxu1 }
 0x100   : > { %v2241_v2 = vpop.f32.mrb[15].mxu1 }
 0x106   : > { %v1907_v3 = vpop.f32.mrb[0].mxu0 }
 0x107   : > { %v1939_v5 = vadd.f32 %v1907_v3, %v1839_v51  ;;  %v1134_v6 = vpop.f32.mrb[1].mxu0 }
 0x108   : > { %v1940_v7 = vadd.f32 %v1134_v6, %v512_v52  ;;  %v1908_v8 = vpop.f32.mrb[2].mxu0 }
 0x109   : > { %v1302_v9 = vadd.f32 %v1939_v5, %v2246_v4  ;;  %v1941_v10 = vadd.f32 %v1908_v8, %v1840_v53  ;;  %v1137_v11 = vpop.f32.mrb[3].mxu0 }
 0x10a   : > { %v1300_v12 = vadd.f32 %v1940_v7, %v2246_v4  ;;  %v1942_v13 = vadd.f32 %v1137_v11, %v515_v54 }
 0x10b   : > { %v1334_v14 = vmax.f32 %v1302_v9, 0.0  ;;  %v1303_v15 = vadd.f32 %v1941_v10, %v2246_v4 }
 0x10c   : > { %v1332_v16 = vmax.f32 %v1300_v12, 0.0  ;;  %v1301_v17 = vadd.f32 %v1942_v13, %v2246_v4 }
 0x10d   : > { %v1754_v18 = vpack.c.bf16 %v1334_v14, %v1334_v14  ;;  %v1335_v19 = vmax.f32 %v1303_v15, 0.0 }
 0x10e   : > { %v1752_v20 = vpack.c.bf16 %v1332_v16, %v1332_v16  ;;  %v1333_v21 = vmax.f32 %v1301_v17, 0.0  ;;  %v1911_v22 = vpop.f32.mrb[4].mxu0 }
 0x10f   : > { %1495 = vst.msk [vmem:[%s2255_s16 + $0x8] sm:$0xf] %vm1492_vm1, %v1754_v18  ;;  %v1755_v23 = vpack.c.bf16 %v1335_v19, %v1335_v19  ;;  %v1943_v24 = vadd.f32 %v1911_v22, %v1843_v55  ;;  %v1150_v25 = vpop.f32.mrb[5].mxu0 }
 0x110   : > { %1493 = vst.msk [vmem:[%s2255_s16] sm:$0xf] %vm1492_vm1, %v1752_v20  ;;  %v1753_v26 = vpack.c.bf16 %v1333_v21, %v1333_v21  ;;  %v1944_v27 = vadd.f32 %v1150_v25, %v528_v56  ;;  %v1912_v28 = vpop.f32.mrb[6].mxu0 }
 0x111   : > { %1496 = vst.msk [vmem:[%s2255_s16 + $0xc] sm:$0xf] %vm1492_vm1, %v1755_v23  ;;  %v1306_v29 = vadd.f32 %v1943_v24, %v2246_v4  ;;  %v1945_v30 = vadd.f32 %v1912_v28, %v1844_v57  ;;  %v1153_v31 = vpop.f32.mrb[7].mxu0 }
 0x112   : > { %1494 = vst.msk [vmem:[%s2255_s16 + $0x4] sm:$0xf] %vm1492_vm1, %v1753_v26  ;;  %v1304_v32 = vadd.f32 %v1944_v27, %v2246_v4  ;;  %v1946_v33 = vadd.f32 %v1153_v31, %v531_v58 }
 0x113   : > { %v1338_v34 = vmax.f32 %v1306_v29, 0.0  ;;  %v1307_v35 = vadd.f32 %v1945_v30, %v2246_v4 }
 0x114   : > { %v1336_v36 = vmax.f32 %v1304_v32, 0.0  ;;  %v1305_v37 = vadd.f32 %v1946_v33, %v2246_v4 }
 0x115   : > { %v1758_v38 = vpack.c.bf16 %v1338_v34, %v1338_v34  ;;  %v1339_v39 = vmax.f32 %v1307_v35, 0.0 }
 0x116   : > { %v1756_v40 = vpack.c.bf16 %v1336_v36, %v1336_v36  ;;  %v1337_v41 = vmax.f32 %v1305_v37, 0.0  ;;  %v1915_v42 = vpop.f32.mrb[8].mxu0 }
 0x117   : > { %1499 = vst.msk [vmem:[%s2255_s16 + $0x18] sm:$0xf] %vm1492_vm1, %v1758_v38  ;;  %v1759_v43 = vpack.c.bf16 %v1339_v39, %v1339_v39  ;;  %v1947_v44 = vadd.f32 %v1915_v42, %v1847_v59  ;;  %v1166_v45 = vpop.f32.mrb[9].mxu0 }
 0x118   : > { %1497 = vst.msk [vmem:[%s2255_s16 + $0x10] sm:$0xf] %vm1492_vm1, %v1756_v40  ;;  %v1757_v46 = vpack.c.bf16 %v1337_v41, %v1337_v41  ;;  %v1948_v47 = vadd.f32 %v1166_v45, %v544_v60  ;;  %v1916_v48 = vpop.f32.mrb[10].mxu0 }
 0x119   : > { %1500 = vst.msk [vmem:[%s2255_s16 + $0x1c] sm:$0xf] %vm1492_vm1, %v1759_v43  ;;  %v1310_v49 = vadd.f32 %v1947_v44, %v2246_v4  ;;  %v1949_v50 = vadd.f32 %v1916_v48, %v1848_v61  ;;  %v1169_v51 = vpop.f32.mrb[11].mxu0 }
 0x11a   : > { %1498 = vst.msk [vmem:[%s2255_s16 + $0x14] sm:$0xf] %vm1492_vm1, %v1757_v46  ;;  %v1308_v52 = vadd.f32 %v1948_v47, %v2246_v4  ;;  %v1950_v53 = vadd.f32 %v1169_v51, %v2233_v62 }
 0x11b   : > { %v1342_v54 = vmax.f32 %v1310_v49, 0.0  ;;  %v1311_v55 = vadd.f32 %v1949_v50, %v2246_v4 }
 0x11c   : > { %v1340_v56 = vmax.f32 %v1308_v52, 0.0  ;;  %v1309_v57 = vadd.f32 %v1950_v53, %v2246_v4 }
 0x11d   : > { %v1762_v58 = vpack.c.bf16 %v1342_v54, %v1342_v54  ;;  %v1343_v59 = vmax.f32 %v1311_v55, 0.0 }
 0x11e   : > { %v1760_v60 = vpack.c.bf16 %v1340_v56, %v1340_v56  ;;  %v1341_v61 = vmax.f32 %v1309_v57, 0.0  ;;  %v1919_v3 = vpop.f32.mrb[12].mxu0 }
 0x11f   : > { %1503 = vst.msk [vmem:[%s2255_s16 + $0x28] sm:$0xf] %vm1492_vm1, %v1762_v58  ;;  %v1763_v5 = vpack.c.bf16 %v1343_v59, %v1343_v59  ;;  %v1951_v6 = vadd.f32 %v1919_v3, %v2235_v63  ;;  %v1182_v7 = vpop.f32.mrb[13].mxu0 }
 0x120   : > { %1501 = vst.msk [vmem:[%s2255_s16 + $0x20] sm:$0xf] %vm1492_vm1, %v1760_v60  ;;  %v1761_v62 = vpack.c.bf16 %v1341_v61, %v1341_v61  ;;  %v1952_v8 = vadd.f32 %v1182_v7, %v2237_v0  ;;  %v1920_v9 = vpop.f32.mrb[14].mxu0 }
 0x121   : > { %1504 = vst.msk [vmem:[%s2255_s16 + $0x2c] sm:$0xf] %vm1492_vm1, %v1763_v5  ;;  %v1314_v10 = vadd.f32 %v1951_v6, %v2246_v4  ;;  %v1953_v11 = vadd.f32 %v1920_v9, %v2239_v1  ;;  %v1185_v12 = vpop.f32.mrb[15].mxu0 }
 0x122   : > { %1502 = vst.msk [vmem:[%s2255_s16 + $0x24] sm:$0xf] %vm1492_vm1, %v1761_v62  ;;  %v1312_v13 = vadd.f32 %v1952_v8, %v2246_v4  ;;  %v1954_v63 = vadd.f32 %v1185_v12, %v2241_v2 }
 0x123   : > { %v1346_v14 = vmax.f32 %v1314_v10, 0.0  ;;  %v1315_v15 = vadd.f32 %v1953_v11, %v2246_v4 }
 0x124   : > { %v1344_v0 = vmax.f32 %v1312_v13, 0.0  ;;  %v1313_v16 = vadd.f32 %v1954_v63, %v2246_v4 }
 0x125   : > { %v1766_v17 = vpack.c.bf16 %v1346_v14, %v1346_v14  ;;  %v1347_v18 = vmax.f32 %v1315_v15, 0.0  ;;  %v1889_v19 = vpop.f32.mrb[16].mxu1 }
 0x126   : > { %v1764_v1 = vpack.c.bf16 %v1344_v0, %v1344_v0  ;;  %v1345_v20 = vmax.f32 %v1313_v16, 0.0  ;;  %v1923_v21 = vpop.f32.mrb[16].mxu0  ;;  %v871_v22 = vpop.f32.mrb[17].mxu1 }
 0x127   : > { %1507 = vst.msk [vmem:[%s2255_s16 + $0x38] sm:$0xf] %vm1492_vm1, %v1766_v17  ;;  %v1767_v23 = vpack.c.bf16 %v1347_v18, %v1347_v18  ;;  %v1955_v2 = vadd.f32 %v1923_v21, %v1889_v19  ;;  %v1198_v24 = vpop.f32.mrb[17].mxu0  ;;  %v1890_v25 = vpop.f32.mrb[18].mxu1 }
 0x128   : > { %1505 = vst.msk [vmem:[%s2255_s16 + $0x30] sm:$0xf] %vm1492_vm1, %v1764_v1  ;;  %v1765_v26 = vpack.c.bf16 %v1345_v20, %v1345_v20  ;;  %v1956_v27 = vadd.f32 %v1198_v24, %v871_v22  ;;  %v1924_v28 = vpop.f32.mrb[18].mxu0  ;;  %v874_v29 = vpop.f32.mrb[19].mxu1 }
 0x129   : > { %1508 = vst.msk [vmem:[%s2255_s16 + $0x3c] sm:$0xf] %vm1492_vm1, %v1767_v23  ;;  %v1318_v30 = vadd.f32 %v1955_v2, %v2246_v4  ;;  %v1957_v31 = vadd.f32 %v1924_v28, %v1890_v25  ;;  %v1201_v32 = vpop.f32.mrb[19].mxu0 }
 0x12a   : > { %1506 = vst.msk [vmem:[%s2255_s16 + $0x34] sm:$0xf] %vm1492_vm1, %v1765_v26  ;;  %v1316_v33 = vadd.f32 %v1956_v27, %v2246_v4  ;;  %v1958_v34 = vadd.f32 %v1201_v32, %v874_v29 }
 0x12b   : > { %v1350_v35 = vmax.f32 %v1318_v30, 0.0  ;;  %v1319_v36 = vadd.f32 %v1957_v31, %v2246_v4 }
 0x12c   : > { %v1348_v37 = vmax.f32 %v1316_v33, 0.0  ;;  %v1317_v38 = vadd.f32 %v1958_v34, %v2246_v4 }
 0x12d   : > { %v1770_v39 = vpack.c.bf16 %v1350_v35, %v1350_v35  ;;  %v1351_v40 = vmax.f32 %v1319_v36, 0.0  ;;  %v1893_v41 = vpop.f32.mrb[20].mxu1 }
 0x12e   : > { %v1768_v42 = vpack.c.bf16 %v1348_v37, %v1348_v37  ;;  %v1349_v43 = vmax.f32 %v1317_v38, 0.0  ;;  %v1927_v44 = vpop.f32.mrb[20].mxu0  ;;  %v887_v45 = vpop.f32.mrb[21].mxu1 }
 0x12f   : > { %1511 = vst.msk [vmem:[%s2255_s16 + $0x48] sm:$0xf] %vm1492_vm1, %v1770_v39  ;;  %v1771_v46 = vpack.c.bf16 %v1351_v40, %v1351_v40  ;;  %v1959_v47 = vadd.f32 %v1927_v44, %v1893_v41  ;;  %v1214_v48 = vpop.f32.mrb[21].mxu0  ;;  %v1894_v49 = vpop.f32.mrb[22].mxu1 }
 0x130   : > { %1509 = vst.msk [vmem:[%s2255_s16 + $0x40] sm:$0xf] %vm1492_vm1, %v1768_v42  ;;  %v1769_v50 = vpack.c.bf16 %v1349_v43, %v1349_v43  ;;  %v1960_v51 = vadd.f32 %v1214_v48, %v887_v45  ;;  %v1928_v52 = vpop.f32.mrb[22].mxu0  ;;  %v890_v53 = vpop.f32.mrb[23].mxu1 }
 0x131   : > { %1512 = vst.msk [vmem:[%s2255_s16 + $0x4c] sm:$0xf] %vm1492_vm1, %v1771_v46  ;;  %v1322_v54 = vadd.f32 %v1959_v47, %v2246_v4  ;;  %v1961_v55 = vadd.f32 %v1928_v52, %v1894_v49  ;;  %v1217_v56 = vpop.f32.mrb[23].mxu0 }
 0x132   : > { %1510 = vst.msk [vmem:[%s2255_s16 + $0x44] sm:$0xf] %vm1492_vm1, %v1769_v50  ;;  %v1320_v57 = vadd.f32 %v1960_v51, %v2246_v4  ;;  %v1962_v58 = vadd.f32 %v1217_v56, %v890_v53 }
 0x133   : > { %v1354_v59 = vmax.f32 %v1322_v54, 0.0  ;;  %v1323_v60 = vadd.f32 %v1961_v55, %v2246_v4 }
 0x134   : > { %v1352_v61 = vmax.f32 %v1320_v57, 0.0  ;;  %v1321_v3 = vadd.f32 %v1962_v58, %v2246_v4 }
 0x135   : > { %v1774_v5 = vpack.c.bf16 %v1354_v59, %v1354_v59  ;;  %v1355_v6 = vmax.f32 %v1323_v60, 0.0  ;;  %v1897_v7 = vpop.f32.mrb[24].mxu1 }
 0x136   : > { %v1772_v62 = vpack.c.bf16 %v1352_v61, %v1352_v61  ;;  %v1353_v8 = vmax.f32 %v1321_v3, 0.0  ;;  %v1931_v9 = vpop.f32.mrb[24].mxu0  ;;  %v903_v10 = vpop.f32.mrb[25].mxu1 }
 0x137   : > { %1515 = vst.msk [vmem:[%s2255_s16 + $0x58] sm:$0xf] %vm1492_vm1, %v1774_v5  ;;  %v1775_v11 = vpack.c.bf16 %v1355_v6, %v1355_v6  ;;  %v1963_v12 = vadd.f32 %v1931_v9, %v1897_v7  ;;  %v1230_v13 = vpop.f32.mrb[25].mxu0  ;;  %v1898_v63 = vpop.f32.mrb[26].mxu1 }
 0x138   : > { %1513 = vst.msk [vmem:[%s2255_s16 + $0x50] sm:$0xf] %vm1492_vm1, %v1772_v62  ;;  %v1773_v14 = vpack.c.bf16 %v1353_v8, %v1353_v8  ;;  %v1964_v15 = vadd.f32 %v1230_v13, %v903_v10  ;;  %v1932_v0 = vpop.f32.mrb[26].mxu0  ;;  %v906_v16 = vpop.f32.mrb[27].mxu1 }
 0x139   : > { %1516 = vst.msk [vmem:[%s2255_s16 + $0x5c] sm:$0xf] %vm1492_vm1, %v1775_v11  ;;  %v1326_v17 = vadd.f32 %v1963_v12, %v2246_v4  ;;  %v1965_v18 = vadd.f32 %v1932_v0, %v1898_v63  ;;  %v1233_v19 = vpop.f32.mrb[27].mxu0 }
 0x13a   : > { %1514 = vst.msk [vmem:[%s2255_s16 + $0x54] sm:$0xf] %vm1492_vm1, %v1773_v14  ;;  %v1324_v1 = vadd.f32 %v1964_v15, %v2246_v4  ;;  %v1966_v20 = vadd.f32 %v1233_v19, %v906_v16 }
 0x13b   : > { %v1358_v21 = vmax.f32 %v1326_v17, 0.0  ;;  %v1327_v22 = vadd.f32 %v1965_v18, %v2246_v4 }
 0x13c   : > { %v1356_v23 = vmax.f32 %v1324_v1, 0.0  ;;  %v1325_v2 = vadd.f32 %v1966_v20, %v2246_v4 }
 0x13d   : > { %v1778_v24 = vpack.c.bf16 %v1358_v21, %v1358_v21  ;;  %v1359_v25 = vmax.f32 %v1327_v22, 0.0  ;;  %v1901_v26 = vpop.f32.mrb[28].mxu1 }
 0x13e   : > { %v1776_v27 = vpack.c.bf16 %v1356_v23, %v1356_v23  ;;  %v1357_v28 = vmax.f32 %v1325_v2, 0.0  ;;  %v1935_v29 = vpop.f32.mrb[28].mxu0  ;;  %v919_v30 = vpop.f32.mrb[29].mxu1 }
 0x13f   : > { %1519 = vst.msk [vmem:[%s2255_s16 + $0x68] sm:$0xf] %vm1492_vm1, %v1778_v24  ;;  %v1779_v31 = vpack.c.bf16 %v1359_v25, %v1359_v25  ;;  %v1967_v32 = vadd.f32 %v1935_v29, %v1901_v26  ;;  %v1246_v33 = vpop.f32.mrb[29].mxu0  ;;  %v1902_v34 = vpop.f32.mrb[30].mxu1 }
 0x140   : > { %1517 = vst.msk [vmem:[%s2255_s16 + $0x60] sm:$0xf] %vm1492_vm1, %v1776_v27  ;;  %v1777_v35 = vpack.c.bf16 %v1357_v28, %v1357_v28  ;;  %v1968_v36 = vadd.f32 %v1246_v33, %v919_v30  ;;  %v1936_v37 = vpop.f32.mrb[30].mxu0  ;;  %v922_v38 = vpop.f32.mrb[31].mxu1 }
 0x141   : > { %1520 = vst.msk [vmem:[%s2255_s16 + $0x6c] sm:$0xf] %vm1492_vm1, %v1779_v31  ;;  %v1330_v39 = vadd.f32 %v1967_v32, %v2246_v4  ;;  %v1969_v40 = vadd.f32 %v1936_v37, %v1902_v34  ;;  %v1249_v41 = vpop.f32.mrb[31].mxu0 }
 0x142   : > { %1518 = vst.msk [vmem:[%s2255_s16 + $0x64] sm:$0xf] %vm1492_vm1, %v1777_v35  ;;  %v1328_v42 = vadd.f32 %v1968_v36, %v2246_v4  ;;  %v1970_v43 = vadd.f32 %v1249_v41, %v922_v38 }
 0x143   : > { %v1362_v44 = vmax.f32 %v1330_v39, 0.0  ;;  %v1331_v45 = vadd.f32 %v1969_v40, %v2246_v4 }
 0x144   : > { %v1360_v46 = vmax.f32 %v1328_v42, 0.0  ;;  %v1329_v47 = vadd.f32 %v1970_v43, %v2246_v4 }
 0x145   : > { %v1782_v48 = vpack.c.bf16 %v1362_v44, %v1362_v44  ;;  %v1363_v49 = vmax.f32 %v1331_v45, 0.0 }
 0x146   : > { %v1780_v50 = vpack.c.bf16 %v1360_v46, %v1360_v46  ;;  %v1361_v51 = vmax.f32 %v1329_v47, 0.0 }
 0x147   : > { %1523 = vst.msk [vmem:[%s2255_s16 + $0x78] sm:$0xf] %vm1492_vm1, %v1782_v48  ;;  %v1783_v52 = vpack.c.bf16 %v1363_v49, %v1363_v49 }
 0x148   : > { %1521 = vst.msk [vmem:[%s2255_s16 + $0x70] sm:$0xf] %vm1492_vm1, %v1780_v50  ;;  %v1781_v53 = vpack.c.bf16 %v1361_v51, %v1361_v51 }
 0x149   : > { %1524 = vst.msk [vmem:[%s2255_s16 + $0x7c] sm:$0xf] %vm1492_vm1, %v1783_v52 }
 0x14a   : > { %1522 = vst.msk [vmem:[%s2255_s16 + $0x74] sm:$0xf] %vm1492_vm1, %v1781_v53 }
 0x14b PF: > { %s15_s18 = sadd.s32 1, %s2068_s18  }
 0x14c   : > { %p12_p4 = scmp.ge.s32.totalorder %s15_s18, 4  }
 0x14e   :  { %14 = sbr.rel (!%p12_p4) target bundleno = 1 (0x1), region = 76 }

// kernel: block4_forward.15
= control target key start
LH: loop header
LB: loop body
LE: loop exit
PB: predicated region body
PF: predicated region fallthrough
CT: control target
= control target key end

     0   :  { %s2660_s21 = smov 0   ;;  %s2944_s0 = inlined_call_operand.vmem [shape: bf16[512,16], index: 0, kind: input, shape index: {}]   ;;  %s2945_s1 = inlined_call_operand.vmem [shape: bf16[512,16], index: 1, kind: input, shape index: {}]   ;;  %s2946_s2 = inlined_call_operand.vmem [shape: bf16[512,16], index: 2, kind: input, shape index: {}]   ;;  %s2947_s3 = inlined_call_operand.vmem [shape: bf16[512,16], index: 3, kind: input, shape index: {}]   ;;  %s2948_s4 = inlined_call_operand.vmem [shape: bf16[4,16,16], index: 4, kind: input, shape index: {}]   ;;  %s2949_s5 = inlined_call_operand.vmem [shape: f32[1,16], index: 5, kind: input, shape index: {}]   ;;  %s2950_s6 = inlined_call_operand.vmem [shape: bf16[512,16], index: 6, kind: output, shape index: {}]  }
   0x1 LB: > { %s2027_s22 = sadd.s32 4294967295, %s2623_s21   ;;  %p2031_p0 = scmp.ge.s32.totalorder %s2623_s21, 1  ;;  %s2623_s21 = sphi %s2660_s21, %s16_s21  }
   0x2   : > { %p246_p1 = scmp.lt.s32.totalorder %s2623_s21, 3 }
   0x4   : > { %p247_p2 = pnand %p2031_p0, %p246_p1 }
   0x5   : > { %v2549_v0 = vld [vmem:[%s2948_s4 + $0x8] sm:$0xff] (!%p247_p2)   ;;  %s2032_s25 = sshll.u32 (!%p247_p2), %s2027_s22, 5  ;;  %v2550_v1 = vld [vmem:[%s2948_s4 + $0x10] sm:$0xff] (!%p247_p2)   ;;  %v2552_v2 = vld [vmem:[%s2948_s4] sm:$0xff] (!%p247_p2)   ;;  %vm480_vm0 = vcmask (!%p247_p2), 130048   ;;  %vm1902_vm1 = vcmask (!%p247_p2), 125952  }
   0x6   : > { %250 = sbr.rel (%p247_p2) target bundleno = 363 (0x16b), region = 44  ;;  %p292_p3 = scmp.lt.s32.totalorder (!%p247_p2), %s2032_s25, 63  ;;  %2309 = vmatprep.subr.bf16.mxu1 (!%p247_p2), %v2549_v0  ;;  %2377 = vmatprep.subr.bf16.mxu0 (!%p247_p2), %v2550_v1  ;;  %v2554_v3 = vld [vmem:[%s2948_s4 + $0x18] sm:$0xff] (!%p247_p2)  }
   0x7   : > { %2310 = vmatpush3.bf16.msra.mxu1 (!%p247_p2), %v2549_v0  ;;  %2378 = vmatpush3.bf16.msra.mxu0 (!%p247_p2), %v2550_v1 }
   0x8   : > { %2343 = vmatprep.subr.bf16.mxu1 (!%p247_p2), %v2552_v2  ;;  %2411 = vmatprep.subr.bf16.mxu0 (!%p247_p2), %v2554_v3 }
   0xd   : > { %s2952_s25 = smov (!%p292_p3, %s2032_s25), 63 }
   0xe   : > { %s2680_s8 = sshll.u32 %s2952_s25, 2 }
   0xf   : > { %s2686_s11 = scalar_lea.vmem %s2945_s1, %s2680_s8  ;;  %s2692_s14 = scalar_lea.vmem %s2946_s2, %s2680_s8 }
  0x10   : > { %v2551_v4 = vld [vmem:[%s2686_s11] sm:$0xff]   ;;  %v2555_v6 = vld [vmem:[%s2686_s11 + $0x8] sm:$0xff]   ;;  %v2557_v8 = vld [vmem:[%s2686_s11 + $0x10] sm:$0xff]   ;;  %s2735_s17 = scalar_lea.vmem %s2944_s0, %s2680_s8  ;;  %s2742_s20 = scalar_lea.vmem %s2947_s3, %s2680_s8 }
  0x11   : > { %v2553_v5 = vld [vmem:[%s2692_s14] sm:$0xff]   ;;  %2311 = vmatprep.mubr.msk.bf16.mxu1 %vm480_vm0, %v2551_v4  ;;  %v2556_v7 = vld [vmem:[%s2692_s14 + $0x8] sm:$0xff]   ;;  %v2558_v9 = vld [vmem:[%s2692_s14 + $0x10] sm:$0xff]   ;;  %s2846_s26 = scalar_lea.vmem %s2950_s6, %s2680_s8 }
  0x12   : > { %2379 = vmatprep.mubr.msk.bf16.mxu0 %vm480_vm0, %v2553_v5  ;;  %2312 = vmatmul.mubr.msk.bf16.vlgmr.msra.gmra.mrb[0].mxu1 %vm480_vm0, %v2555_v6  ;;  %v2559_v10 = vld [vmem:[%s2686_s11 + $0x18] sm:$0xff]   ;;  %v2561_v12 = vld [vmem:[%s2686_s11 + $0x20] sm:$0xff]   ;;  %v2563_v14 = vld [vmem:[%s2686_s11 + $0x28] sm:$0xff]  }
  0x13   : > { %2344 = vmatpush3.bf16.msra.mxu1 %v2552_v2  ;;  %2380 = vmatmul.mubr.msk.bf16.vlgmr.msra.gmra.mrb[0].mxu0 %vm480_vm0, %v2556_v7  ;;  %v2560_v11 = vld [vmem:[%s2692_s14 + $0x18] sm:$0xff]   ;;  %v2562_v13 = vld [vmem:[%s2692_s14 + $0x20] sm:$0xff]   ;;  %v2564_v15 = vld [vmem:[%s2692_s14 + $0x28] sm:$0xff]  }
  0x14   : > { %2412 = vmatpush3.bf16.msra.mxu0 %v2554_v3  ;;  %2315 = vmatprep.mubr.msk.bf16.mxu1 %vm480_vm0, %v2557_v8  ;;  %v2565_v16 = vld [vmem:[%s2686_s11 + $0x30] sm:$0xff]   ;;  %v2567_v18 = vld [vmem:[%s2686_s11 + $0x38] sm:$0xff]   ;;  %v2569_v20 = vld [vmem:[%s2686_s11 + $0x40] sm:$0xff]  }
  0x15   : > { %2383 = vmatprep.mubr.msk.bf16.mxu0 %vm480_vm0, %v2558_v9  ;;  %v2566_v17 = vld [vmem:[%s2692_s14 + $0x30] sm:$0xff]   ;;  %v2568_v19 = vld [vmem:[%s2692_s14 + $0x38] sm:$0xff]   ;;  %v2570_v21 = vld [vmem:[%s2692_s14 + $0x40] sm:$0xff]  }
  0x16   : > { %v2571_v22 = vld [vmem:[%s2686_s11 + $0x48] sm:$0xff]   ;;  %v2573_v24 = vld [vmem:[%s2686_s11 + $0x50] sm:$0xff]   ;;  %v2575_v26 = vld [vmem:[%s2686_s11 + $0x58] sm:$0xff]  }
  0x17   : > { %v2572_v23 = vld [vmem:[%s2692_s14 + $0x48] sm:$0xff]   ;;  %v2574_v25 = vld [vmem:[%s2692_s14 + $0x50] sm:$0xff]   ;;  %v2576_v27 = vld [vmem:[%s2692_s14 + $0x58] sm:$0xff]  }
  0x18   : > { %v2577_v28 = vld [vmem:[%s2686_s11 + $0x60] sm:$0xff]   ;;  %v2579_v30 = vld [vmem:[%s2686_s11 + $0x68] sm:$0xff]   ;;  %v2581_v32 = vld [vmem:[%s2686_s11 + $0x70] sm:$0xff]  }
  0x19   : > { %v2578_v29 = vld [vmem:[%s2692_s14 + $0x60] sm:$0xff]   ;;  %v2580_v31 = vld [vmem:[%s2692_s14 + $0x68] sm:$0xff]   ;;  %v2582_v33 = vld [vmem:[%s2692_s14 + $0x70] sm:$0xff]  }
  0x1a   : > { %2316 = vmatmul.mubr.msk.bf16.gmra.mrb[4].mxu1 %vm480_vm0, %v2559_v10  ;;  %v2583_v34 = vld [vmem:[%s2686_s11 + $0x78] sm:$0xff]   ;;  %v2585_v36 = vld [vmem:[%s2735_s17] sm:$0xff]   ;;  %v2587_v38 = vld [vmem:[%s2735_s17 + $0x8] sm:$0xff]  }
  0x1b   : > { %2384 = vmatmul.mubr.msk.bf16.gmra.mrb[4].mxu0 %vm480_vm0, %v2560_v11  ;;  %2319 = vmatprep.mubr.msk.bf16.mxu1 %vm480_vm0, %v2561_v12  ;;  %v2584_v35 = vld [vmem:[%s2692_s14 + $0x78] sm:$0xff]   ;;  %v2586_v37 = vld [vmem:[%s2742_s20] sm:$0xff]   ;;  %v2588_v39 = vld [vmem:[%s2742_s20 + $0x8] sm:$0xff]  }
  0x1c   : > { %2387 = vmatprep.mubr.msk.bf16.mxu0 %vm480_vm0, %v2562_v13  ;;  %v2589_v40 = vld [vmem:[%s2735_s17 + $0x10] sm:$0xff]   ;;  %v2591_v42 = vld [vmem:[%s2735_s17 + $0x18] sm:$0xff]   ;;  %v2593_v44 = vld [vmem:[%s2735_s17 + $0x20] sm:$0xff]  }
  0x1d   : > { %v2590_v41 = vld [vmem:[%s2742_s20 + $0x10] sm:$0xff]   ;;  %v2592_v43 = vld [vmem:[%s2742_s20 + $0x18] sm:$0xff]   ;;  %v2594_v45 = vld [vmem:[%s2742_s20 + $0x20] sm:$0xff]  }
  0x1e   : > { %v2595_v46 = vld [vmem:[%s2735_s17 + $0x28] sm:$0xff]   ;;  %v2597_v48 = vld [vmem:[%s2735_s17 + $0x30] sm:$0xff]   ;;  %v2599_v50 = vld [vmem:[%s2735_s17 + $0x38] sm:$0xff]  }
  0x1f   : > { %v2596_v47 = vld [vmem:[%s2742_s20 + $0x28] sm:$0xff]   ;;  %v2598_v49 = vld [vmem:[%s2742_s20 + $0x30] sm:$0xff]   ;;  %v2600_v51 = vld [vmem:[%s2742_s20 + $0x38] sm:$0xff]  }
  0x20   : > { %v2601_v52 = vld [vmem:[%s2735_s17 + $0x40] sm:$0xff]   ;;  %v2603_v54 = vld [vmem:[%s2735_s17 + $0x48] sm:$0xff]   ;;  %v2605_v56 = vld [vmem:[%s2735_s17 + $0x50] sm:$0xff]  }
  0x21   : > { %v2602_v53 = vld [vmem:[%s2742_s20 + $0x40] sm:$0xff]   ;;  %v2604_v55 = vld [vmem:[%s2742_s20 + $0x48] sm:$0xff]   ;;  %v2606_v57 = vld [vmem:[%s2742_s20 + $0x50] sm:$0xff]  }
  0x22   : > { %2320 = vmatmul.mubr.msk.bf16.gmra.mrb[8].mxu1 %vm480_vm0, %v2563_v14  ;;  %v2607_v58 = vld [vmem:[%s2735_s17 + $0x58] sm:$0xff]   ;;  %v2609_v60 = vld [vmem:[%s2735_s17 + $0x60] sm:$0xff]   ;;  %v2611_v62 = vld [vmem:[%s2735_s17 + $0x68] sm:$0xff]  }
  0x23   : > { %2388 = vmatmul.mubr.msk.bf16.gmra.mrb[8].mxu0 %vm480_vm0, %v2564_v15  ;;  %2323 = vmatprep.mubr.msk.bf16.mxu1 %vm480_vm0, %v2565_v16  ;;  %v2608_v59 = vld [vmem:[%s2742_s20 + $0x58] sm:$0xff]   ;;  %v2610_v61 = vld [vmem:[%s2742_s20 + $0x60] sm:$0xff]   ;;  %v2612_v63 = vld [vmem:[%s2742_s20 + $0x68] sm:$0xff]  }
  0x24   : > { %2391 = vmatprep.mubr.msk.bf16.mxu0 %vm480_vm0, %v2566_v17  ;;  %v2613_v0 = vld [vmem:[%s2735_s17 + $0x70] sm:$0xff]   ;;  %v2615_v2 = vld [vmem:[%s2735_s17 + $0x78] sm:$0xff]   ;;  %v2837_v6 = vld [vmem:[%s2949_s5] ss:$0 sm:$0xff] }
  0x25   : > { %v2614_v1 = vld [vmem:[%s2742_s20 + $0x70] sm:$0xff]   ;;  %v2616_v3 = vld [vmem:[%s2742_s20 + $0x78] sm:$0xff]  }
  0x2a   : > { %2324 = vmatmul.mubr.msk.bf16.gmra.mrb[12].mxu1 %vm480_vm0, %v2567_v18 }
  0x2b   : > { %2392 = vmatmul.mubr.msk.bf16.gmra.mrb[12].mxu0 %vm480_vm0, %v2568_v19  ;;  %2327 = vmatprep.mubr.msk.bf16.mxu1 %vm480_vm0, %v2569_v20 }
  0x2c   : > { %2395 = vmatprep.mubr.msk.bf16.mxu0 %vm480_vm0, %v2570_v21 }
  0x32   : > { %2328 = vmatmul.mubr.msk.bf16.gmra.mrb[16].mxu1 %vm480_vm0, %v2571_v22 }
  0x33   : > { %2396 = vmatmul.mubr.msk.bf16.gmra.mrb[16].mxu0 %vm480_vm0, %v2572_v23  ;;  %2331 = vmatprep.mubr.msk.bf16.mxu1 %vm480_vm0, %v2573_v24 }
  0x34   : > { %2399 = vmatprep.mubr.msk.bf16.mxu0 %vm480_vm0, %v2574_v25 }
  0x3a   : > { %2332 = vmatmul.mubr.msk.bf16.gmra.mrb[20].mxu1 %vm480_vm0, %v2575_v26 }
  0x3b   : > { %2400 = vmatmul.mubr.msk.bf16.gmra.mrb[20].mxu0 %vm480_vm0, %v2576_v27  ;;  %2335 = vmatprep.mubr.msk.bf16.mxu1 %vm480_vm0, %v2577_v28 }
  0x3c   : > { %2403 = vmatprep.mubr.msk.bf16.mxu0 %vm480_vm0, %v2578_v29 }
  0x42   : > { %2336 = vmatmul.mubr.msk.bf16.gmra.mrb[24].mxu1 %vm480_vm0, %v2579_v30 }
  0x43   : > { %2404 = vmatmul.mubr.msk.bf16.gmra.mrb[24].mxu0 %vm480_vm0, %v2580_v31  ;;  %2339 = vmatprep.mubr.msk.bf16.mxu1 %vm480_vm0, %v2581_v32 }
  0x44   : > { %2407 = vmatprep.mubr.msk.bf16.mxu0 %vm480_vm0, %v2582_v33 }
  0x4a   : > { %2340 = vmatmul.mubr.msk.bf16.gmra.mrb[28].mxu1 %vm480_vm0, %v2583_v34 }
  0x4b   : > { %2408 = vmatmul.mubr.msk.bf16.gmra.mrb[28].mxu0 %vm480_vm0, %v2584_v35  ;;  %2345 = vmatprep.mubr.msk.bf16.mxu1 %vm480_vm0, %v2585_v36 }
  0x4c   : > { %2413 = vmatprep.mubr.msk.bf16.mxu0 %vm480_vm0, %v2586_v37 }
  0x52   : > { %2346 = vmatmul.mubr.msk.bf16.vlgmr.msra.gmra.mrb[0].mxu1 %vm480_vm0, %v2587_v38 }
  0x53   : > { %2414 = vmatmul.mubr.msk.bf16.vlgmr.msra.gmra.mrb[0].mxu0 %vm480_vm0, %v2588_v39  ;;  %2349 = vmatprep.mubr.msk.bf16.mxu1 %vm480_vm0, %v2589_v40 }
  0x54   : > { %2417 = vmatprep.mubr.msk.bf16.mxu0 %vm480_vm0, %v2590_v41 }
  0x5a   : > { %2350 = vmatmul.mubr.msk.bf16.gmra.mrb[4].mxu1 %vm480_vm0, %v2591_v42 }
  0x5b   : > { %2418 = vmatmul.mubr.msk.bf16.gmra.mrb[4].mxu0 %vm480_vm0, %v2592_v43  ;;  %2353 = vmatprep.mubr.msk.bf16.mxu1 %vm480_vm0, %v2593_v44 }
  0x5c   : > { %2421 = vmatprep.mubr.msk.bf16.mxu0 %vm480_vm0, %v2594_v45 }
  0x62   : > { %2354 = vmatmul.mubr.msk.bf16.gmra.mrb[8].mxu1 %vm480_vm0, %v2595_v46 }
  0x63   : > { %2422 = vmatmul.mubr.msk.bf16.gmra.mrb[8].mxu0 %vm480_vm0, %v2596_v47  ;;  %2357 = vmatprep.mubr.msk.bf16.mxu1 %vm480_vm0, %v2597_v48 }
  0x64   : > { %2425 = vmatprep.mubr.msk.bf16.mxu0 %vm480_vm0, %v2598_v49 }
  0x6a   : > { %2358 = vmatmul.mubr.msk.bf16.gmra.mrb[12].mxu1 %vm480_vm0, %v2599_v50 }
  0x6b   : > { %2426 = vmatmul.mubr.msk.bf16.gmra.mrb[12].mxu0 %vm480_vm0, %v2600_v51  ;;  %2361 = vmatprep.mubr.msk.bf16.mxu1 %vm480_vm0, %v2601_v52 }
  0x6c   : > { %2429 = vmatprep.mubr.msk.bf16.mxu0 %vm480_vm0, %v2602_v53 }
  0x72   : > { %2362 = vmatmul.mubr.msk.bf16.gmra.mrb[16].mxu1 %vm480_vm0, %v2603_v54 }
  0x73   : > { %2430 = vmatmul.mubr.msk.bf16.gmra.mrb[16].mxu0 %vm480_vm0, %v2604_v55  ;;  %2365 = vmatprep.mubr.msk.bf16.mxu1 %vm480_vm0, %v2605_v56 }
  0x74   : > { %2433 = vmatprep.mubr.msk.bf16.mxu0 %vm480_vm0, %v2606_v57 }
  0x7a   : > { %2366 = vmatmul.mubr.msk.bf16.gmra.mrb[20].mxu1 %vm480_vm0, %v2607_v58 }
  0x7b   : > { %2434 = vmatmul.mubr.msk.bf16.gmra.mrb[20].mxu0 %vm480_vm0, %v2608_v59  ;;  %2369 = vmatprep.mubr.msk.bf16.mxu1 %vm480_vm0, %v2609_v60 }
  0x7c   : > { %2437 = vmatprep.mubr.msk.bf16.mxu0 %vm480_vm0, %v2610_v61 }
  0x82   : > { %2370 = vmatmul.mubr.msk.bf16.gmra.mrb[24].mxu1 %vm480_vm0, %v2611_v62 }
  0x83   : > { %2438 = vmatmul.mubr.msk.bf16.gmra.mrb[24].mxu0 %vm480_vm0, %v2612_v63  ;;  %2373 = vmatprep.mubr.msk.bf16.mxu1 %vm480_vm0, %v2613_v0 }
  0x84   : > { %2441 = vmatprep.mubr.msk.bf16.mxu0 %vm480_vm0, %v2614_v1 }
  0x8a   : > { %2374 = vmatmul.mubr.msk.bf16.gmra.mrb[28].mxu1 %vm480_vm0, %v2615_v2 }
  0x8b   : > { %2442 = vmatmul.mubr.msk.bf16.gmra.mrb[28].mxu0 %vm480_vm0, %v2616_v3 }
 0x125   : > { %v2347_v4 = vpop.f32.mrb[0].mxu1 }
 0x126   : > { %v2415_v5 = vpop.f32.mrb[0].mxu0  ;;  %v858_v7 = vpop.f32.mrb[1].mxu1 }
 0x127   : > { %v2445_v8 = vadd.f32 %v2415_v5, %v2347_v4  ;;  %v1544_v9 = vpop.f32.mrb[1].mxu0  ;;  %v2348_v10 = vpop.f32.mrb[2].mxu1 }
 0x128   : > { %v2446_v11 = vadd.f32 %v1544_v9, %v858_v7  ;;  %v2416_v12 = vpop.f32.mrb[2].mxu0  ;;  %v861_v13 = vpop.f32.mrb[3].mxu1 }
 0x129   : > { %v1712_v14 = vadd.f32 %v2445_v8, %v2837_v6  ;;  %v2447_v15 = vadd.f32 %v2416_v12, %v2348_v10  ;;  %v1547_v16 = vpop.f32.mrb[3].mxu0 }
 0x12a   : > { %v1710_v17 = vadd.f32 %v2446_v11, %v2837_v6  ;;  %v2448_v18 = vadd.f32 %v1547_v16, %v861_v13 }
 0x12b   : > { %v1744_v19 = vmax.f32 %v1712_v14, 0.0  ;;  %v1713_v20 = vadd.f32 %v2447_v15, %v2837_v6 }
 0x12c   : > { %v1742_v21 = vmax.f32 %v1710_v17, 0.0  ;;  %v1711_v22 = vadd.f32 %v2448_v18, %v2837_v6 }
 0x12d   : > { %v2211_v23 = vpack.c.bf16 %v1744_v19, %v1744_v19  ;;  %v1745_v24 = vmax.f32 %v1713_v20, 0.0  ;;  %v2351_v25 = vpop.f32.mrb[4].mxu1 }
 0x12e   : > { %v2209_v26 = vpack.c.bf16 %v1742_v21, %v1742_v21  ;;  %v1743_v27 = vmax.f32 %v1711_v22, 0.0  ;;  %v2419_v28 = vpop.f32.mrb[4].mxu0  ;;  %v874_v29 = vpop.f32.mrb[5].mxu1 }
 0x12f   : > { %1905 = vst.msk [vmem:[%s2846_s26 + $0x8] sm:$0xf] %vm1902_vm1, %v2211_v23  ;;  %v2212_v30 = vpack.c.bf16 %v1745_v24, %v1745_v24  ;;  %v2449_v31 = vadd.f32 %v2419_v28, %v2351_v25  ;;  %v1560_v32 = vpop.f32.mrb[5].mxu0  ;;  %v2352_v33 = vpop.f32.mrb[6].mxu1 }
 0x130   : > { %1903 = vst.msk [vmem:[%s2846_s26] sm:$0xf] %vm1902_vm1, %v2209_v26  ;;  %v2210_v34 = vpack.c.bf16 %v1743_v27, %v1743_v27  ;;  %v2450_v35 = vadd.f32 %v1560_v32, %v874_v29  ;;  %v2420_v36 = vpop.f32.mrb[6].mxu0  ;;  %v877_v37 = vpop.f32.mrb[7].mxu1 }
 0x131   : > { %1906 = vst.msk [vmem:[%s2846_s26 + $0xc] sm:$0xf] %vm1902_vm1, %v2212_v30  ;;  %v1716_v38 = vadd.f32 %v2449_v31, %v2837_v6  ;;  %v2451_v39 = vadd.f32 %v2420_v36, %v2352_v33  ;;  %v1563_v40 = vpop.f32.mrb[7].mxu0 }
 0x132   : > { %1904 = vst.msk [vmem:[%s2846_s26 + $0x4] sm:$0xf] %vm1902_vm1, %v2210_v34  ;;  %v1714_v41 = vadd.f32 %v2450_v35, %v2837_v6  ;;  %v2452_v42 = vadd.f32 %v1563_v40, %v877_v37 }
 0x133   : > { %v1748_v43 = vmax.f32 %v1716_v38, 0.0  ;;  %v1717_v44 = vadd.f32 %v2451_v39, %v2837_v6 }
 0x134   : > { %v1746_v45 = vmax.f32 %v1714_v41, 0.0  ;;  %v1715_v46 = vadd.f32 %v2452_v42, %v2837_v6 }
 0x135   : > { %v2215_v47 = vpack.c.bf16 %v1748_v43, %v1748_v43  ;;  %v1749_v48 = vmax.f32 %v1717_v44, 0.0  ;;  %v2355_v49 = vpop.f32.mrb[8].mxu1 }
 0x136   : > { %v2213_v50 = vpack.c.bf16 %v1746_v45, %v1746_v45  ;;  %v1747_v51 = vmax.f32 %v1715_v46, 0.0  ;;  %v2423_v52 = vpop.f32.mrb[8].mxu0  ;;  %v890_v53 = vpop.f32.mrb[9].mxu1 }
 0x137   : > { %1909 = vst.msk [vmem:[%s2846_s26 + $0x18] sm:$0xf] %vm1902_vm1, %v2215_v47  ;;  %v2216_v54 = vpack.c.bf16 %v1749_v48, %v1749_v48  ;;  %v2453_v55 = vadd.f32 %v2423_v52, %v2355_v49  ;;  %v1576_v56 = vpop.f32.mrb[9].mxu0  ;;  %v2356_v57 = vpop.f32.mrb[10].mxu1 }
 0x138   : > { %1907 = vst.msk [vmem:[%s2846_s26 + $0x10] sm:$0xf] %vm1902_vm1, %v2213_v50  ;;  %v2214_v58 = vpack.c.bf16 %v1747_v51, %v1747_v51  ;;  %v2454_v59 = vadd.f32 %v1576_v56, %v890_v53  ;;  %v2424_v60 = vpop.f32.mrb[10].mxu0  ;;  %v893_v61 = vpop.f32.mrb[11].mxu1 }
 0x139   : > { %1910 = vst.msk [vmem:[%s2846_s26 + $0x1c] sm:$0xf] %vm1902_vm1, %v2216_v54  ;;  %v1720_v62 = vadd.f32 %v2453_v55, %v2837_v6  ;;  %v2455_v63 = vadd.f32 %v2424_v60, %v2356_v57  ;;  %v1579_v0 = vpop.f32.mrb[11].mxu0 }
 0x13a   : > { %1908 = vst.msk [vmem:[%s2846_s26 + $0x14] sm:$0xf] %vm1902_vm1, %v2214_v58  ;;  %v1718_v1 = vadd.f32 %v2454_v59, %v2837_v6  ;;  %v2456_v2 = vadd.f32 %v1579_v0, %v893_v61 }
 0x13b   : > { %v1752_v3 = vmax.f32 %v1720_v62, 0.0  ;;  %v1721_v4 = vadd.f32 %v2455_v63, %v2837_v6 }
 0x13c   : > { %v1750_v5 = vmax.f32 %v1718_v1, 0.0  ;;  %v1719_v7 = vadd.f32 %v2456_v2, %v2837_v6 }
 0x13d   : > { %v2219_v8 = vpack.c.bf16 %v1752_v3, %v1752_v3  ;;  %v1753_v9 = vmax.f32 %v1721_v4, 0.0  ;;  %v2359_v10 = vpop.f32.mrb[12].mxu1 }
 0x13e   : > { %v2217_v11 = vpack.c.bf16 %v1750_v5, %v1750_v5  ;;  %v1751_v12 = vmax.f32 %v1719_v7, 0.0  ;;  %v2427_v13 = vpop.f32.mrb[12].mxu0  ;;  %v906_v14 = vpop.f32.mrb[13].mxu1 }
 0x13f   : > { %1913 = vst.msk [vmem:[%s2846_s26 + $0x28] sm:$0xf] %vm1902_vm1, %v2219_v8  ;;  %v2220_v15 = vpack.c.bf16 %v1753_v9, %v1753_v9  ;;  %v2457_v16 = vadd.f32 %v2427_v13, %v2359_v10  ;;  %v1592_v17 = vpop.f32.mrb[13].mxu0  ;;  %v2360_v18 = vpop.f32.mrb[14].mxu1 }
 0x140   : > { %1911 = vst.msk [vmem:[%s2846_s26 + $0x20] sm:$0xf] %vm1902_vm1, %v2217_v11  ;;  %v2218_v19 = vpack.c.bf16 %v1751_v12, %v1751_v12  ;;  %v2458_v20 = vadd.f32 %v1592_v17, %v906_v14  ;;  %v2428_v21 = vpop.f32.mrb[14].mxu0  ;;  %v909_v22 = vpop.f32.mrb[15].mxu1 }
 0x141   : > { %1914 = vst.msk [vmem:[%s2846_s26 + $0x2c] sm:$0xf] %vm1902_vm1, %v2220_v15  ;;  %v1724_v23 = vadd.f32 %v2457_v16, %v2837_v6  ;;  %v2459_v24 = vadd.f32 %v2428_v21, %v2360_v18  ;;  %v1595_v25 = vpop.f32.mrb[15].mxu0 }
 0x142   : > { %1912 = vst.msk [vmem:[%s2846_s26 + $0x24] sm:$0xf] %vm1902_vm1, %v2218_v19  ;;  %v1722_v26 = vadd.f32 %v2458_v20, %v2837_v6  ;;  %v2460_v27 = vadd.f32 %v1595_v25, %v909_v22 }
 0x143   : > { %v1756_v28 = vmax.f32 %v1724_v23, 0.0  ;;  %v1725_v29 = vadd.f32 %v2459_v24, %v2837_v6 }
 0x144   : > { %v1754_v30 = vmax.f32 %v1722_v26, 0.0  ;;  %v1723_v31 = vadd.f32 %v2460_v27, %v2837_v6 }
 0x145   : > { %v2223_v32 = vpack.c.bf16 %v1756_v28, %v1756_v28  ;;  %v1757_v33 = vmax.f32 %v1725_v29, 0.0  ;;  %v2363_v34 = vpop.f32.mrb[16].mxu1 }
 0x146   : > { %v2221_v35 = vpack.c.bf16 %v1754_v30, %v1754_v30  ;;  %v1755_v36 = vmax.f32 %v1723_v31, 0.0  ;;  %v2431_v37 = vpop.f32.mrb[16].mxu0  ;;  %v922_v38 = vpop.f32.mrb[17].mxu1 }
 0x147   : > { %1917 = vst.msk [vmem:[%s2846_s26 + $0x38] sm:$0xf] %vm1902_vm1, %v2223_v32  ;;  %v2224_v39 = vpack.c.bf16 %v1757_v33, %v1757_v33  ;;  %v2461_v40 = vadd.f32 %v2431_v37, %v2363_v34  ;;  %v1608_v41 = vpop.f32.mrb[17].mxu0  ;;  %v2364_v42 = vpop.f32.mrb[18].mxu1 }
 0x148   : > { %1915 = vst.msk [vmem:[%s2846_s26 + $0x30] sm:$0xf] %vm1902_vm1, %v2221_v35  ;;  %v2222_v43 = vpack.c.bf16 %v1755_v36, %v1755_v36  ;;  %v2462_v44 = vadd.f32 %v1608_v41, %v922_v38  ;;  %v2432_v45 = vpop.f32.mrb[18].mxu0  ;;  %v925_v46 = vpop.f32.mrb[19].mxu1 }
 0x149   : > { %1918 = vst.msk [vmem:[%s2846_s26 + $0x3c] sm:$0xf] %vm1902_vm1, %v2224_v39  ;;  %v1728_v47 = vadd.f32 %v2461_v40, %v2837_v6  ;;  %v2463_v48 = vadd.f32 %v2432_v45, %v2364_v42  ;;  %v1611_v49 = vpop.f32.mrb[19].mxu0 }
 0x14a   : > { %1916 = vst.msk [vmem:[%s2846_s26 + $0x34] sm:$0xf] %vm1902_vm1, %v2222_v43  ;;  %v1726_v50 = vadd.f32 %v2462_v44, %v2837_v6  ;;  %v2464_v51 = vadd.f32 %v1611_v49, %v925_v46 }
 0x14b   : > { %v1760_v52 = vmax.f32 %v1728_v47, 0.0  ;;  %v1729_v53 = vadd.f32 %v2463_v48, %v2837_v6 }
 0x14c   : > { %v1758_v54 = vmax.f32 %v1726_v50, 0.0  ;;  %v1727_v55 = vadd.f32 %v2464_v51, %v2837_v6 }
 0x14d   : > { %v2227_v56 = vpack.c.bf16 %v1760_v52, %v1760_v52  ;;  %v1761_v57 = vmax.f32 %v1729_v53, 0.0  ;;  %v2367_v58 = vpop.f32.mrb[20].mxu1 }
 0x14e   : > { %v2225_v59 = vpack.c.bf16 %v1758_v54, %v1758_v54  ;;  %v1759_v60 = vmax.f32 %v1727_v55, 0.0  ;;  %v2435_v61 = vpop.f32.mrb[20].mxu0  ;;  %v938_v62 = vpop.f32.mrb[21].mxu1 }
 0x14f   : > { %1921 = vst.msk [vmem:[%s2846_s26 + $0x48] sm:$0xf] %vm1902_vm1, %v2227_v56  ;;  %v2228_v63 = vpack.c.bf16 %v1761_v57, %v1761_v57  ;;  %v2465_v0 = vadd.f32 %v2435_v61, %v2367_v58  ;;  %v1624_v1 = vpop.f32.mrb[21].mxu0  ;;  %v2368_v2 = vpop.f32.mrb[22].mxu1 }
 0x150   : > { %1919 = vst.msk [vmem:[%s2846_s26 + $0x40] sm:$0xf] %vm1902_vm1, %v2225_v59  ;;  %v2226_v3 = vpack.c.bf16 %v1759_v60, %v1759_v60  ;;  %v2466_v4 = vadd.f32 %v1624_v1, %v938_v62  ;;  %v2436_v5 = vpop.f32.mrb[22].mxu0  ;;  %v941_v7 = vpop.f32.mrb[23].mxu1 }
 0x151   : > { %1922 = vst.msk [vmem:[%s2846_s26 + $0x4c] sm:$0xf] %vm1902_vm1, %v2228_v63  ;;  %v1732_v8 = vadd.f32 %v2465_v0, %v2837_v6  ;;  %v2467_v9 = vadd.f32 %v2436_v5, %v2368_v2  ;;  %v1627_v10 = vpop.f32.mrb[23].mxu0 }
 0x152   : > { %1920 = vst.msk [vmem:[%s2846_s26 + $0x44] sm:$0xf] %vm1902_vm1, %v2226_v3  ;;  %v1730_v11 = vadd.f32 %v2466_v4, %v2837_v6  ;;  %v2468_v12 = vadd.f32 %v1627_v10, %v941_v7 }
 0x153   : > { %v1764_v13 = vmax.f32 %v1732_v8, 0.0  ;;  %v1733_v14 = vadd.f32 %v2467_v9, %v2837_v6 }
 0x154   : > { %v1762_v15 = vmax.f32 %v1730_v11, 0.0  ;;  %v1731_v16 = vadd.f32 %v2468_v12, %v2837_v6 }
 0x155   : > { %v2231_v17 = vpack.c.bf16 %v1764_v13, %v1764_v13  ;;  %v1765_v18 = vmax.f32 %v1733_v14, 0.0  ;;  %v2371_v19 = vpop.f32.mrb[24].mxu1 }
 0x156   : > { %v2229_v20 = vpack.c.bf16 %v1762_v15, %v1762_v15  ;;  %v1763_v21 = vmax.f32 %v1731_v16, 0.0  ;;  %v2439_v22 = vpop.f32.mrb[24].mxu0  ;;  %v954_v23 = vpop.f32.mrb[25].mxu1 }
 0x157   : > { %1925 = vst.msk [vmem:[%s2846_s26 + $0x58] sm:$0xf] %vm1902_vm1, %v2231_v17  ;;  %v2232_v24 = vpack.c.bf16 %v1765_v18, %v1765_v18  ;;  %v2469_v25 = vadd.f32 %v2439_v22, %v2371_v19  ;;  %v1640_v26 = vpop.f32.mrb[25].mxu0  ;;  %v2372_v27 = vpop.f32.mrb[26].mxu1 }
 0x158   : > { %1923 = vst.msk [vmem:[%s2846_s26 + $0x50] sm:$0xf] %vm1902_vm1, %v2229_v20  ;;  %v2230_v28 = vpack.c.bf16 %v1763_v21, %v1763_v21  ;;  %v2470_v29 = vadd.f32 %v1640_v26, %v954_v23  ;;  %v2440_v30 = vpop.f32.mrb[26].mxu0  ;;  %v957_v31 = vpop.f32.mrb[27].mxu1 }
 0x159   : > { %1926 = vst.msk [vmem:[%s2846_s26 + $0x5c] sm:$0xf] %vm1902_vm1, %v2232_v24  ;;  %v1736_v32 = vadd.f32 %v2469_v25, %v2837_v6  ;;  %v2471_v33 = vadd.f32 %v2440_v30, %v2372_v27  ;;  %v1643_v34 = vpop.f32.mrb[27].mxu0 }
 0x15a   : > { %1924 = vst.msk [vmem:[%s2846_s26 + $0x54] sm:$0xf] %vm1902_vm1, %v2230_v28  ;;  %v1734_v35 = vadd.f32 %v2470_v29, %v2837_v6  ;;  %v2472_v36 = vadd.f32 %v1643_v34, %v957_v31 }
 0x15b   : > { %v1768_v37 = vmax.f32 %v1736_v32, 0.0  ;;  %v1737_v38 = vadd.f32 %v2471_v33, %v2837_v6 }
 0x15c   : > { %v1766_v39 = vmax.f32 %v1734_v35, 0.0  ;;  %v1735_v40 = vadd.f32 %v2472_v36, %v2837_v6 }
 0x15d   : > { %v2235_v41 = vpack.c.bf16 %v1768_v37, %v1768_v37  ;;  %v1769_v42 = vmax.f32 %v1737_v38, 0.0  ;;  %v2375_v43 = vpop.f32.mrb[28].mxu1 }
 0x15e   : > { %v2233_v44 = vpack.c.bf16 %v1766_v39, %v1766_v39  ;;  %v1767_v45 = vmax.f32 %v1735_v40, 0.0  ;;  %v2443_v46 = vpop.f32.mrb[28].mxu0  ;;  %v970_v47 = vpop.f32.mrb[29].mxu1 }
 0x15f   : > { %1929 = vst.msk [vmem:[%s2846_s26 + $0x68] sm:$0xf] %vm1902_vm1, %v2235_v41  ;;  %v2236_v48 = vpack.c.bf16 %v1769_v42, %v1769_v42  ;;  %v2473_v49 = vadd.f32 %v2443_v46, %v2375_v43  ;;  %v1656_v50 = vpop.f32.mrb[29].mxu0  ;;  %v2376_v51 = vpop.f32.mrb[30].mxu1 }
 0x160   : > { %1927 = vst.msk [vmem:[%s2846_s26 + $0x60] sm:$0xf] %vm1902_vm1, %v2233_v44  ;;  %v2234_v52 = vpack.c.bf16 %v1767_v45, %v1767_v45  ;;  %v2474_v53 = vadd.f32 %v1656_v50, %v970_v47  ;;  %v2444_v54 = vpop.f32.mrb[30].mxu0  ;;  %v973_v55 = vpop.f32.mrb[31].mxu1 }
 0x161   : > { %1930 = vst.msk [vmem:[%s2846_s26 + $0x6c] sm:$0xf] %vm1902_vm1, %v2236_v48  ;;  %v1740_v56 = vadd.f32 %v2473_v49, %v2837_v6  ;;  %v2475_v57 = vadd.f32 %v2444_v54, %v2376_v51  ;;  %v1659_v58 = vpop.f32.mrb[31].mxu0 }
 0x162   : > { %1928 = vst.msk [vmem:[%s2846_s26 + $0x64] sm:$0xf] %vm1902_vm1, %v2234_v52  ;;  %v1738_v59 = vadd.f32 %v2474_v53, %v2837_v6  ;;  %v2476_v60 = vadd.f32 %v1659_v58, %v973_v55 }
 0x163   : > { %v1772_v61 = vmax.f32 %v1740_v56, 0.0  ;;  %v1741_v62 = vadd.f32 %v2475_v57, %v2837_v6 }
 0x164   : > { %v1770_v63 = vmax.f32 %v1738_v59, 0.0  ;;  %v1739_v0 = vadd.f32 %v2476_v60, %v2837_v6 }
 0x165   : > { %v2239_v1 = vpack.c.bf16 %v1772_v61, %v1772_v61  ;;  %v1773_v2 = vmax.f32 %v1741_v62, 0.0 }
 0x166   : > { %v2237_v3 = vpack.c.bf16 %v1770_v63, %v1770_v63  ;;  %v1771_v4 = vmax.f32 %v1739_v0, 0.0 }
 0x167   : > { %1933 = vst.msk [vmem:[%s2846_s26 + $0x78] sm:$0xf] %vm1902_vm1, %v2239_v1  ;;  %v2240_v5 = vpack.c.bf16 %v1773_v2, %v1773_v2 }
 0x168   : > { %1931 = vst.msk [vmem:[%s2846_s26 + $0x70] sm:$0xf] %vm1902_vm1, %v2237_v3  ;;  %v2238_v7 = vpack.c.bf16 %v1771_v4, %v1771_v4 }
 0x169   : > { %1934 = vst.msk [vmem:[%s2846_s26 + $0x7c] sm:$0xf] %vm1902_vm1, %v2240_v5 }
 0x16a   : > { %1932 = vst.msk [vmem:[%s2846_s26 + $0x74] sm:$0xf] %vm1902_vm1, %v2238_v7 }
 0x16b PF: > { %s16_s21 = sadd.s32 1, %s2623_s21  }
 0x16c   : > { %p13_p4 = scmp.ge.s32.totalorder %s16_s21, 4  }
 0x16e   :  { %15 = sbr.rel (!%p13_p4) target bundleno = 1 (0x1), region = 83 }

// kernel: block4_forward.10
= control target key start
LH: loop header
LB: loop body
LE: loop exit
PB: predicated region body
PF: predicated region fallthrough
CT: control target
= control target key end

     0   :  { %s2254_s30 = smov 0   ;;  %s2256_s10 = smov 0   ;;  %s2974_s0 = inlined_call_operand.vmem [shape: bf16[2,16,16,16], index: 0, kind: input, shape index: {}, may-alias: {0,1,2}]   ;;  %s2975_s1 = inlined_call_operand.vmem [shape: bf16[2,16,16,16], index: 1, kind: input, shape index: {}, may-alias: {0,1,2}]   ;;  %s2976_s2 = inlined_call_operand.vmem [shape: bf16[2,16,16,16], index: 2, kind: input, shape index: {}, may-alias: {0,1,2}]   ;;  %s2977_s3 = inlined_call_operand.vmem [shape: bf16[16,96], index: 3, kind: input, shape index: {}]   ;;  %s2978_s4 = inlined_call_operand.vmem [shape: f32[1,96], index: 4, kind: input, shape index: {}]   ;;  %s2979_s5 = inlined_call_operand.vmem [shape: f32[9,96], index: 5, kind: input, shape index: {}]   ;;  %s2980_s6 = inlined_call_operand.vmem [shape: f32[1,96], index: 6, kind: input, shape index: {}]   ;;  %s2981_s7 = inlined_call_operand.vmem [shape: bf16[96,16], index: 7, kind: input, shape index: {}]   ;;  %s2982_s8 = inlined_call_operand.vmem [shape: f32[1,16], index: 8, kind: input, shape index: {}]   ;;  %s2983_s9 = inlined_call_operand.vmem [shape: bf16[2,16,16,16], index: 9, kind: output, shape index: {}]  }
   0x1   :  { %s2258_s11 = smov 0   ;;  %s2260_s12 = smov 0  }
   0x2   :  { %s2262_s13 = smov 0  }
   0x3 LB: > { %s28_s14 = sadd.s32 1, %s2192_s11  ;;  %s31_s15 = sadd.s32 1, %s2196_s12  ;;  %s2200_s13 = sphi %s2262_s13, %s19_s13   ;;  %s2196_s12 = sphi %s2260_s12, %s2987_s12   ;;  %s2192_s11 = sphi %s2258_s11, %s2986_s11   ;;  %s2188_s10 = sphi %s2256_s10, %s2985_s10   ;;  %s2184_s30 = sphi %s2254_s30, %s2984_s30  }
   0x4   : > { %p29_p0 = scmp.ge.s32.totalorder %s28_s14, 2  ;;  %p1874_p1 = scmp.ge.s32.totalorder %s2200_s13, 1 }
   0x5   : > { %p369_p2 = scmp.lt.s32.totalorder %s2200_s13, 5 }
   0x6   : > { %s2989_s14 = smov (%p29_p0, %s28_s14), 0  ;;  %s2991_s15 = smov (!%p29_p0, %s31_s15), %s2196_s12 }
   0x7   : > { %p370_p3 = pnand %p1874_p1, %p369_p2  ;;  %p33_p4 = scmp.ge.s32.totalorder %s2991_s15, 2 }
   0x8   : > { %v2145_v0 = vld [vmem:[%s2977_s3] sm:$0xff] (!%p370_p3)   ;;  %p445_p5 = scmp.lt.s32.totalorder (!%p370_p3), %s2188_s10, 1  ;;  %s1880_s18 = sshll.u32 (!%p370_p3), %s2184_s30, 3  ;;  %v2202_v1 = vmov (!%p370_p3), 0.0   ;;  %vm2203_vm0 = vmmov (!%p370_p3), 0   ;;  %vm573_vm1 = vcmask (!%p370_p3), 130048   ;;  %v906_v18 = vlaneseq (!%p370_p3) }
   0x9   : > { %s2993_s15 = smov (%p33_p4, %s2991_s15), 0  ;;  %373 = sbr.rel (%p370_p3) target bundleno = 573 (0x23d), region = 56 }
   0xa   : > { %s1875_s19 = sadd.s32 (!%p370_p3), 4294967295, %s2184_s30  ;;  %2033 = vmatprep.subr.bf16.mxu0 (!%p370_p3), %v2145_v0  ;;  %2051 = vmatprep.subr.bf16.mxu1 (!%p370_p3), %v2202_v1  ;;  %p461_p6 = scmp.lt.s32.totalorder (!%p370_p3), %s1880_s18, 15  ;;  %vm867_vm2 = vcmask (!%p370_p3), 778240   ;;  %v2156_v12 = vld [vmem:[%s2981_s7] sm:$0xff] (!%p370_p3)   ;;  %v2157_v13 = vld [vmem:[%s2981_s7 + $0x8] sm:$0xff] (!%p370_p3)   ;;  %v2158_v14 = vld [vmem:[%s2981_s7 + $0x10] sm:$0xff] (!%p370_p3)  }
   0xb   : > { %2034 = vmatpush3.bf16.msra.mxu0 (!%p370_p3), %v2145_v0  ;;  %2052 = vmatpush3.bf16.msra.mxu1 (!%p370_p3), %v2145_v0  ;;  %p442_p7 = scmp.gt.s32.totalorder (!%p370_p3), %s1875_s19, 0  ;;  %s469_s21 = sadd.s32 (!%p370_p3), 1, %s2184_s30  ;;  %869 = vst.msk [vmem:[#allocation2 + $0x18] sm:$0x1] (!%p370_p3), %vm867_vm2, %v2202_v1  ;;  %868 = vst.msk [vmem:[#allocation2] sm:$0x1] (!%p370_p3), %vm867_vm2, %v2202_v1 }
   0xc   : > { %2053 = vmatprep.mubr.msk.bf16.mxu1 (!%p370_p3), %vm2203_vm0, %v2202_v1  ;;  %2057 = vmatprep.subr.bf16.mxu1 (!%p370_p3), %v2202_v1  ;;  %p470_p8 = scmp.lt.s32.totalorder (!%p370_p3), %s469_s21, 1  ;;  %870 = vst.msk [vmem:[#allocation2 + $0x30] sm:$0x1] (!%p370_p3), %vm867_vm2, %v2202_v1  ;;  %871 = vst.msk [vmem:[#allocation2 + $0x48] sm:$0x1] (!%p370_p3), %vm867_vm2, %v2202_v1  ;;  %v2159_v15 = vld [vmem:[%s2981_s7 + $0x18] sm:$0xff] (!%p370_p3)  }
   0xd   : > { %872 = vst.msk [vmem:[#allocation2 + $0x60] sm:$0x1] (!%p370_p3), %vm867_vm2, %v2202_v1  ;;  %873 = vst.msk [vmem:[#allocation2 + $0x78] sm:$0x1] (!%p370_p3), %vm867_vm2, %v2202_v1  ;;  %2063 = vmatprep.subr.bf16.mxu0 (!%p370_p3), %v2156_v12  ;;  %v2160_v16 = vld [vmem:[%s2981_s7 + $0x20] sm:$0xff] (!%p370_p3)   ;;  %v2161_v17 = vld [vmem:[%s2981_s7 + $0x28] sm:$0xff] (!%p370_p3)  }
   0xe   : > { %874 = vst.msk [vmem:[#allocation2 + $0x90] sm:$0x1] (!%p370_p3), %vm867_vm2, %v2202_v1  ;;  %875 = vst.msk [vmem:[#allocation2 + $0xa8] sm:$0x1] (!%p370_p3), %vm867_vm2, %v2202_v1  ;;  %p501_p11 = scmp.gt.s32.totalorder (!%p370_p3), %s2184_s30, 0  ;;  %v2401_v20 = vshrl.u32 (!%p370_p3), %v906_v18, 7 }
   0xf   : > { %876 = vst.msk [vmem:[#allocation2 + $0xc0] sm:$0x1] (!%p370_p3), %vm867_vm2, %v2202_v1  ;;  %877 = vst.msk [vmem:[#allocation2 + $0xd8] sm:$0x1] (!%p370_p3), %vm867_vm2, %v2202_v1  ;;  %v2399_v19 = vld [vmem:[%s2978_s4] ss:$0 sm:$0xff] (!%p370_p3) }
  0x10   : > { %s2995_s10 = smov (!%p445_p5, %s2188_s10), 1  ;;  %s2997_s18 = smov (!%p461_p6, %s1880_s18), 15  ;;  %878 = vst.msk [vmem:[#allocation2 + $0x11] sm:$0x1] %vm867_vm2, %v2202_v1  ;;  %879 = vst.msk [vmem:[#allocation2 + $0x29] sm:$0x1] %vm867_vm2, %v2202_v1 }
  0x11   : > { %s2292_s20 = sshll.u32 %s2995_s10, 5  ;;  %s2999_s19 = smov (!%p442_p7, %s1875_s19), 0  ;;  %880 = vst.msk [vmem:[#allocation2 + $0x41] sm:$0x1] %vm867_vm2, %v2202_v1  ;;  %881 = vst.msk [vmem:[#allocation2 + $0x59] sm:$0x1] %vm867_vm2, %v2202_v1 }
  0x12   : > { %s1881_s22 = sshll.u32 %s2997_s18, 1  ;;  %s1876_s24 = sshll.u32 %s2999_s19, 3  ;;  %882 = vst.msk [vmem:[#allocation2 + $0x71] sm:$0x1] %vm867_vm2, %v2202_v1  ;;  %883 = vst.msk [vmem:[#allocation2 + $0x89] sm:$0x1] %vm867_vm2, %v2202_v1 }
  0x13   : > { %s2299_s23 = sadd.s32 %s1881_s22, %s2292_s20  ;;  %p447_p9 = scmp.lt.s32.totalorder %s1876_s24, 15  ;;  %884 = vst.msk [vmem:[#allocation2 + $0xa1] sm:$0x1] %vm867_vm2, %v2202_v1  ;;  %885 = vst.msk [vmem:[#allocation2 + $0xb9] sm:$0x1] %vm867_vm2, %v2202_v1  ;;  %vm728_vm3 = vcmask 785408  }
  0x14   : > { %s1883_s25 = sshll.u32 %s2299_s23, 2  ;;  %s3003_s21 = smov (!%p470_p8, %s469_s21), 1  ;;  %886 = vst.msk [vmem:[#allocation2 + $0xd1] sm:$0x1] %vm867_vm2, %v2202_v1  ;;  %887 = vst.msk [vmem:[#allocation2 + $0xe9] sm:$0x1] %vm867_vm2, %v2202_v1 }
  0x15   : > { %s2307_s28 = scalar_lea.vmem %s2975_s1, %s1883_s25  ;;  %s3001_s24 = smov (!%p447_p9, %s1876_s24), 15  ;;  %v908_v27 = vsub.s32 0, %v2401_v20  ;;  %v888_v31 = vld [vmem:[%s2979_s5] sm:$0xff]  ;;  %v960_v32 = vsub.s32 1, %v2401_v20  ;;  %v1064_v38 = vsub.s32 3, %v2401_v20  ;;  %v1116_v39 = vsub.s32 4, %v2401_v20 }
  0x16   : > { %v2146_v2 = vld [vmem:[%s2307_s28] sm:$0xff]   ;;  %v2147_v3 = vld [vmem:[%s2307_s28 + $0x8] sm:$0xff]   ;;  %s1877_s29 = sshll.u32 %s3001_s24, 1  ;;  %v2149_v4 = vld [vmem:[%s2307_s28 + $0x10] sm:$0xff]   ;;  %s1884_s16 = sshll.u32 %s3003_s21, 3  ;;  %v1012_v44 = vsub.s32 2, %v2401_v20 }
  0x17   : > { %2035 = vmatprep.mubr.msk.bf16.mxu0 %vm573_vm1, %v2146_v2  ;;  %s451_s10 = sadd.s32 %s2292_s20, %s1877_s29  ;;  %p475_p10 = scmp.lt.s32.totalorder %s1884_s16, 15  ;;  %v2150_v6 = vld [vmem:[%s2307_s28 + $0x18] sm:$0xff]   ;;  %v2151_v7 = vld [vmem:[%s2307_s28 + $0x20] sm:$0xff]   ;;  %v2152_v9 = vld [vmem:[%s2307_s28 + $0x28] sm:$0xff]   ;;  %v2421_v45 = vrot.slane %v888_v31, %v908_v27  ;;  %v1221_v48 = vsub.s32 6, %v2401_v20  ;;  %v1273_v49 = vsub.s32 7, %v2401_v20  ;;  %v2426_v50 = vrot.slane %v888_v31, %v960_v32 }
  0x18   : > { %2036 = vmatmul.mubr.msk.bf16.vlgmr.msra.gmra.mrb[0].mxu0 %vm573_vm1, %v2147_v3  ;;  %s1879_s17 = sshll.u32 %s451_s10, 2  ;;  %v2153_v10 = vld [vmem:[%s2307_s28 + $0x30] sm:$0xff]   ;;  %v2154_v11 = vld [vmem:[%s2307_s28 + $0x38] sm:$0xff]   ;;  %p503_p12 = scmp.lt.s32.totalorder %s2184_s30, 1  ;;  %v2435_v58 = vrot.slane %v888_v31, %v1064_v38  ;;  %v2437_v59 = vrot.slane %v888_v31, %v1116_v39  ;;  %v1168_v60 = vsub.s32 5, %v2401_v20  ;;  %vm1710_vm4 = vcmask 125952  }
  0x19   : > { %2039 = vmatprep.mubr.msk.bf16.mxu0 %vm573_vm1, %v2149_v4  ;;  %s453_s22 = scalar_lea.vmem %s2974_s0, %s1879_s17  ;;  %s3005_s16 = smov (!%p475_p10, %s1884_s16), 15  ;;  %2064 = vmatpush3.bf16.msra.mxu0 %v2156_v12 }
  0x1a   : > { %v2148_v5 = vld [vmem:[%s453_s22 + $0x38] sm:$0xff]   ;;  %s1885_s21 = sshll.u32 %s3005_s16, 1  ;;  %2065 = vmatprep.subr.bf16.mxu0 %v2157_v13  ;;  %s2906_s16 = scalar_lea.vmem %s2983_s9, %s1883_s25 }
  0x1b   : > { %2054 = vmatmul.mubr.msk.bf16.vlgmr.msra.gmra.mrb[0].mxu1 %vm573_vm1, %v2148_v5  ;;  %s479_s24 = sadd.s32 %s1885_s21, %s2292_s20  ;;  %v2445_v5 = vrot.slane %v888_v31, %v1221_v48 }
  0x1c   : > { %2058 = vmatpush3.bf16.msra.mxu1 %v2145_v0  ;;  %2059 = vmatprep.mubr.msk.bf16.mxu1 %vm2203_vm0, %v2202_v1  ;;  %s1887_s26 = sshll.u32 %s479_s24, 2  ;;  %v2442_v1 = vrot.slane %v888_v31, %v1012_v44 }
  0x1d   : > { %s481_s10 = scalar_lea.vmem %s2976_s2, %s1887_s26  ;;  %2091 = vmatprep.subr.bf16.mxu1 %v2156_v12  ;;  %2066 = vmatpush3.bf16.msra.mxu0 %v2157_v13 }
  0x1e   : > { %v2155_v8 = vld [vmem:[%s481_s10] sm:$0xff]   ;;  %2067 = vmatprep.subr.bf16.mxu0 %v2158_v14  ;;  %s2403_s17 = scalar_select %p501_p11, 1.0, 0.0 }
  0x1f   : > { %s2433_s22 = scalar_select %p503_p12, 1.0, 0.0 }
  0x20   : > { %2040 = vmatmul.mubr.msk.bf16.gmra.mrb[4].mxu0 %vm573_vm1, %v2150_v6  ;;  %v801_v34 = vstv %s2403_s17  ;;  %v2447_v6 = vrot.slane %v888_v31, %v1273_v49 }
  0x21   : > { %2043 = vmatprep.mubr.msk.bf16.mxu0 %vm573_vm1, %v2151_v7  ;;  %2068 = vmatpush3.bf16.msra.mxu0 %v2158_v14 }
  0x22   : > { %2069 = vmatprep.subr.bf16.mxu0 %v2159_v15 }
  0x23   : > { %2060 = vmatmul.mubr.msk.bf16.vlgmr.msra.gmra.mrb[4].mxu1 %vm573_vm1, %v2155_v8 }
  0x24   : > { %2097 = vmatpush3.bf16.msra.mxu1 %v2156_v12 }
  0x25   : > { %2092 = vmatprep.subr.bf16.mxu1 %v2157_v13  ;;  %2070 = vmatpush3.bf16.msra.mxu0 %v2159_v15 }
  0x26   : > { %2071 = vmatprep.subr.bf16.mxu0 %v2160_v16 }
  0x28   : > { %2044 = vmatmul.mubr.msk.bf16.gmra.mrb[8].mxu0 %vm573_vm1, %v2152_v9  ;;  %2098 = vmatpush3.bf16.msra.mxu1 %v2157_v13 }
  0x29   : > { %2047 = vmatprep.mubr.msk.bf16.mxu0 %vm573_vm1, %v2153_v10  ;;  %2093 = vmatprep.subr.bf16.mxu1 %v2158_v14 }
  0x2a   : > { %2072 = vmatpush3.bf16.msra.mxu0 %v2160_v16 }
  0x2b   : > { %2073 = vmatprep.subr.bf16.mxu0 %v2161_v17 }
  0x2c   : > { %2099 = vmatpush3.bf16.msra.mxu1 %v2158_v14  ;;  %v861_v14 = vstv %s2433_s22 }
  0x2d   : > { %2094 = vmatprep.subr.bf16.mxu1 %v2159_v15 }
  0x2e   : > { %2074 = vmatpush3.bf16.msra.mxu0 %v2161_v17 }
  0x30   : > { %2048 = vmatmul.mubr.msk.bf16.gmra.mrb[12].mxu0 %vm573_vm1, %v2154_v11  ;;  %2100 = vmatpush3.bf16.msra.mxu1 %v2159_v15  ;;  %v2451_v15 = vrot.slane %v888_v31, %v1168_v60 }
  0x31   : > { %2095 = vmatprep.subr.bf16.mxu1 %v2160_v16 }
  0x34   : > { %2101 = vmatpush3.bf16.msra.mxu1 %v2160_v16 }
  0x35   : > { %2096 = vmatprep.subr.bf16.mxu1 %v2161_v17 }
  0x38   : > { %2102 = vmatpush3.bf16.msra.mxu1 %v2161_v17 }
  0xeb   : > { %v2037_v21 = vpop.f32.mrb[0].mxu0 }
  0xec   : > { %v641_v22 = vadd.f32 %v2037_v21, %v2399_v19  ;;  %v632_v23 = vpop.f32.mrb[1].mxu0 }
  0xed   : > { %v633_v24 = vadd.f32 %v2399_v19, %v632_v23  ;;  %v2038_v25 = vpop.f32.mrb[2].mxu0 }
  0xee   : > { %v697_v26 = vmax.f32 %v641_v22, 0.0  ;;  %v644_v28 = vadd.f32 %v2038_v25, %v2399_v19  ;;  %v635_v29 = vpop.f32.mrb[3].mxu0  ;;  %v790_v37 = vpop.f32.mrb[0].mxu1 }
  0xef   : > { %v695_v30 = vmax.f32 %v633_v24, 0.0  ;;  %v636_v33 = vadd.f32 %v2399_v19, %v635_v29  ;;  %v791_v42 = vadd.f32 %v2399_v19, %v790_v37  ;;  %v2055_v43 = vpop.f32.mrb[1].mxu1 }
  0xf0   : > { %v713_v35 = vmin.f32 %v697_v26, 6.0  ;;  %v698_v36 = vmax.f32 %v644_v28, 0.0  ;;  %v793_v47 = vpop.f32.mrb[2].mxu1 }
  0xf1   : > { %v711_v40 = vmin.f32 %v695_v30, 6.0  ;;  %v696_v41 = vmax.f32 %v636_v33, 0.0  ;;  %v797_v52 = vmax.f32 %v791_v42, 0.0  ;;  %v794_v53 = vadd.f32 %v2399_v19, %v793_v47  ;;  %v2056_v55 = vpop.f32.mrb[3].mxu1 }
  0xf2   : > { %731 = vst.msk [vmem:[#allocation2 + $0x31] sm:$0xff] %vm728_vm3, %v713_v35  ;;  %v714_v46 = vmin.f32 %v698_v36, 6.0 }
  0xf3   : > { %729 = vst.msk [vmem:[#allocation2 + $0x19] sm:$0xff] %vm728_vm3, %v711_v40  ;;  %v712_v51 = vmin.f32 %v696_v41, 6.0  ;;  %v2041_v54 = vpop.f32.mrb[4].mxu0  ;;  %v799_v61 = vmin.f32 %v797_v52, 6.0  ;;  %v798_v62 = vmax.f32 %v794_v53, 0.0 }
  0xf4   : > { %732 = vst.msk [vmem:[#allocation2 + $0x39] sm:$0xff] %vm728_vm3, %v714_v46  ;;  %v657_v56 = vadd.f32 %v2041_v54, %v2399_v19  ;;  %v648_v57 = vpop.f32.mrb[5].mxu0 }
  0xf5   : > { %730 = vst.msk [vmem:[#allocation2 + $0x21] sm:$0xff] %vm728_vm3, %v712_v51  ;;  %v649_v63 = vadd.f32 %v2399_v19, %v648_v57  ;;  %v2042_v0 = vpop.f32.mrb[6].mxu0  ;;  %v802_v7 = vmul.f32 %v801_v34, %v799_v61  ;;  %v800_v8 = vmin.f32 %v798_v62, 6.0 }
  0xf6   : > { %v701_v2 = vmax.f32 %v657_v56, 0.0  ;;  %v660_v3 = vadd.f32 %v2042_v0, %v2399_v19  ;;  %v651_v4 = vpop.f32.mrb[7].mxu0  ;;  %v850_v13 = vpop.f32.mrb[4].mxu1 }
  0xf7   : > { %v699_v9 = vmax.f32 %v649_v63, 0.0  ;;  %v652_v10 = vadd.f32 %v2399_v19, %v651_v4  ;;  %804 = vst.msk [vmem:[#allocation2 + $0x1] sm:$0xff] %vm728_vm3, %v802_v7  ;;  %v803_v16 = vmul.f32 %v801_v34, %v800_v8  ;;  %v851_v20 = vadd.f32 %v2399_v19, %v850_v13  ;;  %v2061_v21 = vpop.f32.mrb[5].mxu1  ;;  %v2516_v7 = vld [vmem:[%s2979_s5 + $0x8] ss:$0 sm:$0xff] }
  0xf8   : > { %v717_v11 = vmin.f32 %v701_v2, 6.0  ;;  %v702_v12 = vmax.f32 %v660_v3, 0.0  ;;  %v853_v27 = vpop.f32.mrb[6].mxu1 }
  0xf9   : > { %v715_v17 = vmin.f32 %v699_v9, 6.0  ;;  %v700_v18 = vmax.f32 %v652_v10, 0.0  ;;  %v2455_v22 = vld [vmem:[#allocation2 + $0x30] sm:$0xff]  ;;  %805 = vst.msk [vmem:[#allocation2 + $0x9] sm:$0xff] %vm728_vm3, %v803_v16  ;;  %v857_v35 = vmax.f32 %v851_v20, 0.0  ;;  %v2062_v36 = vpop.f32.mrb[7].mxu1  ;;  %v854_v41 = vadd.f32 %v2399_v19, %v853_v27 }
  0xfa   : > { %v2457_v23 = vld [vmem:[#allocation2 + $0x31] sm:$0xff]  ;;  %v944_v25 = vld [vmem:[#allocation2 + $0x19] sm:$0xff]  ;;  %735 = vst.msk [vmem:[#allocation2 + $0x61] sm:$0xff] %vm728_vm3, %v717_v11  ;;  %v718_v26 = vmin.f32 %v702_v12, 6.0  ;;  %v2462_v28 = vmul.f32 %v2445_v5, %v2455_v22  ;;  %v2470_v30 = vmul.f32 %v2455_v22, %v2435_v58 }
  0xfb   : > { %v892_v24 = vld [vmem:[#allocation2 + $0x18] sm:$0xff]  ;;  %v2466_v29 = vmul.f32 %v2447_v6, %v2457_v23  ;;  %v2476_v32 = vmul.f32 %v2426_v50, %v944_v25  ;;  %733 = vst.msk [vmem:[#allocation2 + $0x49] sm:$0xff] %vm728_vm3, %v715_v17  ;;  %v716_v33 = vmin.f32 %v700_v18, 6.0  ;;  %v2045_v34 = vpop.f32.mrb[8].mxu0  ;;  %v2487_v43 = vmul.f32 %v2437_v59, %v944_v25 }
  0xfc   : > { %v2473_v31 = vmul.f32 %v2421_v45, %v892_v24  ;;  %v893_v37 = vld [vmem:[#allocation2 + $0x20] sm:$0xff]  ;;  %736 = vst.msk [vmem:[#allocation2 + $0x69] sm:$0xff] %vm728_vm3, %v718_v26  ;;  %v673_v39 = vadd.f32 %v2045_v34, %v2399_v19  ;;  %v664_v40 = vpop.f32.mrb[9].mxu0  ;;  %v2484_v42 = vmul.f32 %v2435_v58, %v892_v24  ;;  %v859_v51 = vmin.f32 %v857_v35, 6.0  ;;  %v2511_v0 = vld [vmem:[#allocation2 + $0x38] sm:$0xff] }
  0xfd   : > { %v945_v38 = vld [vmem:[#allocation2 + $0x21] sm:$0xff]  ;;  %v2490_v44 = vmul.f32 %v2421_v45, %v893_v37  ;;  %734 = vst.msk [vmem:[#allocation2 + $0x51] sm:$0xff] %vm728_vm3, %v716_v33  ;;  %v665_v48 = vadd.f32 %v2399_v19, %v664_v40  ;;  %v2046_v49 = vpop.f32.mrb[10].mxu0  ;;  %v858_v55 = vmax.f32 %v854_v41, 0.0  ;;  %v2501_v56 = vmul.f32 %v2435_v58, %v893_v37  ;;  %v2525_v17 = vld [vmem:[#allocation2 + $0x39] sm:$0xff] }
  0xfe   : > { %v2493_v46 = vmul.f32 %v2426_v50, %v945_v38  ;;  %v2495_v47 = vld [vmem:[#allocation2 + $0x1a] sm:$0xff]  ;;  %v705_v52 = vmax.f32 %v673_v39, 0.0  ;;  %v676_v53 = vadd.f32 %v2046_v49, %v2399_v19  ;;  %v667_v54 = vpop.f32.mrb[11].mxu0  ;;  %v2503_v57 = vld [vmem:[#allocation2 + $0x22] sm:$0xff]  ;;  %v862_v62 = vmul.f32 %v861_v14, %v859_v51  ;;  %v2527_v18 = vld [vmem:[#allocation2 + $0x32] sm:$0xff] }
  0xff   : > { %v703_v60 = vmax.f32 %v665_v48, 0.0  ;;  %v668_v61 = vadd.f32 %v2399_v19, %v667_v54  ;;  %v2509_v63 = vmul.f32 %v2437_v59, %v945_v38  ;;  %v860_v4 = vmin.f32 %v858_v55, 6.0  ;;  %v890_v8 = vld [vmem:[#allocation2] sm:$0xff] }
 0x100   : > { %v721_v2 = vmin.f32 %v705_v52, 6.0  ;;  %v706_v3 = vmax.f32 %v676_v53, 0.0  ;;  %v942_v9 = vld [vmem:[#allocation2 + $0x1] sm:$0xff]  ;;  %v2520_v10 = vmul.f32 %v2451_v15, %v2495_v47  ;;  %865 = vst.msk [vmem:[#allocation2 + $0xd9] sm:$0xff] %vm728_vm3, %v862_v62  ;;  %v910_v13 = vmul.f32 %v2421_v45, %v890_v8  ;;  %v943_v26 = vld [vmem:[#allocation2 + $0x9] sm:$0xff] }
 0x101   : > { %v719_v11 = vmin.f32 %v703_v60, 6.0  ;;  %v704_v12 = vmax.f32 %v668_v61, 0.0  ;;  %v962_v16 = vmul.f32 %v2426_v50, %v942_v9  ;;  %v2529_v20 = vld [vmem:[#allocation2 + $0x3a] sm:$0xff]  ;;  %v863_v24 = vmul.f32 %v861_v14, %v860_v4  ;;  %v891_v25 = vld [vmem:[#allocation2 + $0x8] sm:$0xff] }
 0x102   : > { %739 = vst.msk [vmem:[#allocation2 + $0x91] sm:$0xff] %vm728_vm3, %v721_v2  ;;  %v722_v21 = vmin.f32 %v706_v3, 6.0  ;;  %v994_v27 = vld [vmem:[#allocation2 + $0x2] sm:$0xff]  ;;  %v1171_v33 = vmul.f32 %v2451_v15, %v2503_v57  ;;  %v2538_v34 = vmul.f32 %v2445_v5, %v2511_v0  ;;  %v911_v37 = vmul.f32 %v2421_v45, %v891_v25  ;;  %v995_v14 = vld [vmem:[#allocation2 + $0xa] sm:$0xff] }
 0x103   : > { %737 = vst.msk [vmem:[#allocation2 + $0x79] sm:$0xff] %vm728_vm3, %v719_v11  ;;  %v720_v35 = vmin.f32 %v704_v12, 6.0  ;;  %v2049_v36 = vpop.f32.mrb[12].mxu0  ;;  %v963_v38 = vmul.f32 %v2426_v50, %v943_v26  ;;  %v978_v39 = vadd.f32 %v962_v16, %v910_v13  ;;  %866 = vst.msk [vmem:[#allocation2 + $0xe1] sm:$0xff] %vm728_vm3, %v863_v24  ;;  %v1014_v48 = vmul.f32 %v2442_v1, %v994_v27 }
 0x104   : > { %740 = vst.msk [vmem:[#allocation2 + $0x99] sm:$0xff] %vm728_vm3, %v722_v21  ;;  %v689_v40 = vadd.f32 %v2049_v36, %v2399_v19  ;;  %v680_v41 = vpop.f32.mrb[13].mxu0  ;;  %v1015_v49 = vmul.f32 %v2442_v1, %v995_v14  ;;  %v1276_v51 = vmul.f32 %v2447_v6, %v2525_v17  ;;  %v1327_v55 = vmul.f32 %v2516_v7, %v2527_v18  ;;  %v2580_v36 = vld [vmem:[#allocation2 + $0x50] sm:$0xff] }
 0x105   : > { %738 = vst.msk [vmem:[#allocation2 + $0x81] sm:$0xff] %vm728_vm3, %v720_v35  ;;  %v681_v52 = vadd.f32 %v2399_v19, %v680_v41  ;;  %v2050_v53 = vpop.f32.mrb[14].mxu0  ;;  %v979_v54 = vadd.f32 %v963_v38, %v911_v37  ;;  %v2556_v60 = vmul.f32 %v2516_v7, %v2529_v20  ;;  %v1030_v3 = vadd.f32 %v1014_v48, %v978_v39  ;;  %v2582_v37 = vld [vmem:[#allocation2 + $0x49] sm:$0xff]  ;;  %v2591_v14 = vld [vmem:[#allocation2 + $0x51] sm:$0xff] }
 0x106   : > { %v709_v61 = vmax.f32 %v689_v40, 0.0  ;;  %v692_v62 = vadd.f32 %v2050_v53, %v2399_v19  ;;  %v683_v2 = vpop.f32.mrb[15].mxu0  ;;  %v980_v4 = vadd.f32 %v2476_v32, %v2473_v31  ;;  %v981_v12 = vadd.f32 %v2493_v46, %v2490_v44  ;;  %v2593_v40 = vld [vmem:[#allocation2 + $0x4a] sm:$0xff] }
 0x107   : > { %v707_v8 = vmax.f32 %v681_v52, 0.0  ;;  %v684_v9 = vadd.f32 %v2399_v19, %v683_v2  ;;  %v1031_v11 = vadd.f32 %v1015_v49, %v979_v54  ;;  %v1082_v21 = vadd.f32 %v2484_v42, %v1030_v3  ;;  %v2574_v42 = vld [vmem:[#allocation2 + $0x48] sm:$0xff] }
 0x108   : > { %v725_v13 = vmin.f32 %v709_v61, 6.0  ;;  %v710_v16 = vmax.f32 %v692_v62, 0.0  ;;  %v1016_v24 = vmul.f32 %v2442_v1, %v2495_v47  ;;  %v1017_v31 = vmul.f32 %v2442_v1, %v2503_v57 }
 0x109   : > { %v723_v25 = vmin.f32 %v707_v8, 6.0  ;;  %v708_v26 = vmax.f32 %v684_v9, 0.0  ;;  %v1083_v27 = vadd.f32 %v2501_v56, %v1031_v11  ;;  %v1134_v32 = vadd.f32 %v2487_v43, %v1082_v21 }
 0x10a   : > { %743 = vst.msk [vmem:[#allocation2 + $0xc1] sm:$0xff] %vm728_vm3, %v725_v13  ;;  %v726_v19 = vmin.f32 %v710_v16, 6.0  ;;  %v1032_v44 = vadd.f32 %v1016_v24, %v980_v4  ;;  %v1069_v46 = vmul.f32 %v2511_v0, %v2435_v58  ;;  %v1033_v56 = vadd.f32 %v1017_v31, %v981_v12 }
 0x10b   : > { %741 = vst.msk [vmem:[#allocation2 + $0xa9] sm:$0xff] %vm728_vm3, %v723_v25  ;;  %v724_v47 = vmin.f32 %v708_v26, 6.0  ;;  %v1135_v35 = vadd.f32 %v2509_v63, %v1083_v27  ;;  %v1120_v57 = vmul.f32 %v2457_v23, %v2437_v59  ;;  %v1186_v43 = vadd.f32 %v2520_v10, %v1134_v32  ;;  %v2600_v10 = vld [vmem:[#allocation2 + $0x52] sm:$0xff] }
 0x10c   : > { %744 = vst.msk [vmem:[#allocation2 + $0xc9] sm:$0xff] %vm728_vm3, %v726_v19  ;;  %v1084_v38 = vadd.f32 %v2470_v30, %v1032_v44  ;;  %v1121_v39 = vmul.f32 %v2525_v17, %v2437_v59  ;;  %v1172_v63 = vmul.f32 %v2527_v18, %v2451_v15  ;;  %v1085_v48 = vadd.f32 %v1069_v46, %v1033_v56 }
 0x10d   : > { %742 = vst.msk [vmem:[#allocation2 + $0xb1] sm:$0xff] %vm728_vm3, %v724_v47  ;;  %v1187_v41 = vadd.f32 %v1171_v33, %v1135_v35  ;;  %v1173_v49 = vmul.f32 %v2529_v20, %v2451_v15  ;;  %v1225_v30 = vmul.f32 %v2445_v5, %v2574_v42  ;;  %v1239_v52 = vadd.f32 %v2462_v28, %v1186_v43  ;;  %v2643_v43 = vld [vmem:[#allocation2 + $0x60] sm:$0xff] }
 0x10e   : > { %v1136_v53 = vadd.f32 %v1120_v57, %v1084_v38  ;;  %v1226_v54 = vmul.f32 %v2445_v5, %v2580_v36  ;;  %v1277_v61 = vmul.f32 %v2447_v6, %v2582_v37  ;;  %v1137_v62 = vadd.f32 %v1121_v39, %v1085_v48  ;;  %v2645_v38 = vld [vmem:[#allocation2 + $0x68] sm:$0xff] }
 0x10f   : > { %v1240_v33 = vadd.f32 %v2538_v34, %v1187_v41  ;;  %v1278_v2 = vmul.f32 %v2447_v6, %v2591_v14  ;;  %v1329_v3 = vmul.f32 %v2516_v7, %v2593_v40  ;;  %v1291_v4 = vadd.f32 %v2466_v29, %v1239_v52 }
 0x110   : > { %v1188_v8 = vadd.f32 %v1172_v63, %v1136_v53  ;;  %v1330_v28 = vmul.f32 %v2516_v7, %v2600_v10  ;;  %v914_v9 = vmul.f32 %v2455_v22, %v2421_v45  ;;  %v1189_v12 = vadd.f32 %v1173_v49, %v1137_v62  ;;  %v2629_v22 = vld [vmem:[%s2980_s6] ss:$0 sm:$0xff]  ;;  %v2650_v49 = vld [vmem:[#allocation2 + $0x61] sm:$0xff] }
 0x111   : > { %v1292_v11 = vadd.f32 %v1276_v51, %v1240_v33  ;;  %v915_v34 = vmul.f32 %v2511_v0, %v2421_v45  ;;  %v966_v13 = vmul.f32 %v2457_v23, %v2426_v50  ;;  %v1343_v16 = vadd.f32 %v1327_v55, %v1291_v4  ;;  %v2657_v33 = vld [vmem:[#allocation2 + $0x62] sm:$0xff] }
 0x112   : > { %v1241_v21 = vadd.f32 %v1225_v30, %v1188_v8  ;;  %v967_v29 = vmul.f32 %v2525_v17, %v2426_v50  ;;  %v1018_v24 = vmul.f32 %v2527_v18, %v2442_v1  ;;  %v1242_v51 = vadd.f32 %v1226_v54, %v1189_v12  ;;  %v2663_v8 = vld [vmem:[#allocation2 + $0x6a] sm:$0xff] }
 0x113   : > { %v1344_v25 = vadd.f32 %v2556_v60, %v1292_v11  ;;  %v982_v0 = vadd.f32 %v966_v13, %v914_v9  ;;  %v1019_v23 = vmul.f32 %v2529_v20, %v2442_v1  ;;  %v1366_v55 = vadd.f32 %v2629_v22, %v1343_v16 }
 0x114   : > { %v1293_v26 = vadd.f32 %v1277_v61, %v1241_v21  ;;  %v983_v27 = vadd.f32 %v967_v29, %v915_v34  ;;  %v1070_v17 = vmul.f32 %v2574_v42, %v2435_v58  ;;  %v1294_v60 = vadd.f32 %v1278_v2, %v1242_v51  ;;  %v2655_v61 = vld [vmem:[#allocation2 + $0x69] sm:$0xff] }
 0x115   : > { %v1367_v18 = vadd.f32 %v2629_v22, %v1344_v25  ;;  %v1034_v31 = vadd.f32 %v1018_v24, %v982_v0  ;;  %v1071_v19 = vmul.f32 %v2580_v36, %v2435_v58  ;;  %v1382_v32 = vmax.f32 %v1366_v55, 0.0  ;;  %v2676_v0 = vld [vmem:[#allocation2 + $0x78] sm:$0xff] }
 0x116   : > { %v1345_v44 = vadd.f32 %v1329_v3, %v1293_v26  ;;  %v1035_v46 = vadd.f32 %v1019_v23, %v983_v27  ;;  %v1122_v20 = vmul.f32 %v2582_v37, %v2437_v59  ;;  %v1346_v35 = vadd.f32 %v1330_v28, %v1294_v60  ;;  %v2688_v60 = vld [vmem:[#allocation2 + $0x81] sm:$0xff] }
 0x117   : > { %v1383_v47 = vmax.f32 %v1367_v18, 0.0  ;;  %v1086_v56 = vadd.f32 %v1070_v17, %v1034_v31  ;;  %v1123_v57 = vmul.f32 %v2591_v14, %v2437_v59  ;;  %v1398_v39 = vmin.f32 %v1382_v32, 6.0  ;;  %v2684_v17 = vld [vmem:[#allocation2 + $0x80] sm:$0xff] }
 0x118   : > { %v1368_v63 = vadd.f32 %v2629_v22, %v1345_v44  ;;  %v1087_v41 = vadd.f32 %v1071_v19, %v1035_v46  ;;  %v1174_v48 = vmul.f32 %v2593_v40, %v2451_v15  ;;  %v1369_v52 = vadd.f32 %v2629_v22, %v1346_v35  ;;  %v2686_v18 = vld [vmem:[#allocation2 + $0x79] sm:$0xff] }
 0x119   : > { %v1399_v30 = vmin.f32 %v1383_v47, 6.0  ;;  %v1138_v53 = vadd.f32 %v1122_v20, %v1086_v56  ;;  %v1175_v54 = vmul.f32 %v2600_v10, %v2451_v15  ;;  %v1227_v3 = vmul.f32 %v2445_v5, %v2643_v43  ;;  %v2694_v46 = vld [vmem:[#allocation2 + $0x7a] sm:$0xff] }
 0x11a   : > { %v1384_v62 = vmax.f32 %v1368_v63, 0.0  ;;  %v1139_v2 = vadd.f32 %v1123_v57, %v1087_v41  ;;  %v1228_v4 = vmul.f32 %v2445_v5, %v2645_v38  ;;  %v1385_v9 = vmax.f32 %v1369_v52, 0.0  ;;  %v2698_v57 = vld [vmem:[#allocation2 + $0x82] sm:$0xff]  ;;  %v2702_v63 = vld [vmem:[#allocation2 + $0x98] sm:$0xff] }
 0x11b   : > { %v1414_v28 = vpack.c.bf16 %v1399_v30, %v1398_v39  ;;  %v1190_v11 = vadd.f32 %v1174_v48, %v1138_v53  ;;  %v1279_v12 = vmul.f32 %v2447_v6, %v2650_v49  ;;  %v1280_v16 = vmul.f32 %v2447_v6, %v2655_v61  ;;  %v2700_v39 = vld [vmem:[#allocation2 + $0x90] sm:$0xff] }
 0x11c   : > { %v1400_v34 = vmin.f32 %v1384_v62, 6.0  ;;  %v1191_v13 = vadd.f32 %v1175_v54, %v1139_v2  ;;  %v1331_v21 = vmul.f32 %v2516_v7, %v2657_v33  ;;  %v1401_v29 = vmin.f32 %v1385_v9, 6.0  ;;  %v2711_v53 = vld [vmem:[#allocation2 + $0x91] sm:$0xff]  ;;  %v2719_v9 = vld [vmem:[#allocation2 + $0x9a] sm:$0xff] }
 0x11d   : > { %2075 = vmatprep.mubr.msk.bf16.mxu0 %vm728_vm3, %v1414_v28  ;;  %v1243_v24 = vadd.f32 %v1227_v3, %v1190_v11  ;;  %v1332_v25 = vmul.f32 %v2516_v7, %v2663_v8  ;;  %v918_v51 = vmul.f32 %v2643_v43, %v2421_v45  ;;  %v919_v55 = vmul.f32 %v2645_v38, %v2421_v45  ;;  %v2717_v28 = vld [vmem:[#allocation2 + $0x92] sm:$0xff] }
 0x11e   : > { %v1244_v23 = vadd.f32 %v1228_v4, %v1191_v13  ;;  %v970_v26 = vmul.f32 %v2650_v49, %v2426_v50  ;;  %v971_v27 = vmul.f32 %v2655_v61, %v2426_v50  ;;  %v1415_v31 = vpack.c.bf16 %v1401_v29, %v1400_v34  ;;  %v2715_v4 = vld [vmem:[#allocation2 + $0x99] sm:$0xff] }
 0x11f   : > { %v1295_v19 = vadd.f32 %v1279_v12, %v1243_v24  ;;  %v1022_v32 = vmul.f32 %v2657_v33, %v2442_v1  ;;  %v1023_v44 = vmul.f32 %v2663_v8, %v2442_v1  ;;  %v1074_v56 = vmul.f32 %v2435_v58, %v2676_v0 }
 0x120   : > { %v1296_v20 = vadd.f32 %v1280_v16, %v1244_v23  ;;  %v986_v47 = vadd.f32 %v970_v26, %v918_v51  ;;  %v987_v35 = vadd.f32 %v971_v27, %v919_v55  ;;  %2076 = vmatmul.mubr.msk.bf16.vlgmr.msra.gmra.mrb[16].mxu0 %vm728_vm3, %v1415_v31  ;;  %v1075_v48 = vmul.f32 %v2435_v58, %v2684_v17 }
 0x121   : > { %v1347_v41 = vadd.f32 %v1331_v21, %v1295_v19  ;;  %v1126_v30 = vmul.f32 %v2437_v59, %v2686_v18  ;;  %v1127_v52 = vmul.f32 %v2437_v59, %v2688_v60  ;;  %v1178_v3 = vmul.f32 %v2451_v15, %v2694_v46 }
 0x122   : > { %v1348_v54 = vadd.f32 %v1332_v25, %v1296_v20  ;;  %v1038_v62 = vadd.f32 %v1022_v32, %v986_v47  ;;  %v1039_v2 = vadd.f32 %v1023_v44, %v987_v35  ;;  %v1179_v12 = vmul.f32 %v2451_v15, %v2698_v57 }
 0x123   : > { %v1370_v11 = vadd.f32 %v2629_v22, %v1347_v41  ;;  %v1231_v34 = vmul.f32 %v2445_v5, %v2700_v39  ;;  %v1232_v13 = vmul.f32 %v2445_v5, %v2702_v63  ;;  %v1283_v24 = vmul.f32 %v2447_v6, %v2711_v53 }
 0x124   : > { %v1371_v16 = vadd.f32 %v2629_v22, %v1348_v54  ;;  %v1090_v21 = vadd.f32 %v1074_v56, %v1038_v62  ;;  %v1091_v29 = vadd.f32 %v1075_v48, %v1039_v2  ;;  %v1284_v51 = vmul.f32 %v2447_v6, %v2715_v4 }
 0x125   : > { %v1386_v25 = vmax.f32 %v1370_v11, 0.0  ;;  %v1335_v23 = vmul.f32 %v2516_v7, %v2717_v28  ;;  %v1336_v55 = vmul.f32 %v2516_v7, %v2719_v9  ;;  %v916_v19 = vmul.f32 %v2574_v42, %v2421_v45 }
 0x126   : > { %v1387_v26 = vmax.f32 %v1371_v16, 0.0  ;;  %v1142_v27 = vadd.f32 %v1126_v30, %v1090_v21  ;;  %v1143_v31 = vadd.f32 %v1127_v52, %v1091_v29  ;;  %v917_v44 = vmul.f32 %v2580_v36, %v2421_v45 }
 0x127   : > { %v1402_v32 = vmin.f32 %v1386_v25, 6.0  ;;  %v968_v20 = vmul.f32 %v2582_v37, %v2426_v50  ;;  %v969_v47 = vmul.f32 %v2591_v14, %v2426_v50  ;;  %v1020_v48 = vmul.f32 %v2593_v40, %v2442_v1 }
 0x128   : > { %v1403_v35 = vmin.f32 %v1387_v26, 6.0  ;;  %v1194_v56 = vadd.f32 %v1178_v3, %v1142_v27  ;;  %v1195_v41 = vadd.f32 %v1179_v12, %v1143_v31  ;;  %v1021_v42 = vmul.f32 %v2600_v10, %v2442_v1 }
 0x129   : > { %v984_v30 = vadd.f32 %v968_v20, %v916_v19  ;;  %v985_v52 = vadd.f32 %v969_v47, %v917_v44  ;;  %v1072_v36 = vmul.f32 %v2643_v43, %v2435_v58  ;;  %v1073_v14 = vmul.f32 %v2645_v38, %v2435_v58 }
 0x12a   : > { %v1416_v54 = vpack.c.bf16 %v1403_v35, %v1402_v32  ;;  %v1247_v62 = vadd.f32 %v1231_v34, %v1194_v56  ;;  %v1248_v37 = vadd.f32 %v1232_v13, %v1195_v41  ;;  %v1124_v11 = vmul.f32 %v2650_v49, %v2437_v59 }
 0x12b   : > { %v1036_v2 = vadd.f32 %v1020_v48, %v984_v30  ;;  %v1037_v3 = vadd.f32 %v1021_v42, %v985_v52  ;;  %v1125_v40 = vmul.f32 %v2655_v61, %v2437_v59  ;;  %v1176_v43 = vmul.f32 %v2657_v33, %v2451_v15 }
 0x12c   : > { %2079 = vmatprep.mubr.msk.bf16.mxu0 %vm728_vm3, %v1416_v54  ;;  %v1299_v10 = vadd.f32 %v1283_v24, %v1247_v62  ;;  %v1300_v12 = vadd.f32 %v1284_v51, %v1248_v37  ;;  %v1177_v34 = vmul.f32 %v2663_v8, %v2451_v15  ;;  %v1229_v16 = vmul.f32 %v2445_v5, %v2676_v0  ;;  %v2794_v37 = vld [vmem:[#allocation2 + $0xb0] sm:$0xff] }
 0x12d   : > { %v1088_v13 = vadd.f32 %v1072_v36, %v1036_v2  ;;  %v1089_v38 = vadd.f32 %v1073_v14, %v1037_v3  ;;  %v1230_v49 = vmul.f32 %v2445_v5, %v2684_v17  ;;  %v1281_v29 = vmul.f32 %v2447_v6, %v2686_v18 }
 0x12e   : > { %v1351_v21 = vadd.f32 %v1335_v23, %v1299_v10  ;;  %v1352_v61 = vadd.f32 %v1336_v55, %v1300_v12  ;;  %v1282_v24 = vmul.f32 %v2447_v6, %v2688_v60  ;;  %v1333_v8 = vmul.f32 %v2516_v7, %v2694_v46 }
 0x12f   : > { %v1140_v33 = vadd.f32 %v1124_v11, %v1088_v13  ;;  %v1141_v25 = vadd.f32 %v1125_v40, %v1089_v38  ;;  %v1334_v51 = vmul.f32 %v2516_v7, %v2698_v57  ;;  %v920_v23 = vmul.f32 %v2676_v0, %v2421_v45  ;;  %v2806_v13 = vld [vmem:[#allocation2 + $0xaa] sm:$0xff]  ;;  %v2808_v38 = vld [vmem:[#allocation2 + $0xb2] sm:$0xff] }
 0x130   : > { %v1374_v26 = vadd.f32 %v2629_v22, %v1351_v21  ;;  %v1375_v27 = vadd.f32 %v2629_v22, %v1352_v61  ;;  %v921_v55 = vmul.f32 %v2684_v17, %v2421_v45  ;;  %v972_v32 = vmul.f32 %v2686_v18, %v2426_v50 }
 0x131   : > { %v1192_v31 = vadd.f32 %v1176_v43, %v1140_v33  ;;  %v1193_v19 = vadd.f32 %v1177_v34, %v1141_v25  ;;  %v973_v44 = vmul.f32 %v2688_v60, %v2426_v50  ;;  %v1024_v35 = vmul.f32 %v2694_v46, %v2442_v1  ;;  %v2792_v46 = vld [vmem:[#allocation2 + $0xa8] sm:$0xff]  ;;  %v2804_v34 = vld [vmem:[#allocation2 + $0xb1] sm:$0xff] }
 0x132   : > { %v1390_v20 = vmax.f32 %v1374_v26, 0.0  ;;  %v1391_v47 = vmax.f32 %v1375_v27, 0.0  ;;  %v1025_v56 = vmul.f32 %v2698_v57, %v2442_v1  ;;  %v988_v48 = vadd.f32 %v972_v32, %v920_v23  ;;  %v2796_v57 = vld [vmem:[#allocation2 + $0xa9] sm:$0xff] }
 0x133   : > { %v1245_v0 = vadd.f32 %v1229_v16, %v1192_v31  ;;  %v1246_v41 = vadd.f32 %v1230_v49, %v1193_v19  ;;  %v989_v17 = vadd.f32 %v973_v44, %v921_v55  ;;  %v1076_v18 = vmul.f32 %v2700_v39, %v2435_v58 }
 0x134   : > { %v1406_v30 = vmin.f32 %v1390_v20, 6.0  ;;  %v1407_v52 = vmin.f32 %v1391_v47, 6.0  ;;  %v1077_v60 = vmul.f32 %v2702_v63, %v2435_v58  ;;  %v1040_v54 = vadd.f32 %v1024_v35, %v988_v48 }
 0x135   : > { %v1297_v42 = vadd.f32 %v1281_v29, %v1245_v0  ;;  %v1298_v36 = vadd.f32 %v1282_v24, %v1246_v41  ;;  %v1041_v62 = vadd.f32 %v1025_v56, %v989_v17  ;;  %v1128_v2 = vmul.f32 %v2711_v53, %v2437_v59 }
 0x136   : > { %v1418_v14 = vpack.c.bf16 %v1407_v52, %v1406_v30  ;;  %v1129_v3 = vmul.f32 %v2715_v4, %v2437_v59  ;;  %v1180_v11 = vmul.f32 %v2717_v28, %v2451_v15  ;;  %v1092_v12 = vadd.f32 %v1076_v18, %v1040_v54  ;;  %v1215_v18 = vld [vmem:[#allocation2 + $0xc0] sm:$0xff] }
 0x137   : > { %v1349_v40 = vadd.f32 %v1333_v8, %v1297_v42  ;;  %v1350_v10 = vadd.f32 %v1334_v51, %v1298_v36  ;;  %v1093_v43 = vadd.f32 %v1077_v60, %v1041_v62  ;;  %v1181_v16 = vmul.f32 %v2719_v9, %v2451_v15  ;;  %v1216_v36 = vld [vmem:[#allocation2 + $0xc8] sm:$0xff] }
 0x138   : > { %2083 = vmatprep.mubr.msk.bf16.mxu1 %vm728_vm3, %v1418_v14  ;;  %v1233_v49 = vmul.f32 %v2445_v5, %v2792_v46  ;;  %v1234_v21 = vmul.f32 %v2445_v5, %v2794_v37  ;;  %v1285_v61 = vmul.f32 %v2447_v6, %v2796_v57  ;;  %v1144_v33 = vadd.f32 %v1128_v2, %v1092_v12  ;;  %v1267_v54 = vld [vmem:[#allocation2 + $0xc1] sm:$0xff] }
 0x139   : > { %v1372_v29 = vadd.f32 %v2629_v22, %v1349_v40  ;;  %v1373_v24 = vadd.f32 %v2629_v22, %v1350_v10  ;;  %v1145_v25 = vadd.f32 %v1129_v3, %v1093_v43  ;;  %v1286_v8 = vmul.f32 %v2447_v6, %v2804_v34  ;;  %v1268_v3 = vld [vmem:[#allocation2 + $0xc9] sm:$0xff] }
 0x13a   : > { %v1337_v51 = vmul.f32 %v2516_v7, %v2806_v13  ;;  %v1338_v26 = vmul.f32 %v2516_v7, %v2808_v38  ;;  %v922_v27 = vmul.f32 %v2700_v39, %v2421_v45  ;;  %v1196_v31 = vadd.f32 %v1180_v11, %v1144_v33  ;;  %v1319_v11 = vld [vmem:[#allocation2 + $0xc2] sm:$0xff] }
 0x13b   : > { %v1388_v23 = vmax.f32 %v1372_v29, 0.0  ;;  %v1389_v55 = vmax.f32 %v1373_v24, 0.0  ;;  %v1197_v19 = vadd.f32 %v1181_v16, %v1145_v25  ;;  %v923_v32 = vmul.f32 %v2702_v63, %v2421_v45 }
 0x13c   : > { %v974_v44 = vmul.f32 %v2711_v53, %v2426_v50  ;;  %v975_v20 = vmul.f32 %v2715_v4, %v2426_v50  ;;  %v1026_v47 = vmul.f32 %v2717_v28, %v2442_v1  ;;  %v1249_v0 = vadd.f32 %v1233_v49, %v1196_v31  ;;  %v1320_v31 = vld [vmem:[#allocation2 + $0xca] sm:$0xff] }
 0x13d   : > { %v1404_v35 = vmin.f32 %v1388_v23, 6.0  ;;  %v1405_v56 = vmin.f32 %v1389_v55, 6.0  ;;  %v1250_v39 = vadd.f32 %v1234_v21, %v1197_v19  ;;  %v1027_v17 = vmul.f32 %v2719_v9, %v2442_v1 }
 0x13e   : > { %v990_v41 = vadd.f32 %v974_v44, %v922_v27  ;;  %v991_v48 = vadd.f32 %v975_v20, %v923_v32  ;;  %v1078_v63 = vmul.f32 %v2792_v46, %v2435_v58  ;;  %v1301_v53 = vadd.f32 %v1285_v61, %v1249_v0 }
 0x13f   : > { %v1417_v30 = vpack.c.bf16 %v1405_v56, %v1404_v35  ;;  %v1302_v52 = vadd.f32 %v1286_v8, %v1250_v39  ;;  %v1079_v4 = vmul.f32 %v2794_v37, %v2435_v58  ;;  %v1130_v42 = vmul.f32 %v2796_v57, %v2437_v59 }
 0x140   : > { %v1042_v28 = vadd.f32 %v1026_v47, %v990_v41  ;;  %v1043_v60 = vadd.f32 %v1027_v17, %v991_v48  ;;  %v1353_v9 = vadd.f32 %v1337_v51, %v1301_v53  ;;  %v1131_v14 = vmul.f32 %v2804_v34, %v2437_v59 }
 0x141   : > { %2080 = vmatmul.mubr.msk.bf16.gmra.mrb[20].mxu0 %vm728_vm3, %v1417_v30  ;;  %v1354_v62 = vadd.f32 %v1338_v26, %v1302_v52  ;;  %v1182_v2 = vmul.f32 %v2806_v13, %v2451_v15  ;;  %v1183_v12 = vmul.f32 %v2808_v38, %v2451_v15  ;;  %v1235_v43 = vmul.f32 %v2445_v5, %v1215_v18 }
 0x142   : > { %v1094_v40 = vadd.f32 %v1078_v63, %v1042_v28  ;;  %v1095_v10 = vadd.f32 %v1079_v4, %v1043_v60  ;;  %v1376_v16 = vadd.f32 %v2629_v22, %v1353_v9  ;;  %v1236_v21 = vmul.f32 %v2445_v5, %v1216_v36  ;;  %v1217_v63 = vld [vmem:[#allocation2 + $0xd8] sm:$0xff]  ;;  %v1218_v4 = vld [vmem:[#allocation2 + $0xe0] sm:$0xff] }
 0x143   : > { %v1377_v49 = vadd.f32 %v2629_v22, %v1354_v62  ;;  %v1287_v61 = vmul.f32 %v2447_v6, %v1267_v54  ;;  %v1288_v33 = vmul.f32 %v2447_v6, %v1268_v3  ;;  %v1339_v25 = vmul.f32 %v2516_v7, %v1319_v11  ;;  %v1270_v62 = vld [vmem:[#allocation2 + $0xe1] sm:$0xff] }
 0x144   : > { %v1146_v29 = vadd.f32 %v1130_v42, %v1094_v40  ;;  %v1147_v24 = vadd.f32 %v1131_v14, %v1095_v10  ;;  %v1392_v8 = vmax.f32 %v1376_v16, 0.0  ;;  %v924_v26 = vmul.f32 %v2792_v46, %v2421_v45  ;;  %v1321_v10 = vld [vmem:[#allocation2 + $0xda] sm:$0xff] }
 0x145   : > { %v1393_v51 = vmax.f32 %v1377_v49, 0.0  ;;  %v925_v27 = vmul.f32 %v2794_v37, %v2421_v45  ;;  %v976_v19 = vmul.f32 %v2796_v57, %v2426_v50  ;;  %v977_v32 = vmul.f32 %v2804_v34, %v2426_v50 }
 0x146   : > { %v1198_v23 = vadd.f32 %v1182_v2, %v1146_v29  ;;  %v1199_v55 = vadd.f32 %v1183_v12, %v1147_v24  ;;  %v1408_v44 = vmin.f32 %v1392_v8, 6.0  ;;  %v1028_v47 = vmul.f32 %v2806_v13, %v2442_v1  ;;  %v1322_v12 = vld [vmem:[#allocation2 + $0xe2] sm:$0xff] }
 0x147   : > { %v1409_v20 = vmin.f32 %v1393_v51, 6.0  ;;  %v1029_v46 = vmul.f32 %v2808_v38, %v2442_v1  ;;  %v992_v45 = vadd.f32 %v976_v19, %v924_v26  ;;  %v993_v37 = vadd.f32 %v977_v32, %v925_v27  ;;  %v1999_v19 = vld [vmem:[%s2307_s28 + $0x8] sm:$0xff]   ;;  %v1968_v32 = vld [vmem:[%s2307_s28] sm:$0xff]  }
 0x148   : > { %v1251_v35 = vadd.f32 %v1235_v43, %v1198_v23  ;;  %v1252_v56 = vadd.f32 %v1236_v21, %v1199_v55  ;;  %v1340_v39 = vmul.f32 %v2516_v7, %v1320_v31  ;;  %v1080_v57 = vmul.f32 %v1215_v18, %v2435_v58 }
 0x149   : > { %v1419_v0 = vpack.c.bf16 %v1409_v20, %v1408_v44  ;;  %v1081_v41 = vmul.f32 %v1216_v36, %v2435_v58  ;;  %v1044_v48 = vadd.f32 %v1028_v47, %v992_v45  ;;  %v1045_v17 = vadd.f32 %v1029_v46, %v993_v37 }
 0x14a   : > { %v1303_v50 = vadd.f32 %v1287_v61, %v1251_v35  ;;  %v1304_v34 = vadd.f32 %v1288_v33, %v1252_v56  ;;  %v1132_v1 = vmul.f32 %v1267_v54, %v2437_v59  ;;  %v1133_v13 = vmul.f32 %v1268_v3, %v2437_v59  ;;  %v1269_v54 = vld [vmem:[#allocation2 + $0xd9] sm:$0xff] }
 0x14b   : > { %2084 = vmatmul.mubr.msk.bf16.vlgmr.msra.gmra.mrb[8].mxu1 %vm728_vm3, %v1419_v0  ;;  %v1096_v53 = vadd.f32 %v1080_v57, %v1044_v48  ;;  %v1097_v52 = vadd.f32 %v1081_v41, %v1045_v17  ;;  %v1184_v18 = vmul.f32 %v1319_v11, %v2451_v15  ;;  %v1185_v58 = vmul.f32 %v1320_v31, %v2451_v15 }
 0x14c   : > { %v1355_v38 = vadd.f32 %v1339_v25, %v1303_v50  ;;  %v1356_v30 = vadd.f32 %v1340_v39, %v1304_v34  ;;  %v1237_v28 = vmul.f32 %v2445_v5, %v1217_v63  ;;  %v1238_v59 = vmul.f32 %v2445_v5, %v1218_v4 }
 0x14d   : > { %v1148_v36 = vadd.f32 %v1132_v1, %v1096_v53  ;;  %v1149_v9 = vadd.f32 %v1133_v13, %v1097_v52  ;;  %v1289_v11 = vmul.f32 %v2447_v6, %v1269_v54  ;;  %v1290_v15 = vmul.f32 %v2447_v6, %v1270_v62 }
 0x14e   : > { %v1378_v60 = vadd.f32 %v2629_v22, %v1355_v38  ;;  %v1379_v42 = vadd.f32 %v2629_v22, %v1356_v30  ;;  %v1341_v61 = vmul.f32 %v2516_v7, %v1321_v10  ;;  %v1342_v33 = vmul.f32 %v2516_v7, %v1322_v12  ;;  %v2896_v7 = vld [vmem:[%s2982_s8] ss:$0 sm:$0xff]  ;;  %v2001_v38 = vld [vmem:[%s2307_s28 + $0x18] sm:$0xff]   ;;  %v2000_v30 = vld [vmem:[%s2307_s28 + $0x10] sm:$0xff]  }
 0x14f   : > { %v1200_v3 = vadd.f32 %v1184_v18, %v1148_v36  ;;  %v1201_v40 = vadd.f32 %v1185_v58, %v1149_v9  ;;  %v1973_v44 = vunpack.c.l.bf16 %v1999_v19  ;;  %v1969_v47 = vunpack.c.l.bf16 %v1968_v32  ;;  %v2003_v10 = vld [vmem:[%s2307_s28 + $0x28] sm:$0xff]   ;;  %v2002_v12 = vld [vmem:[%s2307_s28 + $0x20] sm:$0xff]  }
 0x150   : > { %v1394_v14 = vmax.f32 %v1378_v60, 0.0  ;;  %v1395_v2 = vmax.f32 %v1379_v42, 0.0  ;;  %v1974_v35 = vunpack.c.h.bf16 %v1999_v19  ;;  %v1970_v37 = vunpack.c.h.bf16 %v1968_v32 }
 0x151   : > { %v1253_v49 = vadd.f32 %v1237_v28, %v1200_v3  ;;  %v1254_v21 = vadd.f32 %v1238_v59, %v1201_v40  ;;  %v1981_v53 = vunpack.c.l.bf16 %v2001_v38  ;;  %v1977_v4 = vunpack.c.l.bf16 %v2000_v30 }
 0x152   : > { %v1410_v43 = vmin.f32 %v1394_v14, 6.0  ;;  %v1411_v16 = vmin.f32 %v1395_v2, 6.0  ;;  %v1982_v28 = vunpack.c.h.bf16 %v2001_v38  ;;  %v1978_v36 = vunpack.c.h.bf16 %v2000_v30 }
 0x153   : > { %v1305_v5 = vadd.f32 %v1289_v11, %v1253_v49  ;;  %v1306_v24 = vadd.f32 %v1290_v15, %v1254_v21  ;;  %v1985_v21 = vunpack.c.l.bf16 %v2002_v12 }
 0x154   : > { %v1420_v29 = vpack.c.bf16 %v1411_v16, %v1410_v43  ;;  %v1989_v16 = vunpack.c.l.bf16 %v2003_v10 }
 0x155   : > { %v1357_v25 = vadd.f32 %v1341_v61, %v1305_v5  ;;  %v1358_v8 = vadd.f32 %v1342_v33, %v1306_v24  ;;  %v1990_v5 = vunpack.c.h.bf16 %v2003_v10 }
 0x156   : > { %2087 = vmatprep.mubr.msk.bf16.mxu1 %vm728_vm3, %v1420_v29 }
 0x157   : > { %v1380_v6 = vadd.f32 %v2629_v22, %v1357_v25  ;;  %v1381_v51 = vadd.f32 %v2629_v22, %v1358_v8  ;;  %v1986_v25 = vunpack.c.h.bf16 %v2002_v12 }
 0x159   : > { %v1396_v26 = vmax.f32 %v1380_v6, 0.0  ;;  %v1397_v27 = vmax.f32 %v1381_v51, 0.0 }
 0x15b   : > { %v1412_v23 = vmin.f32 %v1396_v26, 6.0  ;;  %v1413_v55 = vmin.f32 %v1397_v27, 6.0 }
 0x15d   : > { %v1421_v31 = vpack.c.bf16 %v1413_v55, %v1412_v23 }
 0x15f   : > { %2088 = vmatmul.mubr.msk.bf16.gmra.mrb[12].mxu1 %vm728_vm3, %v1421_v31 }
 0x1f3   : > { %v2077_v20 = vpop.f32.mrb[16].mxu0 }
 0x1f4   : > { %v1544_v22 = vadd.f32 %v2077_v20, %v2896_v7  ;;  %v1535_v46 = vpop.f32.mrb[17].mxu0  ;;  %v2005_v20 = vld [vmem:[%s2307_s28 + $0x38] sm:$0xff]  }
 0x1f5   : > { %v1536_v56 = vadd.f32 %v2896_v7, %v1535_v46  ;;  %v2078_v45 = vpop.f32.mrb[18].mxu0 }
 0x1f6   : > { %v1632_v0 = vadd.f32 %v1973_v44, %v1544_v22  ;;  %v1547_v39 = vadd.f32 %v2078_v45, %v2896_v7  ;;  %v1538_v57 = vpop.f32.mrb[19].mxu0  ;;  %v1997_v22 = vunpack.c.l.bf16 %v2005_v20 }
 0x1f7   : > { %v1630_v41 = vadd.f32 %v1969_v47, %v1536_v56  ;;  %v1539_v50 = vadd.f32 %v2896_v7, %v1538_v57  ;;  %v2004_v47 = vld [vmem:[%s2307_s28 + $0x30] sm:$0xff]  }
 0x1f8   : > { %v1953_v34 = vpack.c.bf16 %v1632_v0, %v1632_v0  ;;  %v1633_v48 = vadd.f32 %v1974_v35, %v1547_v39  ;;  %v1993_v35 = vunpack.c.l.bf16 %v2004_v47  ;;  %v1994_v57 = vunpack.c.h.bf16 %v2004_v47 }
 0x1f9   : > { %v1951_v17 = vpack.c.bf16 %v1630_v41, %v1630_v41  ;;  %v1631_v63 = vadd.f32 %v1970_v37, %v1539_v50  ;;  %v1998_v37 = vunpack.c.h.bf16 %v2005_v20 }
 0x1fa   : > { %1713 = vst.msk [vmem:[%s2906_s16 + $0x8] sm:$0xf] %vm1710_vm4, %v1953_v34  ;;  %v1954_v1 = vpack.c.bf16 %v1633_v48, %v1633_v48 }
 0x1fb   : > { %1711 = vst.msk [vmem:[%s2906_s16] sm:$0xf] %vm1710_vm4, %v1951_v17  ;;  %v1952_v13 = vpack.c.bf16 %v1631_v63, %v1631_v63 }
 0x1fc   : > { %1714 = vst.msk [vmem:[%s2906_s16 + $0xc] sm:$0xf] %vm1710_vm4, %v1954_v1 }
 0x1fd   : > { %1712 = vst.msk [vmem:[%s2906_s16 + $0x4] sm:$0xf] %vm1710_vm4, %v1952_v13 }
 0x214   : > { %v2081_v52 = vpop.f32.mrb[20].mxu0 }
 0x215   : > { %v1560_v18 = vadd.f32 %v2081_v52, %v2896_v7  ;;  %v1551_v58 = vpop.f32.mrb[21].mxu0 }
 0x216   : > { %v1552_v60 = vadd.f32 %v2896_v7, %v1551_v58  ;;  %v2082_v42 = vpop.f32.mrb[22].mxu0 }
 0x217   : > { %v1636_v9 = vadd.f32 %v1981_v53, %v1560_v18  ;;  %v1563_v54 = vadd.f32 %v2082_v42, %v2896_v7  ;;  %v1554_v62 = vpop.f32.mrb[23].mxu0 }
 0x218   : > { %v1634_v59 = vadd.f32 %v1977_v4, %v1552_v60  ;;  %v1555_v14 = vadd.f32 %v2896_v7, %v1554_v62 }
 0x219   : > { %v1957_v2 = vpack.c.bf16 %v1636_v9, %v1636_v9  ;;  %v1637_v3 = vadd.f32 %v1982_v28, %v1563_v54 }
 0x21a   : > { %v1955_v40 = vpack.c.bf16 %v1634_v59, %v1634_v59  ;;  %v1635_v11 = vadd.f32 %v1978_v36, %v1555_v14 }
 0x21b   : > { %1717 = vst.msk [vmem:[%s2906_s16 + $0x18] sm:$0xf] %vm1710_vm4, %v1957_v2  ;;  %v1958_v15 = vpack.c.bf16 %v1637_v3, %v1637_v3 }
 0x21c   : > { %1715 = vst.msk [vmem:[%s2906_s16 + $0x10] sm:$0xf] %vm1710_vm4, %v1955_v40  ;;  %v1956_v43 = vpack.c.bf16 %v1635_v11, %v1635_v11 }
 0x21d   : > { %1718 = vst.msk [vmem:[%s2906_s16 + $0x1c] sm:$0xf] %vm1710_vm4, %v1958_v15 }
 0x21e   : > { %v2085_v49 = vpop.f32.mrb[8].mxu1  ;;  %1716 = vst.msk [vmem:[%s2906_s16 + $0x14] sm:$0xf] %vm1710_vm4, %v1956_v43 }
 0x21f   : > { %v1576_v61 = vadd.f32 %v2085_v49, %v2896_v7  ;;  %v1567_v29 = vpop.f32.mrb[9].mxu1 }
 0x220   : > { %v1568_v24 = vadd.f32 %v2896_v7, %v1567_v29  ;;  %v2086_v33 = vpop.f32.mrb[10].mxu1 }
 0x221   : > { %v1640_v8 = vadd.f32 %v1989_v16, %v1576_v61  ;;  %v1579_v6 = vadd.f32 %v2086_v33, %v2896_v7  ;;  %v1570_v51 = vpop.f32.mrb[11].mxu1 }
 0x222   : > { %v1638_v26 = vadd.f32 %v1985_v21, %v1568_v24  ;;  %v1571_v27 = vadd.f32 %v2896_v7, %v1570_v51 }
 0x223   : > { %v1961_v23 = vpack.c.bf16 %v1640_v8, %v1640_v8  ;;  %v1641_v55 = vadd.f32 %v1990_v5, %v1579_v6 }
 0x224   : > { %v1959_v31 = vpack.c.bf16 %v1638_v26, %v1638_v26  ;;  %v1639_v19 = vadd.f32 %v1986_v25, %v1571_v27 }
 0x225   : > { %1721 = vst.msk [vmem:[%s2906_s16 + $0x28] sm:$0xf] %vm1710_vm4, %v1961_v23  ;;  %v1962_v32 = vpack.c.bf16 %v1641_v55, %v1641_v55 }
 0x226   : > { %1719 = vst.msk [vmem:[%s2906_s16 + $0x20] sm:$0xf] %vm1710_vm4, %v1959_v31  ;;  %v1960_v44 = vpack.c.bf16 %v1639_v19, %v1639_v19 }
 0x227   : > { %1722 = vst.msk [vmem:[%s2906_s16 + $0x2c] sm:$0xf] %vm1710_vm4, %v1962_v32 }
 0x228   : > { %1720 = vst.msk [vmem:[%s2906_s16 + $0x24] sm:$0xf] %vm1710_vm4, %v1960_v44 }
 0x232   : > { %v2089_v46 = vpop.f32.mrb[12].mxu1 }
 0x233   : > { %v1592_v56 = vadd.f32 %v2089_v46, %v2896_v7  ;;  %v1583_v45 = vpop.f32.mrb[13].mxu1 }
 0x234   : > { %v1584_v0 = vadd.f32 %v2896_v7, %v1583_v45  ;;  %v2090_v39 = vpop.f32.mrb[14].mxu1 }
 0x235   : > { %v1644_v41 = vadd.f32 %v1997_v22, %v1592_v56  ;;  %v1595_v50 = vadd.f32 %v2090_v39, %v2896_v7  ;;  %v1586_v34 = vpop.f32.mrb[15].mxu1 }
 0x236   : > { %v1642_v48 = vadd.f32 %v1993_v35, %v1584_v0  ;;  %v1587_v17 = vadd.f32 %v2896_v7, %v1586_v34 }
 0x237   : > { %v1965_v63 = vpack.c.bf16 %v1644_v41, %v1644_v41  ;;  %v1645_v1 = vadd.f32 %v1998_v37, %v1595_v50 }
 0x238   : > { %v1963_v13 = vpack.c.bf16 %v1642_v48, %v1642_v48  ;;  %v1643_v38 = vadd.f32 %v1994_v57, %v1587_v17 }
 0x239   : > { %1725 = vst.msk [vmem:[%s2906_s16 + $0x38] sm:$0xf] %vm1710_vm4, %v1965_v63  ;;  %v1966_v30 = vpack.c.bf16 %v1645_v1, %v1645_v1 }
 0x23a   : > { %1723 = vst.msk [vmem:[%s2906_s16 + $0x30] sm:$0xf] %vm1710_vm4, %v1963_v13  ;;  %v1964_v53 = vpack.c.bf16 %v1643_v38, %v1643_v38 }
 0x23b   : > { %1726 = vst.msk [vmem:[%s2906_s16 + $0x3c] sm:$0xf] %vm1710_vm4, %v1966_v30 }
 0x23c   : > { %1724 = vst.msk [vmem:[%s2906_s16 + $0x34] sm:$0xf] %vm1710_vm4, %v1964_v53 }
 0x23d PF: > { %s19_s13 = sadd.s32 1, %s2200_s13   ;;  %s2984_s30 = smov %s2192_s11 }
 0x23e   : > { %p16_p13 = scmp.ge.s32.totalorder %s19_s13, 6   ;;  %s2985_s10 = smov %s2196_s12 }
 0x23f   : > { %s2986_s11 = smov %s2989_s14  ;;  %s2987_s12 = smov %s2993_s15 }
 0x240   :  { %18 = sbr.rel (!%p16_p13) target bundleno = 3 (0x3), region = 96 }

// kernel: block4_forward.17
= control target key start
LH: loop header
LB: loop body
LE: loop exit
PB: predicated region body
PF: predicated region fallthrough
CT: control target
= control target key end

     0   :  { %s3224_s24 = smov 0   ;;  %s3570_s0 = inlined_call_operand.vmem [shape: bf16[512,16], index: 0, kind: input, shape index: {}]   ;;  %s3571_s1 = inlined_call_operand.vmem [shape: bf16[512,16], index: 1, kind: input, shape index: {}]   ;;  %s3572_s2 = inlined_call_operand.vmem [shape: bf16[512,16], index: 2, kind: input, shape index: {}]   ;;  %s3573_s3 = inlined_call_operand.vmem [shape: bf16[512,16], index: 3, kind: input, shape index: {}]   ;;  %s3574_s4 = inlined_call_operand.vmem [shape: bf16[512,16], index: 4, kind: input, shape index: {}]   ;;  %s3575_s5 = inlined_call_operand.vmem [shape: bf16[5,16,16], index: 5, kind: input, shape index: {}]   ;;  %s3576_s6 = inlined_call_operand.vmem [shape: f32[1,16], index: 6, kind: input, shape index: {}]   ;;  %s3577_s7 = inlined_call_operand.vmem [shape: bf16[512,16], index: 7, kind: output, shape index: {}]  }
   0x1 LB: > { %s2449_s25 = sadd.s32 4294967295, %s3182_s24   ;;  %p2453_p0 = scmp.ge.s32.totalorder %s3182_s24, 1  ;;  %s3182_s24 = sphi %s3224_s24, %s17_s24  }
   0x2   : > { %p282_p1 = scmp.lt.s32.totalorder %s3182_s24, 3 }
   0x4   : > { %p283_p2 = pnand %p2453_p0, %p282_p1 }
   0x5   : > { %v3091_v0 = vld [vmem:[%s3575_s5 + $0x8] sm:$0xff] (!%p283_p2)   ;;  %s2454_s28 = sshll.u32 (!%p283_p2), %s2449_s25, 5  ;;  %v3238_v1 = vld [vmem:[%s3575_s5 + $0x10] sm:$0xff] (!%p283_p2)   ;;  %v3094_v2 = vld [vmem:[%s3575_s5] sm:$0xff] (!%p283_p2)   ;;  %vm531_vm0 = vcmask (!%p283_p2), 130048   ;;  %vm2312_vm1 = vcmask (!%p283_p2), 125952  }
   0x6   : > { %286 = sbr.rel (%p283_p2) target bundleno = 395 (0x18b), region = 48  ;;  %p335_p3 = scmp.lt.s32.totalorder (!%p283_p2), %s2454_s28, 63  ;;  %2783 = vmatprep.subr.bf16.mxu1 (!%p283_p2), %v3091_v0  ;;  %2851 = vmatprep.subr.bf16.mxu0 (!%p283_p2), %v3238_v1  ;;  %v3096_v3 = vld [vmem:[%s3575_s5 + $0x18] sm:$0xff] (!%p283_p2)   ;;  %v3113_v6 = vld [vmem:[%s3575_s5 + $0x20] sm:$0xff] (!%p283_p2)  }
   0x7   : > { %2784 = vmatpush3.bf16.msra.mxu1 (!%p283_p2), %v3091_v0  ;;  %2852 = vmatpush3.bf16.msra.mxu0 (!%p283_p2), %v3238_v1 }
   0x8   : > { %2817 = vmatprep.subr.bf16.mxu1 (!%p283_p2), %v3094_v2  ;;  %2885 = vmatprep.subr.bf16.mxu0 (!%p283_p2), %v3096_v3 }
   0xd   : > { %s3579_s28 = smov (!%p335_p3, %s2454_s28), 63 }
   0xe   : > { %s3248_s12 = sshll.u32 %s3579_s28, 2 }
   0xf   : > { %s3254_s15 = scalar_lea.vmem %s3571_s1, %s3248_s12  ;;  %s3260_s18 = scalar_lea.vmem %s3572_s2, %s3248_s12 }
  0x10   : > { %v3093_v4 = vld [vmem:[%s3254_s15] sm:$0xff]   ;;  %v3097_v7 = vld [vmem:[%s3254_s15 + $0x8] sm:$0xff]   ;;  %v3099_v9 = vld [vmem:[%s3254_s15 + $0x10] sm:$0xff]   ;;  %s3292_s23 = scalar_lea.vmem %s3573_s3, %s3248_s12  ;;  %s3313_s27 = scalar_lea.vmem %s3570_s0, %s3248_s12 }
  0x11   : > { %v3095_v5 = vld [vmem:[%s3260_s18] sm:$0xff]   ;;  %2785 = vmatprep.mubr.msk.bf16.mxu1 %vm531_vm0, %v3093_v4  ;;  %v3098_v8 = vld [vmem:[%s3260_s18 + $0x8] sm:$0xff]   ;;  %v3100_v10 = vld [vmem:[%s3260_s18 + $0x10] sm:$0xff]   ;;  %s3336_s30 = scalar_lea.vmem %s3574_s4, %s3248_s12  ;;  %s3467_s13 = scalar_lea.vmem %s3577_s7, %s3248_s12 }
  0x12   : > { %2853 = vmatprep.mubr.msk.bf16.mxu0 %vm531_vm0, %v3095_v5  ;;  %2786 = vmatmul.mubr.msk.bf16.vlgmr.msra.gmra.mrb[0].mxu1 %vm531_vm0, %v3097_v7  ;;  %v3101_v11 = vld [vmem:[%s3254_s15 + $0x18] sm:$0xff]   ;;  %v3103_v13 = vld [vmem:[%s3254_s15 + $0x20] sm:$0xff]   ;;  %v3105_v15 = vld [vmem:[%s3254_s15 + $0x28] sm:$0xff]  }
  0x13   : > { %2818 = vmatpush3.bf16.msra.mxu1 %v3094_v2  ;;  %2854 = vmatmul.mubr.msk.bf16.vlgmr.msra.gmra.mrb[0].mxu0 %vm531_vm0, %v3098_v8  ;;  %v3102_v12 = vld [vmem:[%s3260_s18 + $0x18] sm:$0xff]   ;;  %v3104_v14 = vld [vmem:[%s3260_s18 + $0x20] sm:$0xff]   ;;  %v3106_v16 = vld [vmem:[%s3260_s18 + $0x28] sm:$0xff]  }
  0x14   : > { %2886 = vmatpush3.bf16.msra.mxu0 %v3096_v3  ;;  %2789 = vmatprep.mubr.msk.bf16.mxu1 %vm531_vm0, %v3099_v9  ;;  %v3107_v17 = vld [vmem:[%s3254_s15 + $0x30] sm:$0xff]   ;;  %v3109_v19 = vld [vmem:[%s3254_s15 + $0x38] sm:$0xff]   ;;  %v3111_v21 = vld [vmem:[%s3254_s15 + $0x40] sm:$0xff]  }
  0x15   : > { %2857 = vmatprep.mubr.msk.bf16.mxu0 %vm531_vm0, %v3100_v10  ;;  %2919 = vmatprep.subr.bf16.mxu0 %v3113_v6  ;;  %v3108_v18 = vld [vmem:[%s3260_s18 + $0x30] sm:$0xff]   ;;  %v3110_v20 = vld [vmem:[%s3260_s18 + $0x38] sm:$0xff]   ;;  %v3112_v22 = vld [vmem:[%s3292_s23] sm:$0xff]  }
  0x16   : > { %2953 = vmatprep.subr.bf16.mxu1 %v3238_v1  ;;  %v3114_v23 = vld [vmem:[%s3254_s15 + $0x48] sm:$0xff]   ;;  %v3116_v25 = vld [vmem:[%s3254_s15 + $0x50] sm:$0xff]   ;;  %v3118_v27 = vld [vmem:[%s3254_s15 + $0x58] sm:$0xff]  }
  0x17   : > { %v3115_v24 = vld [vmem:[%s3292_s23 + $0x8] sm:$0xff]   ;;  %v3117_v26 = vld [vmem:[%s3292_s23 + $0x10] sm:$0xff]   ;;  %v3119_v28 = vld [vmem:[%s3292_s23 + $0x18] sm:$0xff]  }
  0x18   : > { %v3120_v29 = vld [vmem:[%s3254_s15 + $0x60] sm:$0xff]   ;;  %v3122_v31 = vld [vmem:[%s3254_s15 + $0x68] sm:$0xff]   ;;  %v3124_v33 = vld [vmem:[%s3254_s15 + $0x70] sm:$0xff]  }
  0x19   : > { %v3121_v30 = vld [vmem:[%s3292_s23 + $0x20] sm:$0xff]   ;;  %v3123_v32 = vld [vmem:[%s3292_s23 + $0x28] sm:$0xff]   ;;  %v3125_v34 = vld [vmem:[%s3292_s23 + $0x30] sm:$0xff]  }
  0x1a   : > { %2790 = vmatmul.mubr.msk.bf16.gmra.mrb[4].mxu1 %vm531_vm0, %v3101_v11  ;;  %v3126_v35 = vld [vmem:[%s3254_s15 + $0x78] sm:$0xff]   ;;  %v3128_v37 = vld [vmem:[%s3313_s27] sm:$0xff]   ;;  %v3130_v39 = vld [vmem:[%s3313_s27 + $0x8] sm:$0xff]  }
  0x1b   : > { %2858 = vmatmul.mubr.msk.bf16.gmra.mrb[4].mxu0 %vm531_vm0, %v3102_v12  ;;  %2793 = vmatprep.mubr.msk.bf16.mxu1 %vm531_vm0, %v3103_v13  ;;  %v3127_v36 = vld [vmem:[%s3292_s23 + $0x38] sm:$0xff]   ;;  %v3129_v38 = vld [vmem:[%s3292_s23 + $0x40] sm:$0xff]   ;;  %v3131_v40 = vld [vmem:[%s3292_s23 + $0x48] sm:$0xff]  }
  0x1c   : > { %2861 = vmatprep.mubr.msk.bf16.mxu0 %vm531_vm0, %v3104_v14  ;;  %v3132_v41 = vld [vmem:[%s3313_s27 + $0x10] sm:$0xff]   ;;  %v3134_v43 = vld [vmem:[%s3313_s27 + $0x18] sm:$0xff]   ;;  %v3136_v45 = vld [vmem:[%s3313_s27 + $0x20] sm:$0xff]  }
  0x1d   : > { %v3133_v42 = vld [vmem:[%s3292_s23 + $0x50] sm:$0xff]   ;;  %v3135_v44 = vld [vmem:[%s3292_s23 + $0x58] sm:$0xff]   ;;  %v3137_v46 = vld [vmem:[%s3292_s23 + $0x60] sm:$0xff]  }
  0x1e   : > { %v3138_v47 = vld [vmem:[%s3313_s27 + $0x28] sm:$0xff]   ;;  %v3140_v49 = vld [vmem:[%s3313_s27 + $0x30] sm:$0xff]   ;;  %v3142_v51 = vld [vmem:[%s3313_s27 + $0x38] sm:$0xff]  }
  0x1f   : > { %v3139_v48 = vld [vmem:[%s3292_s23 + $0x68] sm:$0xff]   ;;  %v3141_v50 = vld [vmem:[%s3292_s23 + $0x70] sm:$0xff]   ;;  %v3143_v52 = vld [vmem:[%s3292_s23 + $0x78] sm:$0xff]  }
  0x20   : > { %v3144_v53 = vld [vmem:[%s3313_s27 + $0x40] sm:$0xff]   ;;  %v3146_v55 = vld [vmem:[%s3313_s27 + $0x48] sm:$0xff]   ;;  %v3148_v57 = vld [vmem:[%s3313_s27 + $0x50] sm:$0xff]  }
  0x21   : > { %v3145_v54 = vld [vmem:[%s3336_s30] sm:$0xff]   ;;  %v3147_v56 = vld [vmem:[%s3336_s30 + $0x8] sm:$0xff]   ;;  %v3149_v58 = vld [vmem:[%s3336_s30 + $0x10] sm:$0xff]  }
  0x22   : > { %2794 = vmatmul.mubr.msk.bf16.gmra.mrb[8].mxu1 %vm531_vm0, %v3105_v15  ;;  %v3150_v59 = vld [vmem:[%s3313_s27 + $0x58] sm:$0xff]   ;;  %v3152_v61 = vld [vmem:[%s3313_s27 + $0x60] sm:$0xff]   ;;  %v3154_v63 = vld [vmem:[%s3313_s27 + $0x68] sm:$0xff]  }
  0x23   : > { %2862 = vmatmul.mubr.msk.bf16.gmra.mrb[8].mxu0 %vm531_vm0, %v3106_v16  ;;  %2797 = vmatprep.mubr.msk.bf16.mxu1 %vm531_vm0, %v3107_v17  ;;  %v3151_v60 = vld [vmem:[%s3336_s30 + $0x18] sm:$0xff]   ;;  %v3153_v62 = vld [vmem:[%s3336_s30 + $0x20] sm:$0xff]   ;;  %v3155_v0 = vld [vmem:[%s3336_s30 + $0x28] sm:$0xff]  }
  0x24   : > { %2865 = vmatprep.mubr.msk.bf16.mxu0 %vm531_vm0, %v3108_v18  ;;  %v3157_v2 = vld [vmem:[%s3336_s30 + $0x30] sm:$0xff]   ;;  %v3158_v3 = vld [vmem:[%s3313_s27 + $0x78] sm:$0xff]   ;;  %v3160_v5 = vld [vmem:[%s3260_s18 + $0x40] sm:$0xff]  }
  0x25   : > { %v3159_v4 = vld [vmem:[%s3336_s30 + $0x38] sm:$0xff]   ;;  %v3162_v7 = vld [vmem:[%s3260_s18 + $0x48] sm:$0xff]   ;;  %v3164_v9 = vld [vmem:[%s3260_s18 + $0x50] sm:$0xff]  }
  0x26   : > { %v3163_v8 = vld [vmem:[%s3336_s30 + $0x48] sm:$0xff]   ;;  %v3165_v10 = vld [vmem:[%s3336_s30 + $0x50] sm:$0xff]   ;;  %v3166_v11 = vld [vmem:[%s3260_s18 + $0x58] sm:$0xff]  }
  0x27   : > { %v3167_v12 = vld [vmem:[%s3336_s30 + $0x58] sm:$0xff]   ;;  %v3168_v13 = vld [vmem:[%s3260_s18 + $0x60] sm:$0xff]   ;;  %v3170_v15 = vld [vmem:[%s3260_s18 + $0x68] sm:$0xff]  }
  0x28   : > { %v3169_v14 = vld [vmem:[%s3336_s30 + $0x60] sm:$0xff]   ;;  %v3171_v16 = vld [vmem:[%s3336_s30 + $0x68] sm:$0xff]   ;;  %v3172_v17 = vld [vmem:[%s3260_s18 + $0x70] sm:$0xff]  }
  0x29   : > { %v3173_v18 = vld [vmem:[%s3336_s30 + $0x70] sm:$0xff]  }
  0x2a   : > { %2798 = vmatmul.mubr.msk.bf16.gmra.mrb[12].mxu1 %vm531_vm0, %v3109_v19  ;;  %v3174_v19 = vld [vmem:[%s3260_s18 + $0x78] sm:$0xff]  }
  0x2b   : > { %2866 = vmatmul.mubr.msk.bf16.gmra.mrb[12].mxu0 %vm531_vm0, %v3110_v20  ;;  %2801 = vmatprep.mubr.msk.bf16.mxu1 %vm531_vm0, %v3111_v21  ;;  %v3175_v20 = vld [vmem:[%s3336_s30 + $0x78] sm:$0xff]  }
  0x2c   : > { %2887 = vmatprep.mubr.msk.bf16.mxu0 %vm531_vm0, %v3112_v22 }
  0x32   : > { %2802 = vmatmul.mubr.msk.bf16.gmra.mrb[16].mxu1 %vm531_vm0, %v3114_v23 }
  0x33   : > { %2888 = vmatmul.mubr.msk.bf16.vlgmr.msra.gmra.mrb[0].mxu0 %vm531_vm0, %v3115_v24  ;;  %2805 = vmatprep.mubr.msk.bf16.mxu1 %vm531_vm0, %v3116_v25 }
  0x34   : > { %2920 = vmatpush3.bf16.msra.mxu0 %v3113_v6  ;;  %2891 = vmatprep.mubr.msk.bf16.mxu0 %vm531_vm0, %v3117_v26  ;;  %v3161_v6 = vld [vmem:[%s3336_s30 + $0x40] sm:$0xff]  }
  0x3a   : > { %2806 = vmatmul.mubr.msk.bf16.gmra.mrb[20].mxu1 %vm531_vm0, %v3118_v27 }
  0x3b   : > { %2892 = vmatmul.mubr.msk.bf16.gmra.mrb[4].mxu0 %vm531_vm0, %v3119_v28  ;;  %2809 = vmatprep.mubr.msk.bf16.mxu1 %vm531_vm0, %v3120_v29 }
  0x3c   : > { %2895 = vmatprep.mubr.msk.bf16.mxu0 %vm531_vm0, %v3121_v30 }
  0x42   : > { %2810 = vmatmul.mubr.msk.bf16.gmra.mrb[24].mxu1 %vm531_vm0, %v3122_v31 }
  0x43   : > { %2896 = vmatmul.mubr.msk.bf16.gmra.mrb[8].mxu0 %vm531_vm0, %v3123_v32  ;;  %2813 = vmatprep.mubr.msk.bf16.mxu1 %vm531_vm0, %v3124_v33 }
  0x44   : > { %2899 = vmatprep.mubr.msk.bf16.mxu0 %vm531_vm0, %v3125_v34 }
  0x4a   : > { %2814 = vmatmul.mubr.msk.bf16.gmra.mrb[28].mxu1 %vm531_vm0, %v3126_v35 }
  0x4b   : > { %2900 = vmatmul.mubr.msk.bf16.gmra.mrb[12].mxu0 %vm531_vm0, %v3127_v36  ;;  %2819 = vmatprep.mubr.msk.bf16.mxu1 %vm531_vm0, %v3128_v37 }
  0x4c   : > { %2903 = vmatprep.mubr.msk.bf16.mxu0 %vm531_vm0, %v3129_v38  ;;  %v3458_v38 = vld [vmem:[%s3576_s6] ss:$0 sm:$0xff] }
  0x52   : > { %2820 = vmatmul.mubr.msk.bf16.vlgmr.msra.gmra.mrb[0].mxu1 %vm531_vm0, %v3130_v39 }
  0x53   : > { %2954 = vmatpush3.bf16.msra.mxu1 %v3238_v1  ;;  %2904 = vmatmul.mubr.msk.bf16.gmra.mrb[16].mxu0 %vm531_vm0, %v3131_v40  ;;  %v3156_v1 = vld [vmem:[%s3313_s27 + $0x70] sm:$0xff]  }
  0x54   : > { %2823 = vmatprep.mubr.msk.bf16.mxu1 %vm531_vm0, %v3132_v41  ;;  %2907 = vmatprep.mubr.msk.bf16.mxu0 %vm531_vm0, %v3133_v42 }
  0x5a   : > { %2824 = vmatmul.mubr.msk.bf16.gmra.mrb[4].mxu1 %vm531_vm0, %v3134_v43 }
  0x5b   : > { %2908 = vmatmul.mubr.msk.bf16.gmra.mrb[20].mxu0 %vm531_vm0, %v3135_v44  ;;  %2827 = vmatprep.mubr.msk.bf16.mxu1 %vm531_vm0, %v3136_v45 }
  0x5c   : > { %2911 = vmatprep.mubr.msk.bf16.mxu0 %vm531_vm0, %v3137_v46 }
  0x62   : > { %2828 = vmatmul.mubr.msk.bf16.gmra.mrb[8].mxu1 %vm531_vm0, %v3138_v47 }
  0x63   : > { %2912 = vmatmul.mubr.msk.bf16.gmra.mrb[24].mxu0 %vm531_vm0, %v3139_v48  ;;  %2831 = vmatprep.mubr.msk.bf16.mxu1 %vm531_vm0, %v3140_v49 }
  0x64   : > { %2915 = vmatprep.mubr.msk.bf16.mxu0 %vm531_vm0, %v3141_v50 }
  0x6a   : > { %2832 = vmatmul.mubr.msk.bf16.gmra.mrb[12].mxu1 %vm531_vm0, %v3142_v51 }
  0x6b   : > { %2916 = vmatmul.mubr.msk.bf16.gmra.mrb[28].mxu0 %vm531_vm0, %v3143_v52  ;;  %2835 = vmatprep.mubr.msk.bf16.mxu1 %vm531_vm0, %v3144_v53 }
  0x6c   : > { %2921 = vmatprep.mubr.msk.bf16.mxu0 %vm531_vm0, %v3145_v54 }
  0x72   : > { %2836 = vmatmul.mubr.msk.bf16.gmra.mrb[16].mxu1 %vm531_vm0, %v3146_v55 }
  0x73   : > { %2922 = vmatmul.mubr.msk.bf16.vlgmr.msra.gmra.mrb[0].mxu0 %vm531_vm0, %v3147_v56  ;;  %2839 = vmatprep.mubr.msk.bf16.mxu1 %vm531_vm0, %v3148_v57 }
  0x74   : > { %2925 = vmatprep.mubr.msk.bf16.mxu0 %vm531_vm0, %v3149_v58 }
  0x7a   : > { %2840 = vmatmul.mubr.msk.bf16.gmra.mrb[20].mxu1 %vm531_vm0, %v3150_v59 }
  0x7b   : > { %2926 = vmatmul.mubr.msk.bf16.gmra.mrb[4].mxu0 %vm531_vm0, %v3151_v60  ;;  %2843 = vmatprep.mubr.msk.bf16.mxu1 %vm531_vm0, %v3152_v61 }
  0x7c   : > { %2929 = vmatprep.mubr.msk.bf16.mxu0 %vm531_vm0, %v3153_v62 }
  0x82   : > { %2844 = vmatmul.mubr.msk.bf16.gmra.mrb[24].mxu1 %vm531_vm0, %v3154_v63 }
  0x83   : > { %2930 = vmatmul.mubr.msk.bf16.gmra.mrb[8].mxu0 %vm531_vm0, %v3155_v0  ;;  %2847 = vmatprep.mubr.msk.bf16.mxu1 %vm531_vm0, %v3156_v1 }
  0x84   : > { %2933 = vmatprep.mubr.msk.bf16.mxu0 %vm531_vm0, %v3157_v2 }
  0x8a   : > { %2848 = vmatmul.mubr.msk.bf16.gmra.mrb[28].mxu1 %vm531_vm0, %v3158_v3 }
  0x8b   : > { %2934 = vmatmul.mubr.msk.bf16.gmra.mrb[12].mxu0 %vm531_vm0, %v3159_v4  ;;  %2869 = vmatprep.mubr.msk.bf16.mxu1 %vm531_vm0, %v3160_v5 }
  0x8c   : > { %2937 = vmatprep.mubr.msk.bf16.mxu0 %vm531_vm0, %v3161_v6 }
  0x92   : > { %2870 = vmatmul.mubr.msk.bf16.vlgmr.msra.gmra.mrb[16].mxu1 %vm531_vm0, %v3162_v7 }
  0x93   : > { %2938 = vmatmul.mubr.msk.bf16.gmra.mrb[16].mxu0 %vm531_vm0, %v3163_v8  ;;  %2873 = vmatprep.mubr.msk.bf16.mxu1 %vm531_vm0, %v3164_v9 }
  0x94   : > { %2941 = vmatprep.mubr.msk.bf16.mxu0 %vm531_vm0, %v3165_v10 }
  0x9a   : > { %2874 = vmatmul.mubr.msk.bf16.gmra.mrb[20].mxu1 %vm531_vm0, %v3166_v11 }
  0x9b   : > { %2942 = vmatmul.mubr.msk.bf16.gmra.mrb[20].mxu0 %vm531_vm0, %v3167_v12  ;;  %2877 = vmatprep.mubr.msk.bf16.mxu1 %vm531_vm0, %v3168_v13 }
  0x9c   : > { %2945 = vmatprep.mubr.msk.bf16.mxu0 %vm531_vm0, %v3169_v14 }
  0xa2   : > { %2878 = vmatmul.mubr.msk.bf16.gmra.mrb[24].mxu1 %vm531_vm0, %v3170_v15 }
  0xa3   : > { %2946 = vmatmul.mubr.msk.bf16.gmra.mrb[24].mxu0 %vm531_vm0, %v3171_v16  ;;  %2881 = vmatprep.mubr.msk.bf16.mxu1 %vm531_vm0, %v3172_v17 }
  0xa4   : > { %2949 = vmatprep.mubr.msk.bf16.mxu0 %vm531_vm0, %v3173_v18 }
  0xaa   : > { %2882 = vmatmul.mubr.msk.bf16.gmra.mrb[28].mxu1 %vm531_vm0, %v3174_v19 }
  0xab   : > { %2950 = vmatmul.mubr.msk.bf16.gmra.mrb[28].mxu0 %vm531_vm0, %v3175_v20 }
 0x125   : > { %v2821_v21 = vpop.f32.mrb[0].mxu1 }
 0x126   : > { %v909_v22 = vpop.f32.mrb[1].mxu1 }
 0x127   : > { %v2822_v23 = vpop.f32.mrb[2].mxu1 }
 0x128   : > { %v912_v24 = vpop.f32.mrb[3].mxu1 }
 0x12d   : > { %v2825_v25 = vpop.f32.mrb[4].mxu1 }
 0x12e   : > { %v925_v26 = vpop.f32.mrb[5].mxu1 }
 0x12f   : > { %v2826_v27 = vpop.f32.mrb[6].mxu1 }
 0x130   : > { %v928_v28 = vpop.f32.mrb[7].mxu1 }
 0x135   : > { %v2829_v29 = vpop.f32.mrb[8].mxu1 }
 0x136   : > { %v941_v30 = vpop.f32.mrb[9].mxu1 }
 0x137   : > { %v2830_v31 = vpop.f32.mrb[10].mxu1 }
 0x138   : > { %v3445_v32 = vpop.f32.mrb[11].mxu1 }
 0x13d   : > { %v3447_v33 = vpop.f32.mrb[12].mxu1 }
 0x13e   : > { %v3449_v34 = vpop.f32.mrb[13].mxu1 }
 0x13f   : > { %v3451_v35 = vpop.f32.mrb[14].mxu1 }
 0x140   : > { %v3453_v36 = vpop.f32.mrb[15].mxu1 }
 0x146   : > { %v2923_v37 = vpop.f32.mrb[0].mxu0 }
 0x147   : > { %v2955_v39 = vadd.f32 %v2923_v37, %v2821_v21  ;;  %v1954_v40 = vpop.f32.mrb[1].mxu0 }
 0x148   : > { %v2956_v41 = vadd.f32 %v1954_v40, %v909_v22  ;;  %v2924_v42 = vpop.f32.mrb[2].mxu0 }
 0x149   : > { %v2122_v43 = vadd.f32 %v2955_v39, %v3458_v38  ;;  %v2957_v44 = vadd.f32 %v2924_v42, %v2822_v23  ;;  %v1957_v45 = vpop.f32.mrb[3].mxu0 }
 0x14a   : > { %v2120_v46 = vadd.f32 %v2956_v41, %v3458_v38  ;;  %v2958_v47 = vadd.f32 %v1957_v45, %v912_v24 }
 0x14b   : > { %v2154_v48 = vmax.f32 %v2122_v43, 0.0  ;;  %v2123_v49 = vadd.f32 %v2957_v44, %v3458_v38 }
 0x14c   : > { %v2152_v50 = vmax.f32 %v2120_v46, 0.0  ;;  %v2121_v51 = vadd.f32 %v2958_v47, %v3458_v38 }
 0x14d   : > { %v2668_v52 = vpack.c.bf16 %v2154_v48, %v2154_v48  ;;  %v2155_v53 = vmax.f32 %v2123_v49, 0.0 }
 0x14e   : > { %v2666_v54 = vpack.c.bf16 %v2152_v50, %v2152_v50  ;;  %v2153_v55 = vmax.f32 %v2121_v51, 0.0  ;;  %v2927_v56 = vpop.f32.mrb[4].mxu0 }
 0x14f   : > { %2315 = vst.msk [vmem:[%s3467_s13 + $0x8] sm:$0xf] %vm2312_vm1, %v2668_v52  ;;  %v2669_v57 = vpack.c.bf16 %v2155_v53, %v2155_v53  ;;  %v2959_v58 = vadd.f32 %v2927_v56, %v2825_v25  ;;  %v1970_v59 = vpop.f32.mrb[5].mxu0 }
 0x150   : > { %2313 = vst.msk [vmem:[%s3467_s13] sm:$0xf] %vm2312_vm1, %v2666_v54  ;;  %v2667_v60 = vpack.c.bf16 %v2153_v55, %v2153_v55  ;;  %v2960_v61 = vadd.f32 %v1970_v59, %v925_v26  ;;  %v2928_v62 = vpop.f32.mrb[6].mxu0 }
 0x151   : > { %2316 = vst.msk [vmem:[%s3467_s13 + $0xc] sm:$0xf] %vm2312_vm1, %v2669_v57  ;;  %v2126_v63 = vadd.f32 %v2959_v58, %v3458_v38  ;;  %v2961_v0 = vadd.f32 %v2928_v62, %v2826_v27  ;;  %v1973_v1 = vpop.f32.mrb[7].mxu0 }
 0x152   : > { %2314 = vst.msk [vmem:[%s3467_s13 + $0x4] sm:$0xf] %vm2312_vm1, %v2667_v60  ;;  %v2124_v2 = vadd.f32 %v2960_v61, %v3458_v38  ;;  %v2962_v3 = vadd.f32 %v1973_v1, %v928_v28 }
 0x153   : > { %v2158_v4 = vmax.f32 %v2126_v63, 0.0  ;;  %v2127_v5 = vadd.f32 %v2961_v0, %v3458_v38 }
 0x154   : > { %v2156_v6 = vmax.f32 %v2124_v2, 0.0  ;;  %v2125_v7 = vadd.f32 %v2962_v3, %v3458_v38 }
 0x155   : > { %v2672_v8 = vpack.c.bf16 %v2158_v4, %v2158_v4  ;;  %v2159_v9 = vmax.f32 %v2127_v5, 0.0 }
 0x156   : > { %v2670_v10 = vpack.c.bf16 %v2156_v6, %v2156_v6  ;;  %v2157_v11 = vmax.f32 %v2125_v7, 0.0  ;;  %v2931_v12 = vpop.f32.mrb[8].mxu0 }
 0x157   : > { %2319 = vst.msk [vmem:[%s3467_s13 + $0x18] sm:$0xf] %vm2312_vm1, %v2672_v8  ;;  %v2673_v13 = vpack.c.bf16 %v2159_v9, %v2159_v9  ;;  %v2963_v14 = vadd.f32 %v2931_v12, %v2829_v29  ;;  %v1986_v15 = vpop.f32.mrb[9].mxu0 }
 0x158   : > { %2317 = vst.msk [vmem:[%s3467_s13 + $0x10] sm:$0xf] %vm2312_vm1, %v2670_v10  ;;  %v2671_v16 = vpack.c.bf16 %v2157_v11, %v2157_v11  ;;  %v2964_v17 = vadd.f32 %v1986_v15, %v941_v30  ;;  %v2932_v18 = vpop.f32.mrb[10].mxu0 }
 0x159   : > { %2320 = vst.msk [vmem:[%s3467_s13 + $0x1c] sm:$0xf] %vm2312_vm1, %v2673_v13  ;;  %v2130_v19 = vadd.f32 %v2963_v14, %v3458_v38  ;;  %v2965_v20 = vadd.f32 %v2932_v18, %v2830_v31  ;;  %v1989_v21 = vpop.f32.mrb[11].mxu0 }
 0x15a   : > { %2318 = vst.msk [vmem:[%s3467_s13 + $0x14] sm:$0xf] %vm2312_vm1, %v2671_v16  ;;  %v2128_v22 = vadd.f32 %v2964_v17, %v3458_v38  ;;  %v2966_v23 = vadd.f32 %v1989_v21, %v3445_v32 }
 0x15b   : > { %v2162_v24 = vmax.f32 %v2130_v19, 0.0  ;;  %v2131_v25 = vadd.f32 %v2965_v20, %v3458_v38 }
 0x15c   : > { %v2160_v26 = vmax.f32 %v2128_v22, 0.0  ;;  %v2129_v27 = vadd.f32 %v2966_v23, %v3458_v38 }
 0x15d   : > { %v2676_v28 = vpack.c.bf16 %v2162_v24, %v2162_v24  ;;  %v2163_v29 = vmax.f32 %v2131_v25, 0.0 }
 0x15e   : > { %v2674_v30 = vpack.c.bf16 %v2160_v26, %v2160_v26  ;;  %v2161_v31 = vmax.f32 %v2129_v27, 0.0  ;;  %v2935_v37 = vpop.f32.mrb[12].mxu0 }
 0x15f   : > { %2323 = vst.msk [vmem:[%s3467_s13 + $0x28] sm:$0xf] %vm2312_vm1, %v2676_v28  ;;  %v2677_v39 = vpack.c.bf16 %v2163_v29, %v2163_v29  ;;  %v2967_v40 = vadd.f32 %v2935_v37, %v3447_v33  ;;  %v2002_v41 = vpop.f32.mrb[13].mxu0 }
 0x160   : > { %2321 = vst.msk [vmem:[%s3467_s13 + $0x20] sm:$0xf] %vm2312_vm1, %v2674_v30  ;;  %v2675_v32 = vpack.c.bf16 %v2161_v31, %v2161_v31  ;;  %v2968_v42 = vadd.f32 %v2002_v41, %v3449_v34  ;;  %v2936_v43 = vpop.f32.mrb[14].mxu0 }
 0x161   : > { %2324 = vst.msk [vmem:[%s3467_s13 + $0x2c] sm:$0xf] %vm2312_vm1, %v2677_v39  ;;  %v2134_v44 = vadd.f32 %v2967_v40, %v3458_v38  ;;  %v2969_v45 = vadd.f32 %v2936_v43, %v3451_v35  ;;  %v2005_v46 = vpop.f32.mrb[15].mxu0 }
 0x162   : > { %2322 = vst.msk [vmem:[%s3467_s13 + $0x24] sm:$0xf] %vm2312_vm1, %v2675_v32  ;;  %v2132_v47 = vadd.f32 %v2968_v42, %v3458_v38  ;;  %v2970_v33 = vadd.f32 %v2005_v46, %v3453_v36 }
 0x163   : > { %v2166_v48 = vmax.f32 %v2134_v44, 0.0  ;;  %v2135_v49 = vadd.f32 %v2969_v45, %v3458_v38 }
 0x164   : > { %v2164_v34 = vmax.f32 %v2132_v47, 0.0  ;;  %v2133_v50 = vadd.f32 %v2970_v33, %v3458_v38 }
 0x165   : > { %v2680_v51 = vpack.c.bf16 %v2166_v48, %v2166_v48  ;;  %v2167_v52 = vmax.f32 %v2135_v49, 0.0  ;;  %v2871_v53 = vpop.f32.mrb[16].mxu1 }
 0x166   : > { %v2678_v35 = vpack.c.bf16 %v2164_v34, %v2164_v34  ;;  %v2165_v54 = vmax.f32 %v2133_v50, 0.0  ;;  %v2939_v55 = vpop.f32.mrb[16].mxu0  ;;  %v1300_v56 = vpop.f32.mrb[17].mxu1 }
 0x167   : > { %2327 = vst.msk [vmem:[%s3467_s13 + $0x38] sm:$0xf] %vm2312_vm1, %v2680_v51  ;;  %v2681_v57 = vpack.c.bf16 %v2167_v52, %v2167_v52  ;;  %v2971_v36 = vadd.f32 %v2939_v55, %v2871_v53  ;;  %v2018_v58 = vpop.f32.mrb[17].mxu0  ;;  %v2872_v59 = vpop.f32.mrb[18].mxu1 }
 0x168   : > { %2325 = vst.msk [vmem:[%s3467_s13 + $0x30] sm:$0xf] %vm2312_vm1, %v2678_v35  ;;  %v2679_v60 = vpack.c.bf16 %v2165_v54, %v2165_v54  ;;  %v2972_v61 = vadd.f32 %v2018_v58, %v1300_v56  ;;  %v2940_v62 = vpop.f32.mrb[18].mxu0  ;;  %v1303_v63 = vpop.f32.mrb[19].mxu1 }
 0x169   : > { %2328 = vst.msk [vmem:[%s3467_s13 + $0x3c] sm:$0xf] %vm2312_vm1, %v2681_v57  ;;  %v2138_v0 = vadd.f32 %v2971_v36, %v3458_v38  ;;  %v2973_v1 = vadd.f32 %v2940_v62, %v2872_v59  ;;  %v2021_v2 = vpop.f32.mrb[19].mxu0 }
 0x16a   : > { %2326 = vst.msk [vmem:[%s3467_s13 + $0x34] sm:$0xf] %vm2312_vm1, %v2679_v60  ;;  %v2136_v3 = vadd.f32 %v2972_v61, %v3458_v38  ;;  %v2974_v4 = vadd.f32 %v2021_v2, %v1303_v63 }
 0x16b   : > { %v2170_v5 = vmax.f32 %v2138_v0, 0.0  ;;  %v2139_v6 = vadd.f32 %v2973_v1, %v3458_v38 }
 0x16c   : > { %v2168_v7 = vmax.f32 %v2136_v3, 0.0  ;;  %v2137_v8 = vadd.f32 %v2974_v4, %v3458_v38 }
 0x16d   : > { %v2684_v9 = vpack.c.bf16 %v2170_v5, %v2170_v5  ;;  %v2171_v10 = vmax.f32 %v2139_v6, 0.0  ;;  %v2875_v11 = vpop.f32.mrb[20].mxu1 }
 0x16e   : > { %v2682_v12 = vpack.c.bf16 %v2168_v7, %v2168_v7  ;;  %v2169_v13 = vmax.f32 %v2137_v8, 0.0  ;;  %v2943_v14 = vpop.f32.mrb[20].mxu0  ;;  %v1316_v15 = vpop.f32.mrb[21].mxu1 }
 0x16f   : > { %2331 = vst.msk [vmem:[%s3467_s13 + $0x48] sm:$0xf] %vm2312_vm1, %v2684_v9  ;;  %v2685_v16 = vpack.c.bf16 %v2171_v10, %v2171_v10  ;;  %v2975_v17 = vadd.f32 %v2943_v14, %v2875_v11  ;;  %v2034_v18 = vpop.f32.mrb[21].mxu0  ;;  %v2876_v19 = vpop.f32.mrb[22].mxu1 }
 0x170   : > { %2329 = vst.msk [vmem:[%s3467_s13 + $0x40] sm:$0xf] %vm2312_vm1, %v2682_v12  ;;  %v2683_v20 = vpack.c.bf16 %v2169_v13, %v2169_v13  ;;  %v2976_v21 = vadd.f32 %v2034_v18, %v1316_v15  ;;  %v2944_v22 = vpop.f32.mrb[22].mxu0  ;;  %v1319_v23 = vpop.f32.mrb[23].mxu1 }
 0x171   : > { %2332 = vst.msk [vmem:[%s3467_s13 + $0x4c] sm:$0xf] %vm2312_vm1, %v2685_v16  ;;  %v2142_v24 = vadd.f32 %v2975_v17, %v3458_v38  ;;  %v2977_v25 = vadd.f32 %v2944_v22, %v2876_v19  ;;  %v2037_v26 = vpop.f32.mrb[23].mxu0 }
 0x172   : > { %2330 = vst.msk [vmem:[%s3467_s13 + $0x44] sm:$0xf] %vm2312_vm1, %v2683_v20  ;;  %v2140_v27 = vadd.f32 %v2976_v21, %v3458_v38  ;;  %v2978_v28 = vadd.f32 %v2037_v26, %v1319_v23 }
 0x173   : > { %v2174_v29 = vmax.f32 %v2142_v24, 0.0  ;;  %v2143_v30 = vadd.f32 %v2977_v25, %v3458_v38 }
 0x174   : > { %v2172_v31 = vmax.f32 %v2140_v27, 0.0  ;;  %v2141_v37 = vadd.f32 %v2978_v28, %v3458_v38 }
 0x175   : > { %v2688_v39 = vpack.c.bf16 %v2174_v29, %v2174_v29  ;;  %v2175_v40 = vmax.f32 %v2143_v30, 0.0  ;;  %v2879_v41 = vpop.f32.mrb[24].mxu1 }
 0x176   : > { %v2686_v32 = vpack.c.bf16 %v2172_v31, %v2172_v31  ;;  %v2173_v42 = vmax.f32 %v2141_v37, 0.0  ;;  %v2947_v43 = vpop.f32.mrb[24].mxu0  ;;  %v1332_v44 = vpop.f32.mrb[25].mxu1 }
 0x177   : > { %2335 = vst.msk [vmem:[%s3467_s13 + $0x58] sm:$0xf] %vm2312_vm1, %v2688_v39  ;;  %v2689_v45 = vpack.c.bf16 %v2175_v40, %v2175_v40  ;;  %v2979_v46 = vadd.f32 %v2947_v43, %v2879_v41  ;;  %v2050_v47 = vpop.f32.mrb[25].mxu0  ;;  %v2880_v33 = vpop.f32.mrb[26].mxu1 }
 0x178   : > { %2333 = vst.msk [vmem:[%s3467_s13 + $0x50] sm:$0xf] %vm2312_vm1, %v2686_v32  ;;  %v2687_v48 = vpack.c.bf16 %v2173_v42, %v2173_v42  ;;  %v2980_v49 = vadd.f32 %v2050_v47, %v1332_v44  ;;  %v2948_v34 = vpop.f32.mrb[26].mxu0  ;;  %v1335_v50 = vpop.f32.mrb[27].mxu1 }
 0x179   : > { %2336 = vst.msk [vmem:[%s3467_s13 + $0x5c] sm:$0xf] %vm2312_vm1, %v2689_v45  ;;  %v2146_v51 = vadd.f32 %v2979_v46, %v3458_v38  ;;  %v2981_v52 = vadd.f32 %v2948_v34, %v2880_v33  ;;  %v2053_v53 = vpop.f32.mrb[27].mxu0 }
 0x17a   : > { %2334 = vst.msk [vmem:[%s3467_s13 + $0x54] sm:$0xf] %vm2312_vm1, %v2687_v48  ;;  %v2144_v35 = vadd.f32 %v2980_v49, %v3458_v38  ;;  %v2982_v54 = vadd.f32 %v2053_v53, %v1335_v50 }
 0x17b   : > { %v2178_v55 = vmax.f32 %v2146_v51, 0.0  ;;  %v2147_v56 = vadd.f32 %v2981_v52, %v3458_v38 }
 0x17c   : > { %v2176_v57 = vmax.f32 %v2144_v35, 0.0  ;;  %v2145_v36 = vadd.f32 %v2982_v54, %v3458_v38 }
 0x17d   : > { %v2692_v58 = vpack.c.bf16 %v2178_v55, %v2178_v55  ;;  %v2179_v59 = vmax.f32 %v2147_v56, 0.0  ;;  %v2883_v60 = vpop.f32.mrb[28].mxu1 }
 0x17e   : > { %v2690_v61 = vpack.c.bf16 %v2176_v57, %v2176_v57  ;;  %v2177_v62 = vmax.f32 %v2145_v36, 0.0  ;;  %v2951_v63 = vpop.f32.mrb[28].mxu0  ;;  %v1348_v0 = vpop.f32.mrb[29].mxu1 }
 0x17f   : > { %2339 = vst.msk [vmem:[%s3467_s13 + $0x68] sm:$0xf] %vm2312_vm1, %v2692_v58  ;;  %v2693_v1 = vpack.c.bf16 %v2179_v59, %v2179_v59  ;;  %v2983_v2 = vadd.f32 %v2951_v63, %v2883_v60  ;;  %v2066_v3 = vpop.f32.mrb[29].mxu0  ;;  %v2884_v4 = vpop.f32.mrb[30].mxu1 }
 0x180   : > { %2337 = vst.msk [vmem:[%s3467_s13 + $0x60] sm:$0xf] %vm2312_vm1, %v2690_v61  ;;  %v2691_v5 = vpack.c.bf16 %v2177_v62, %v2177_v62  ;;  %v2984_v6 = vadd.f32 %v2066_v3, %v1348_v0  ;;  %v2952_v7 = vpop.f32.mrb[30].mxu0  ;;  %v1351_v8 = vpop.f32.mrb[31].mxu1 }
 0x181   : > { %2340 = vst.msk [vmem:[%s3467_s13 + $0x6c] sm:$0xf] %vm2312_vm1, %v2693_v1  ;;  %v2150_v9 = vadd.f32 %v2983_v2, %v3458_v38  ;;  %v2985_v10 = vadd.f32 %v2952_v7, %v2884_v4  ;;  %v2069_v11 = vpop.f32.mrb[31].mxu0 }
 0x182   : > { %2338 = vst.msk [vmem:[%s3467_s13 + $0x64] sm:$0xf] %vm2312_vm1, %v2691_v5  ;;  %v2148_v12 = vadd.f32 %v2984_v6, %v3458_v38  ;;  %v2986_v13 = vadd.f32 %v2069_v11, %v1351_v8 }
 0x183   : > { %v2182_v14 = vmax.f32 %v2150_v9, 0.0  ;;  %v2151_v15 = vadd.f32 %v2985_v10, %v3458_v38 }
 0x184   : > { %v2180_v16 = vmax.f32 %v2148_v12, 0.0  ;;  %v2149_v17 = vadd.f32 %v2986_v13, %v3458_v38 }
 0x185   : > { %v2696_v18 = vpack.c.bf16 %v2182_v14, %v2182_v14  ;;  %v2183_v19 = vmax.f32 %v2151_v15, 0.0 }
 0x186   : > { %v2694_v20 = vpack.c.bf16 %v2180_v16, %v2180_v16  ;;  %v2181_v21 = vmax.f32 %v2149_v17, 0.0 }
 0x187   : > { %2343 = vst.msk [vmem:[%s3467_s13 + $0x78] sm:$0xf] %vm2312_vm1, %v2696_v18  ;;  %v2697_v22 = vpack.c.bf16 %v2183_v19, %v2183_v19 }
 0x188   : > { %2341 = vst.msk [vmem:[%s3467_s13 + $0x70] sm:$0xf] %vm2312_vm1, %v2694_v20  ;;  %v2695_v23 = vpack.c.bf16 %v2181_v21, %v2181_v21 }
 0x189   : > { %2344 = vst.msk [vmem:[%s3467_s13 + $0x7c] sm:$0xf] %vm2312_vm1, %v2697_v22 }
 0x18a   : > { %2342 = vst.msk [vmem:[%s3467_s13 + $0x74] sm:$0xf] %vm2312_vm1, %v2695_v23 }
 0x18b PF: > { %s17_s24 = sadd.s32 1, %s3182_s24  }
 0x18c   : > { %p14_p4 = scmp.ge.s32.totalorder %s17_s24, 4  }
 0x18e   :  { %16 = sbr.rel (!%p14_p4) target bundleno = 1 (0x1), region = 90 }

</bundles_post_ra>
